<compile_context>
chip_gen: v6e
topology: v6e:2x2x1
jax: 0.10.0
libtpu: 0.0.40
codegen_flags: <defaults>
</compile_context>

<pallas_src>
import functools

import jax
import jax.numpy as jnp
from jax import lax
from jax.experimental import pallas as pl
from jax.experimental.pallas import tpu as pltpu


def _sigmoid_via_tanh(x):
    # sigmoid(x) = 0.5 * (tanh(0.5 * x) + 1): one EUP op, two cheap VPU ops.
    return 0.5 * (jnp.tanh(0.5 * x) + 1.0)


def _lstm_recurrence_kernel(gx_ref, whh_ref, hseq_ref, h_ref, c_ref, *,
                            hidden_dim, t_chunk, t_total, mask_tail, unroll):
    """One grid step = one chunk of `t_chunk` timesteps.

    gx_ref  : (t_chunk, B, 4H) bf16  precomputed x-part of the gates (+ biases)
    whh_ref : (H, 4H)          bf16  recurrent weight (transposed)
    hseq_ref: (t_chunk, B, H)  bf16  per-step hidden states (output)
    h_ref   : (B, H)           f32   carried / final hidden state (resident)
    c_ref   : (B, H)           f32   carried / final cell  state (resident)
    """
    chunk = pl.program_id(0)
    H = hidden_dim

    # hidden=None case: zero-init the carried state on the first chunk.
    @pl.when(chunk == 0)
    def _():
        h_ref[...] = jnp.zeros_like(h_ref)
        c_ref[...] = jnp.zeros_like(c_ref)

    # Hoist the (H, 4H) bf16 weight load out of the time loop.
    w_hh = whh_ref[...]

    def step(i, carry):
        h, c = carry                                       # f32 (B, H)
        # x-gates were precomputed (biases folded in); cast to f32 for the
        # elementwise path (keeps v5e on its f32 VPU/EUP).
        gx = gx_ref[i].astype(jnp.float32)                 # (B, 4H)
        # bf16 operands into the MXU, f32 accumulation.
        gates = gx + jnp.dot(h.astype(jnp.bfloat16), w_hh,
                             preferred_element_type=jnp.float32)

        i_g = _sigmoid_via_tanh(gates[:, 0 * H:1 * H])
        f_g = _sigmoid_via_tanh(gates[:, 1 * H:2 * H])
        g_g = jnp.tanh(gates[:, 2 * H:3 * H])
        o_g = _sigmoid_via_tanh(gates[:, 3 * H:4 * H])

        c_new = f_g * c + i_g * g_g
        h_new = o_g * jnp.tanh(c_new)

        # Lane-dense (B, H) bf16 store of this step's hidden state.
        hseq_ref[i] = h_new.astype(hseq_ref.dtype)

        if mask_tail:
            # Only reachable when t_chunk does not divide T; padded tail
            # timesteps must not corrupt the carried state.
            valid = (chunk * t_chunk + i) < t_total
            h_new = jnp.where(valid, h_new, h)
            c_new = jnp.where(valid, c_new, c)
        return h_new, c_new

    h, c = lax.fori_loop(0, t_chunk, step, (h_ref[...], c_ref[...]),
                         unroll=unroll)

    # Unconditional writeback each chunk: keeps the resident output blocks
    # well-defined on every grid iteration and costs only a BxH store.
    h_ref[...] = h
    c_ref[...] = c


def lstm_poet_forward(x_ids, params, *, t_chunk_cap=128):
    """x_ids: int32 (B, T). Returns (logits (B,T,V), (h_n, c_n)) like PyTorch."""
    emb = params["embedding"]          # (V, E)
    w_ih_t = params["w_ih_t"]          # (E, 4H)
    w_hh_t = params["w_hh_t"]          # (H, 4H)
    b_gates = params["b_gates"]        # (1, 4H)  == b_ih + b_hh
    w_fc_t = params["w_fc_t"]          # (H, V)
    b_fc = params["b_fc"]              # (1, V)

    B, T = x_ids.shape
    V, E = emb.shape
    H = w_hh_t.shape[0]

    # ---- hoisted input projection -------------------------------------------
    # embedding followed by x @ W_ih^T + b is a fixed linear map of the token
    # id: fold it into one (V, 4H) table, cast to bf16, and gather per token.
    gate_table = (jnp.dot(emb, w_ih_t, preferred_element_type=jnp.float32)
                  + b_gates).astype(jnp.bfloat16)          # (V, 4H) bf16

    # Pad batch to a sublane multiple (>= 8); keep the whole batch in one block
    # (it is the M dim of the recurrent matmul).
    B_pad = max(8, -(-B // 8) * 8)

    # Chunk the time axis; prefer a chunk size that divides T (no tail-mask on
    # the serial path) as long as it stays within 2x of the cap.
    t_chunk = max(1, min(t_chunk_cap, T))
    if T % t_chunk != 0:
        for cand in range(t_chunk, max(1, t_chunk // 2) - 1, -1):
            if T % cand == 0:
                t_chunk = cand
                break
    n_chunks = pl.cdiv(T, t_chunk)
    T_pad = n_chunks * t_chunk
    mask_tail = (T_pad != T)
    unroll = min(8, t_chunk)

    ids = x_ids
    if B_pad != B:
        ids = jnp.pad(ids, ((0, B_pad - B), (0, 0)))       # pad rows w/ token 0
    # Gather with transposed ids -> time-major layout directly, no HBM
    # transpose of the (T, B, 4H) gates tensor.
    gates_x = jnp.take(gate_table, ids.T, axis=0)          # (T, B_pad, 4H) bf16
    if mask_tail:
        gates_x = jnp.pad(gates_x, ((0, T_pad - T), (0, 0), (0, 0)))

    kernel = functools.partial(_lstm_recurrence_kernel,
                               hidden_dim=H, t_chunk=t_chunk, t_total=T,
                               mask_tail=mask_tail, unroll=unroll)

    h_seq_tm, h_n, c_n = pl.pallas_call(
        kernel,
        out_shape=(
            jax.ShapeDtypeStruct((T_pad, B_pad, H), jnp.bfloat16),  # h per step
            jax.ShapeDtypeStruct((B_pad, H), jnp.float32),          # h_n
            jax.ShapeDtypeStruct((B_pad, H), jnp.float32),          # c_n
        ),
        grid_spec=pltpu.PrefetchScalarGridSpec(
            num_scalar_prefetch=0,
            grid=(n_chunks,),
            in_specs=[
                # chunk of precomputed gate inputs, streamed over time (bf16)
                pl.BlockSpec((t_chunk, B_pad, 4 * H), lambda c: (c, 0, 0)),
                # recurrent weight (bf16), constant block across the grid
                pl.BlockSpec((H, 4 * H), lambda c: (0, 0)),
            ],
            out_specs=[
                pl.BlockSpec((t_chunk, B_pad, H), lambda c: (c, 0, 0)),
                pl.BlockSpec((B_pad, H), lambda c: (0, 0)),   # resident carry
                pl.BlockSpec((B_pad, H), lambda c: (0, 0)),   # resident carry
            ],
        ),
        compiler_params=pltpu.CompilerParams(
            dimension_semantics=("arbitrary",),   # time chunks are sequential
            vmem_limit_bytes=32 * 1024 * 1024,    # safe on v5e/v6e/v7x
        ),
    )(gates_x, w_hh_t.astype(jnp.bfloat16))

    # ---- hoisted output projection ------------------------------------------
    # One large matmul outside the recurrence.  Transpose whichever tensor is
    # smaller: when V <= H run fc on the kernel's (T, B, H) layout and
    # transpose the logits; otherwise transpose the hidden sequence first.
    w_fc_bf = w_fc_t.astype(jnp.bfloat16)
    if V <= H:
        logits_tb = (jnp.dot(h_seq_tm.reshape(T_pad * B_pad, H), w_fc_bf,
                             preferred_element_type=jnp.float32)
                     + b_fc).reshape(T_pad, B_pad, V)
        logits = jnp.transpose(logits_tb[:T, :B], (1, 0, 2))      # (B, T, V)
    else:
        h_bt = jnp.transpose(h_seq_tm[:T, :B], (1, 0, 2))         # (B, T, H)
        logits = (jnp.dot(h_bt.reshape(B * T, H), w_fc_bf,
                          preferred_element_type=jnp.float32)
                  + b_fc).reshape(B, T, V)

    # hidden state like nn.LSTM: (num_layers=1, B, H)
    return logits, (h_n[:B][None], c_n[:B][None])


def _reference_forward(x_ids, params):
    """Pure-JAX f32 reference mirroring the PyTorch forward semantics."""
    emb = params["embedding"]
    w_ih_t, w_hh_t = params["w_ih_t"], params["w_hh_t"]
    b_gates = params["b_gates"][0]
    w_fc_t, b_fc = params["w_fc_t"], params["b_fc"][0]
    H = w_hh_t.shape[0]
    x_emb = jnp.take(emb, x_ids, axis=0)           # (B, T, E)
    B = x_emb.shape[0]

    def step(carry, x_t):
        h, c = carry
        gates = x_t @ w_ih_t + h @ w_hh_t + b_gates
        i = jax.nn.sigmoid(gates[:, 0 * H:1 * H])
        f = jax.nn.sigmoid(gates[:, 1 * H:2 * H])
        g = jnp.tanh(gates[:, 2 * H:3 * H])
        o = jax.nn.sigmoid(gates[:, 3 * H:4 * H])
        c = f * c + i * g
        h = o * jnp.tanh(c)
        return (h, c), h

    h0 = jnp.zeros((B, H), jnp.float32)
    (h_n, c_n), hs = jax.lax.scan(step, (h0, h0),
                                  jnp.transpose(x_emb, (1, 0, 2)))
    out = jnp.transpose(hs, (1, 0, 2)) @ w_fc_t + b_fc
    return out, (h_n[None], c_n[None])


def init_params(key, vocab_size, embedding_dim, hidden_dim):
    ks = jax.random.split(key, 7)
    s = 1.0 / jnp.sqrt(hidden_dim)
    return {
        "embedding": jax.random.normal(ks[0], (vocab_size, embedding_dim),
                                       jnp.float32),
        # stored pre-transposed: (E, 4H), (H, 4H)
        "w_ih_t": jax.random.uniform(ks[1], (embedding_dim, 4 * hidden_dim),
                                     jnp.float32, -s, s),
        "w_hh_t": jax.random.uniform(ks[2], (hidden_dim, 4 * hidden_dim),
                                     jnp.float32, -s, s),
        "b_gates": (jax.random.uniform(ks[3], (1, 4 * hidden_dim),
                                       jnp.float32, -s, s)
                    + jax.random.uniform(ks[4], (1, 4 * hidden_dim),
                                         jnp.float32, -s, s)),
        "w_fc_t": jax.random.uniform(ks[5], (hidden_dim, vocab_size),
                                     jnp.float32, -s, s),
        "b_fc": jax.random.uniform(ks[6], (1, vocab_size),
                                   jnp.float32, -s, s),
    }


if __name__ == "__main__":
    vocab_size = 64
    embedding_dim = 128
    hidden_dim = 256
    batch, seq = 2, 8

    key = jax.random.PRNGKey(0)
    k_param, k_data = jax.random.split(key)
    params = init_params(k_param, vocab_size, embedding_dim, hidden_dim)
    x_ids = jax.random.randint(k_data, (batch, seq), 0, vocab_size,
                               dtype=jnp.int32)

    logits, (h_n, c_n) = jax.jit(lstm_poet_forward)(x_ids, params)
    jax.block_until_ready((logits, h_n, c_n))

    ref_logits, (ref_h, ref_c) = _reference_forward(x_ids, params)
    assert logits.shape == (batch, seq, vocab_size)
    assert h_n.shape == (1, batch, hidden_dim)
    assert c_n.shape == (1, batch, hidden_dim)
    # bf16 at the MXU / memory boundaries -> looser tolerance than pure f32.
    assert jnp.allclose(logits, ref_logits, rtol=3e-2, atol=3e-2)
    assert jnp.allclose(h_n, ref_h, rtol=3e-2, atol=3e-2)
    assert jnp.allclose(c_n, ref_c, rtol=3e-2, atol=3e-2)

    print("KERNEL_OK")
</pallas_src>

<mosaic_0001>
module attributes {stable_mosaic.version = 11 : i64} {
  func.func @_lstm_recurrence_kernel(%arg0: i32, %arg1: memref<8x8x1024xbf16, #tpu.memory_space<vmem>>, %arg2: memref<256x1024xbf16, #tpu.memory_space<vmem>>, %arg3: memref<8x8x256xbf16, #tpu.memory_space<vmem>>, %arg4: memref<8x256xf32, #tpu.memory_space<vmem>>, %arg5: memref<8x256xf32, #tpu.memory_space<vmem>>) attributes {dimension_semantics = [#tpu.dimension_semantics<arbitrary>], iteration_bounds = array<i64: 1>, scalar_prefetch = 0 : i64, scratch_operands = 0 : i64, tpu.core_type = #tpu.core_type<tc>, window_params = [{transform_indices = @transform_0, window_bounds = array<i64: 8, 8, 1024>}, {pipeline_mode = #tpu.pipeline_mode<synchronous>, transform_indices = @transform_1, window_bounds = array<i64: 256, 1024>}, {transform_indices = @transform_2, window_bounds = array<i64: 8, 8, 256>}, {pipeline_mode = #tpu.pipeline_mode<synchronous>, transform_indices = @transform_3, window_bounds = array<i64: 8, 256>}, {pipeline_mode = #tpu.pipeline_mode<synchronous>, transform_indices = @transform_4, window_bounds = array<i64: 8, 256>}]} {
    %c0_i32 = arith.constant 0 : i32
    %0 = arith.cmpi eq, %arg0, %c0_i32 : i32
    %1 = arith.extui %0 : i1 to i32
    %c0_i32_0 = arith.constant 0 : i32
    %2 = arith.cmpi ne, %1, %c0_i32_0 : i32
    scf.if %2 {
      %cst_122 = arith.constant 0.000000e+00 : f32
      %352 = vector.broadcast %cst_122 : f32 to vector<8x256xf32>
      %c0_123 = arith.constant 0 : index
      %c0_124 = arith.constant 0 : index
      %353 = vector.load %arg4[%c0_123, %c0_124] : memref<8x256xf32, #tpu.memory_space<vmem>>, vector<8x256xf32>
      tpu.vector_store %arg4[%c0_123, %c0_124], %352 {strides = array<i32>} : memref<8x256xf32, #tpu.memory_space<vmem>>, vector<8x256xf32>,
      %cst_125 = arith.constant 0.000000e+00 : f32
      %354 = vector.broadcast %cst_125 : f32 to vector<8x256xf32>
      %c0_126 = arith.constant 0 : index
      %c0_127 = arith.constant 0 : index
      %355 = vector.load %arg5[%c0_126, %c0_127] : memref<8x256xf32, #tpu.memory_space<vmem>>, vector<8x256xf32>
      tpu.vector_store %arg5[%c0_126, %c0_127], %354 {strides = array<i32>} : memref<8x256xf32, #tpu.memory_space<vmem>>, vector<8x256xf32>,
    } else {
    }
    %c0 = arith.constant 0 : index
    %c0_1 = arith.constant 0 : index
    %3 = vector.load %arg2[%c0, %c0_1] : memref<256x1024xbf16, #tpu.memory_space<vmem>>, vector<256x1024xbf16>
    %c0_2 = arith.constant 0 : index
    %c0_3 = arith.constant 0 : index
    %4 = vector.load %arg4[%c0_2, %c0_3] : memref<8x256xf32, #tpu.memory_space<vmem>>, vector<8x256xf32>
    %c0_4 = arith.constant 0 : index
    %c0_5 = arith.constant 0 : index
    %5 = vector.load %arg5[%c0_4, %c0_5] : memref<8x256xf32, #tpu.memory_space<vmem>>, vector<8x256xf32>
    %c0_i32_6 = arith.constant 0 : i32
    %6 = arith.index_cast %c0_i32_6 : i32 to index
    %c0_7 = arith.constant 0 : index
    %c0_8 = arith.constant 0 : index
    %7 = vector.load %arg1[%6, %c0_7, %c0_8] : memref<8x8x1024xbf16, #tpu.memory_space<vmem>>, vector<1x8x1024xbf16>
    %8 = vector.shape_cast %7 : vector<1x8x1024xbf16> to vector<8x1024xbf16>
    %9 = arith.extf %8 : vector<8x1024xbf16> to vector<8x1024xf32>
    %10 = arith.truncf %4 : vector<8x256xf32> to vector<8x256xbf16>
    %cst = arith.constant dense<0.000000e+00> : vector<8x1024xf32>
    %11 = tpu.matmul %10, %3, %cst {dimension_numbers = #tpu.dot_dimension_numbers<[1], [0], [0], [1], [0, 0, 1, 1], [], []>} : vector<8x256xbf16>, vector<256x1024xbf16>, vector<8x1024xf32> -> vector<8x1024xf32>
    %12 = arith.addf %9, %11 : vector<8x1024xf32>
    %13 = vector.extract_strided_slice %12 {offsets = [0, 0], sizes = [8, 256], strides = [1, 1]} : vector<8x1024xf32> to vector<8x256xf32>
    %cst_9 = arith.constant 5.000000e-01 : f32
    %14 = vector.broadcast %cst_9 : f32 to vector<8x256xf32>
    %15 = arith.mulf %14, %13 : vector<8x256xf32>
    %16 = math.tanh %15 : vector<8x256xf32>
    %cst_10 = arith.constant 1.000000e+00 : f32
    %17 = vector.broadcast %cst_10 : f32 to vector<8x256xf32>
    %18 = arith.addf %16, %17 : vector<8x256xf32>
    %cst_11 = arith.constant 5.000000e-01 : f32
    %19 = vector.broadcast %cst_11 : f32 to vector<8x256xf32>
    %20 = arith.mulf %19, %18 : vector<8x256xf32>
    %21 = vector.extract_strided_slice %12 {offsets = [0, 256], sizes = [8, 256], strides = [1, 1]} : vector<8x1024xf32> to vector<8x256xf32>
    %cst_12 = arith.constant 5.000000e-01 : f32
    %22 = vector.broadcast %cst_12 : f32 to vector<8x256xf32>
    %23 = arith.mulf %22, %21 : vector<8x256xf32>
    %24 = math.tanh %23 : vector<8x256xf32>
    %cst_13 = arith.constant 1.000000e+00 : f32
    %25 = vector.broadcast %cst_13 : f32 to vector<8x256xf32>
    %26 = arith.addf %24, %25 : vector<8x256xf32>
    %cst_14 = arith.constant 5.000000e-01 : f32
    %27 = vector.broadcast %cst_14 : f32 to vector<8x256xf32>
    %28 = arith.mulf %27, %26 : vector<8x256xf32>
    %29 = vector.extract_strided_slice %12 {offsets = [0, 512], sizes = [8, 256], strides = [1, 1]} : vector<8x1024xf32> to vector<8x256xf32>
    %30 = math.tanh %29 : vector<8x256xf32>
    %31 = vector.extract_strided_slice %12 {offsets = [0, 768], sizes = [8, 256], strides = [1, 1]} : vector<8x1024xf32> to vector<8x256xf32>
    %cst_15 = arith.constant 5.000000e-01 : f32
    %32 = vector.broadcast %cst_15 : f32 to vector<8x256xf32>
    %33 = arith.mulf %32, %31 : vector<8x256xf32>
    %34 = math.tanh %33 : vector<8x256xf32>
    %cst_16 = arith.constant 1.000000e+00 : f32
    %35 = vector.broadcast %cst_16 : f32 to vector<8x256xf32>
    %36 = arith.addf %34, %35 : vector<8x256xf32>
    %cst_17 = arith.constant 5.000000e-01 : f32
    %37 = vector.broadcast %cst_17 : f32 to vector<8x256xf32>
    %38 = arith.mulf %37, %36 : vector<8x256xf32>
    %39 = arith.mulf %28, %5 : vector<8x256xf32>
    %40 = arith.mulf %20, %30 : vector<8x256xf32>
    %41 = arith.addf %39, %40 : vector<8x256xf32>
    %42 = math.tanh %41 : vector<8x256xf32>
    %43 = arith.mulf %38, %42 : vector<8x256xf32>
    %44 = arith.truncf %43 : vector<8x256xf32> to vector<8x256xbf16>
    %45 = arith.index_cast %c0_i32_6 : i32 to index
    %c0_18 = arith.constant 0 : index
    %c0_19 = arith.constant 0 : index
    %46 = vector.load %arg3[%45, %c0_18, %c0_19] : memref<8x8x256xbf16, #tpu.memory_space<vmem>>, vector<1x8x256xbf16>
    %47 = vector.shape_cast %46 : vector<1x8x256xbf16> to vector<8x256xbf16>
    %48 = vector.shape_cast %44 : vector<8x256xbf16> to vector<1x8x256xbf16>
    tpu.vector_store %arg3[%45, %c0_18, %c0_19], %48 {strides = array<i32>} : memref<8x8x256xbf16, #tpu.memory_space<vmem>>, vector<1x8x256xbf16>,
    %c1_i32 = arith.constant 1 : i32
    %49 = arith.index_cast %c1_i32 : i32 to index
    %c0_20 = arith.constant 0 : index
    %c0_21 = arith.constant 0 : index
    %50 = vector.load %arg1[%49, %c0_20, %c0_21] : memref<8x8x1024xbf16, #tpu.memory_space<vmem>>, vector<1x8x1024xbf16>
    %51 = vector.shape_cast %50 : vector<1x8x1024xbf16> to vector<8x1024xbf16>
    %52 = arith.extf %51 : vector<8x1024xbf16> to vector<8x1024xf32>
    %53 = arith.truncf %43 : vector<8x256xf32> to vector<8x256xbf16>
    %cst_22 = arith.constant dense<0.000000e+00> : vector<8x1024xf32>
    %54 = tpu.matmul %53, %3, %cst_22 {dimension_numbers = #tpu.dot_dimension_numbers<[1], [0], [0], [1], [0, 0, 1, 1], [], []>} : vector<8x256xbf16>, vector<256x1024xbf16>, vector<8x1024xf32> -> vector<8x1024xf32>
    %55 = arith.addf %52, %54 : vector<8x1024xf32>
    %56 = vector.extract_strided_slice %55 {offsets = [0, 0], sizes = [8, 256], strides = [1, 1]} : vector<8x1024xf32> to vector<8x256xf32>
    %cst_23 = arith.constant 5.000000e-01 : f32
    %57 = vector.broadcast %cst_23 : f32 to vector<8x256xf32>
    %58 = arith.mulf %57, %56 : vector<8x256xf32>
    %59 = math.tanh %58 : vector<8x256xf32>
    %cst_24 = arith.constant 1.000000e+00 : f32
    %60 = vector.broadcast %cst_24 : f32 to vector<8x256xf32>
    %61 = arith.addf %59, %60 : vector<8x256xf32>
    %cst_25 = arith.constant 5.000000e-01 : f32
    %62 = vector.broadcast %cst_25 : f32 to vector<8x256xf32>
    %63 = arith.mulf %62, %61 : vector<8x256xf32>
    %64 = vector.extract_strided_slice %55 {offsets = [0, 256], sizes = [8, 256], strides = [1, 1]} : vector<8x1024xf32> to vector<8x256xf32>
    %cst_26 = arith.constant 5.000000e-01 : f32
    %65 = vector.broadcast %cst_26 : f32 to vector<8x256xf32>
    %66 = arith.mulf %65, %64 : vector<8x256xf32>
    %67 = math.tanh %66 : vector<8x256xf32>
    %cst_27 = arith.constant 1.000000e+00 : f32
    %68 = vector.broadcast %cst_27 : f32 to vector<8x256xf32>
    %69 = arith.addf %67, %68 : vector<8x256xf32>
    %cst_28 = arith.constant 5.000000e-01 : f32
    %70 = vector.broadcast %cst_28 : f32 to vector<8x256xf32>
    %71 = arith.mulf %70, %69 : vector<8x256xf32>
    %72 = vector.extract_strided_slice %55 {offsets = [0, 512], sizes = [8, 256], strides = [1, 1]} : vector<8x1024xf32> to vector<8x256xf32>
    %73 = math.tanh %72 : vector<8x256xf32>
    %74 = vector.extract_strided_slice %55 {offsets = [0, 768], sizes = [8, 256], strides = [1, 1]} : vector<8x1024xf32> to vector<8x256xf32>
    %cst_29 = arith.constant 5.000000e-01 : f32
    %75 = vector.broadcast %cst_29 : f32 to vector<8x256xf32>
    %76 = arith.mulf %75, %74 : vector<8x256xf32>
    %77 = math.tanh %76 : vector<8x256xf32>
    %cst_30 = arith.constant 1.000000e+00 : f32
    %78 = vector.broadcast %cst_30 : f32 to vector<8x256xf32>
    %79 = arith.addf %77, %78 : vector<8x256xf32>
    %cst_31 = arith.constant 5.000000e-01 : f32
    %80 = vector.broadcast %cst_31 : f32 to vector<8x256xf32>
    %81 = arith.mulf %80, %79 : vector<8x256xf32>
    %82 = arith.mulf %71, %41 : vector<8x256xf32>
    %83 = arith.mulf %63, %73 : vector<8x256xf32>
    %84 = arith.addf %82, %83 : vector<8x256xf32>
    %85 = math.tanh %84 : vector<8x256xf32>
    %86 = arith.mulf %81, %85 : vector<8x256xf32>
    %87 = arith.truncf %86 : vector<8x256xf32> to vector<8x256xbf16>
    %88 = arith.index_cast %c1_i32 : i32 to index
    %c0_32 = arith.constant 0 : index
    %c0_33 = arith.constant 0 : index
    %89 = vector.load %arg3[%88, %c0_32, %c0_33] : memref<8x8x256xbf16, #tpu.memory_space<vmem>>, vector<1x8x256xbf16>
    %90 = vector.shape_cast %89 : vector<1x8x256xbf16> to vector<8x256xbf16>
    %91 = vector.shape_cast %87 : vector<8x256xbf16> to vector<1x8x256xbf16>
    tpu.vector_store %arg3[%88, %c0_32, %c0_33], %91 {strides = array<i32>} : memref<8x8x256xbf16, #tpu.memory_space<vmem>>, vector<1x8x256xbf16>,
    %c2_i32 = arith.constant 2 : i32
    %92 = arith.index_cast %c2_i32 : i32 to index
    %c0_34 = arith.constant 0 : index
    %c0_35 = arith.constant 0 : index
    %93 = vector.load %arg1[%92, %c0_34, %c0_35] : memref<8x8x1024xbf16, #tpu.memory_space<vmem>>, vector<1x8x1024xbf16>
    %94 = vector.shape_cast %93 : vector<1x8x1024xbf16> to vector<8x1024xbf16>
    %95 = arith.extf %94 : vector<8x1024xbf16> to vector<8x1024xf32>
    %96 = arith.truncf %86 : vector<8x256xf32> to vector<8x256xbf16>
    %cst_36 = arith.constant dense<0.000000e+00> : vector<8x1024xf32>
    %97 = tpu.matmul %96, %3, %cst_36 {dimension_numbers = #tpu.dot_dimension_numbers<[1], [0], [0], [1], [0, 0, 1, 1], [], []>} : vector<8x256xbf16>, vector<256x1024xbf16>, vector<8x1024xf32> -> vector<8x1024xf32>
    %98 = arith.addf %95, %97 : vector<8x1024xf32>
    %99 = vector.extract_strided_slice %98 {offsets = [0, 0], sizes = [8, 256], strides = [1, 1]} : vector<8x1024xf32> to vector<8x256xf32>
    %cst_37 = arith.constant 5.000000e-01 : f32
    %100 = vector.broadcast %cst_37 : f32 to vector<8x256xf32>
    %101 = arith.mulf %100, %99 : vector<8x256xf32>
    %102 = math.tanh %101 : vector<8x256xf32>
    %cst_38 = arith.constant 1.000000e+00 : f32
    %103 = vector.broadcast %cst_38 : f32 to vector<8x256xf32>
    %104 = arith.addf %102, %103 : vector<8x256xf32>
    %cst_39 = arith.constant 5.000000e-01 : f32
    %105 = vector.broadcast %cst_39 : f32 to vector<8x256xf32>
    %106 = arith.mulf %105, %104 : vector<8x256xf32>
    %107 = vector.extract_strided_slice %98 {offsets = [0, 256], sizes = [8, 256], strides = [1, 1]} : vector<8x1024xf32> to vector<8x256xf32>
    %cst_40 = arith.constant 5.000000e-01 : f32
    %108 = vector.broadcast %cst_40 : f32 to vector<8x256xf32>
    %109 = arith.mulf %108, %107 : vector<8x256xf32>
    %110 = math.tanh %109 : vector<8x256xf32>
    %cst_41 = arith.constant 1.000000e+00 : f32
    %111 = vector.broadcast %cst_41 : f32 to vector<8x256xf32>
    %112 = arith.addf %110, %111 : vector<8x256xf32>
    %cst_42 = arith.constant 5.000000e-01 : f32
    %113 = vector.broadcast %cst_42 : f32 to vector<8x256xf32>
    %114 = arith.mulf %113, %112 : vector<8x256xf32>
    %115 = vector.extract_strided_slice %98 {offsets = [0, 512], sizes = [8, 256], strides = [1, 1]} : vector<8x1024xf32> to vector<8x256xf32>
    %116 = math.tanh %115 : vector<8x256xf32>
    %117 = vector.extract_strided_slice %98 {offsets = [0, 768], sizes = [8, 256], strides = [1, 1]} : vector<8x1024xf32> to vector<8x256xf32>
    %cst_43 = arith.constant 5.000000e-01 : f32
    %118 = vector.broadcast %cst_43 : f32 to vector<8x256xf32>
    %119 = arith.mulf %118, %117 : vector<8x256xf32>
    %120 = math.tanh %119 : vector<8x256xf32>
    %cst_44 = arith.constant 1.000000e+00 : f32
    %121 = vector.broadcast %cst_44 : f32 to vector<8x256xf32>
    %122 = arith.addf %120, %121 : vector<8x256xf32>
    %cst_45 = arith.constant 5.000000e-01 : f32
    %123 = vector.broadcast %cst_45 : f32 to vector<8x256xf32>
    %124 = arith.mulf %123, %122 : vector<8x256xf32>
    %125 = arith.mulf %114, %84 : vector<8x256xf32>
    %126 = arith.mulf %106, %116 : vector<8x256xf32>
    %127 = arith.addf %125, %126 : vector<8x256xf32>
    %128 = math.tanh %127 : vector<8x256xf32>
    %129 = arith.mulf %124, %128 : vector<8x256xf32>
    %130 = arith.truncf %129 : vector<8x256xf32> to vector<8x256xbf16>
    %131 = arith.index_cast %c2_i32 : i32 to index
    %c0_46 = arith.constant 0 : index
    %c0_47 = arith.constant 0 : index
    %132 = vector.load %arg3[%131, %c0_46, %c0_47] : memref<8x8x256xbf16, #tpu.memory_space<vmem>>, vector<1x8x256xbf16>
    %133 = vector.shape_cast %132 : vector<1x8x256xbf16> to vector<8x256xbf16>
    %134 = vector.shape_cast %130 : vector<8x256xbf16> to vector<1x8x256xbf16>
    tpu.vector_store %arg3[%131, %c0_46, %c0_47], %134 {strides = array<i32>} : memref<8x8x256xbf16, #tpu.memory_space<vmem>>, vector<1x8x256xbf16>,
    %c3_i32 = arith.constant 3 : i32
    %135 = arith.index_cast %c3_i32 : i32 to index
    %c0_48 = arith.constant 0 : index
    %c0_49 = arith.constant 0 : index
    %136 = vector.load %arg1[%135, %c0_48, %c0_49] : memref<8x8x1024xbf16, #tpu.memory_space<vmem>>, vector<1x8x1024xbf16>
    %137 = vector.shape_cast %136 : vector<1x8x1024xbf16> to vector<8x1024xbf16>
    %138 = arith.extf %137 : vector<8x1024xbf16> to vector<8x1024xf32>
    %139 = arith.truncf %129 : vector<8x256xf32> to vector<8x256xbf16>
    %cst_50 = arith.constant dense<0.000000e+00> : vector<8x1024xf32>
    %140 = tpu.matmul %139, %3, %cst_50 {dimension_numbers = #tpu.dot_dimension_numbers<[1], [0], [0], [1], [0, 0, 1, 1], [], []>} : vector<8x256xbf16>, vector<256x1024xbf16>, vector<8x1024xf32> -> vector<8x1024xf32>
    %141 = arith.addf %138, %140 : vector<8x1024xf32>
    %142 = vector.extract_strided_slice %141 {offsets = [0, 0], sizes = [8, 256], strides = [1, 1]} : vector<8x1024xf32> to vector<8x256xf32>
    %cst_51 = arith.constant 5.000000e-01 : f32
    %143 = vector.broadcast %cst_51 : f32 to vector<8x256xf32>
    %144 = arith.mulf %143, %142 : vector<8x256xf32>
    %145 = math.tanh %144 : vector<8x256xf32>
    %cst_52 = arith.constant 1.000000e+00 : f32
    %146 = vector.broadcast %cst_52 : f32 to vector<8x256xf32>
    %147 = arith.addf %145, %146 : vector<8x256xf32>
    %cst_53 = arith.constant 5.000000e-01 : f32
    %148 = vector.broadcast %cst_53 : f32 to vector<8x256xf32>
    %149 = arith.mulf %148, %147 : vector<8x256xf32>
    %150 = vector.extract_strided_slice %141 {offsets = [0, 256], sizes = [8, 256], strides = [1, 1]} : vector<8x1024xf32> to vector<8x256xf32>
    %cst_54 = arith.constant 5.000000e-01 : f32
    %151 = vector.broadcast %cst_54 : f32 to vector<8x256xf32>
    %152 = arith.mulf %151, %150 : vector<8x256xf32>
    %153 = math.tanh %152 : vector<8x256xf32>
    %cst_55 = arith.constant 1.000000e+00 : f32
    %154 = vector.broadcast %cst_55 : f32 to vector<8x256xf32>
    %155 = arith.addf %153, %154 : vector<8x256xf32>
    %cst_56 = arith.constant 5.000000e-01 : f32
    %156 = vector.broadcast %cst_56 : f32 to vector<8x256xf32>
    %157 = arith.mulf %156, %155 : vector<8x256xf32>
    %158 = vector.extract_strided_slice %141 {offsets = [0, 512], sizes = [8, 256], strides = [1, 1]} : vector<8x1024xf32> to vector<8x256xf32>
    %159 = math.tanh %158 : vector<8x256xf32>
    %160 = vector.extract_strided_slice %141 {offsets = [0, 768], sizes = [8, 256], strides = [1, 1]} : vector<8x1024xf32> to vector<8x256xf32>
    %cst_57 = arith.constant 5.000000e-01 : f32
    %161 = vector.broadcast %cst_57 : f32 to vector<8x256xf32>
    %162 = arith.mulf %161, %160 : vector<8x256xf32>
    %163 = math.tanh %162 : vector<8x256xf32>
    %cst_58 = arith.constant 1.000000e+00 : f32
    %164 = vector.broadcast %cst_58 : f32 to vector<8x256xf32>
    %165 = arith.addf %163, %164 : vector<8x256xf32>
    %cst_59 = arith.constant 5.000000e-01 : f32
    %166 = vector.broadcast %cst_59 : f32 to vector<8x256xf32>
    %167 = arith.mulf %166, %165 : vector<8x256xf32>
    %168 = arith.mulf %157, %127 : vector<8x256xf32>
    %169 = arith.mulf %149, %159 : vector<8x256xf32>
    %170 = arith.addf %168, %169 : vector<8x256xf32>
    %171 = math.tanh %170 : vector<8x256xf32>
    %172 = arith.mulf %167, %171 : vector<8x256xf32>
    %173 = arith.truncf %172 : vector<8x256xf32> to vector<8x256xbf16>
    %174 = arith.index_cast %c3_i32 : i32 to index
    %c0_60 = arith.constant 0 : index
    %c0_61 = arith.constant 0 : index
    %175 = vector.load %arg3[%174, %c0_60, %c0_61] : memref<8x8x256xbf16, #tpu.memory_space<vmem>>, vector<1x8x256xbf16>
    %176 = vector.shape_cast %175 : vector<1x8x256xbf16> to vector<8x256xbf16>
    %177 = vector.shape_cast %173 : vector<8x256xbf16> to vector<1x8x256xbf16>
    tpu.vector_store %arg3[%174, %c0_60, %c0_61], %177 {strides = array<i32>} : memref<8x8x256xbf16, #tpu.memory_space<vmem>>, vector<1x8x256xbf16>,
    %c4_i32 = arith.constant 4 : i32
    %178 = arith.index_cast %c4_i32 : i32 to index
    %c0_62 = arith.constant 0 : index
    %c0_63 = arith.constant 0 : index
    %179 = vector.load %arg1[%178, %c0_62, %c0_63] : memref<8x8x1024xbf16, #tpu.memory_space<vmem>>, vector<1x8x1024xbf16>
    %180 = vector.shape_cast %179 : vector<1x8x1024xbf16> to vector<8x1024xbf16>
    %181 = arith.extf %180 : vector<8x1024xbf16> to vector<8x1024xf32>
    %182 = arith.truncf %172 : vector<8x256xf32> to vector<8x256xbf16>
    %cst_64 = arith.constant dense<0.000000e+00> : vector<8x1024xf32>
    %183 = tpu.matmul %182, %3, %cst_64 {dimension_numbers = #tpu.dot_dimension_numbers<[1], [0], [0], [1], [0, 0, 1, 1], [], []>} : vector<8x256xbf16>, vector<256x1024xbf16>, vector<8x1024xf32> -> vector<8x1024xf32>
    %184 = arith.addf %181, %183 : vector<8x1024xf32>
    %185 = vector.extract_strided_slice %184 {offsets = [0, 0], sizes = [8, 256], strides = [1, 1]} : vector<8x1024xf32> to vector<8x256xf32>
    %cst_65 = arith.constant 5.000000e-01 : f32
    %186 = vector.broadcast %cst_65 : f32 to vector<8x256xf32>
    %187 = arith.mulf %186, %185 : vector<8x256xf32>
    %188 = math.tanh %187 : vector<8x256xf32>
    %cst_66 = arith.constant 1.000000e+00 : f32
    %189 = vector.broadcast %cst_66 : f32 to vector<8x256xf32>
    %190 = arith.addf %188, %189 : vector<8x256xf32>
    %cst_67 = arith.constant 5.000000e-01 : f32
    %191 = vector.broadcast %cst_67 : f32 to vector<8x256xf32>
    %192 = arith.mulf %191, %190 : vector<8x256xf32>
    %193 = vector.extract_strided_slice %184 {offsets = [0, 256], sizes = [8, 256], strides = [1, 1]} : vector<8x1024xf32> to vector<8x256xf32>
    %cst_68 = arith.constant 5.000000e-01 : f32
    %194 = vector.broadcast %cst_68 : f32 to vector<8x256xf32>
    %195 = arith.mulf %194, %193 : vector<8x256xf32>
    %196 = math.tanh %195 : vector<8x256xf32>
    %cst_69 = arith.constant 1.000000e+00 : f32
    %197 = vector.broadcast %cst_69 : f32 to vector<8x256xf32>
    %198 = arith.addf %196, %197 : vector<8x256xf32>
    %cst_70 = arith.constant 5.000000e-01 : f32
    %199 = vector.broadcast %cst_70 : f32 to vector<8x256xf32>
    %200 = arith.mulf %199, %198 : vector<8x256xf32>
    %201 = vector.extract_strided_slice %184 {offsets = [0, 512], sizes = [8, 256], strides = [1, 1]} : vector<8x1024xf32> to vector<8x256xf32>
    %202 = math.tanh %201 : vector<8x256xf32>
    %203 = vector.extract_strided_slice %184 {offsets = [0, 768], sizes = [8, 256], strides = [1, 1]} : vector<8x1024xf32> to vector<8x256xf32>
    %cst_71 = arith.constant 5.000000e-01 : f32
    %204 = vector.broadcast %cst_71 : f32 to vector<8x256xf32>
    %205 = arith.mulf %204, %203 : vector<8x256xf32>
    %206 = math.tanh %205 : vector<8x256xf32>
    %cst_72 = arith.constant 1.000000e+00 : f32
    %207 = vector.broadcast %cst_72 : f32 to vector<8x256xf32>
    %208 = arith.addf %206, %207 : vector<8x256xf32>
    %cst_73 = arith.constant 5.000000e-01 : f32
    %209 = vector.broadcast %cst_73 : f32 to vector<8x256xf32>
    %210 = arith.mulf %209, %208 : vector<8x256xf32>
    %211 = arith.mulf %200, %170 : vector<8x256xf32>
    %212 = arith.mulf %192, %202 : vector<8x256xf32>
    %213 = arith.addf %211, %212 : vector<8x256xf32>
    %214 = math.tanh %213 : vector<8x256xf32>
    %215 = arith.mulf %210, %214 : vector<8x256xf32>
    %216 = arith.truncf %215 : vector<8x256xf32> to vector<8x256xbf16>
    %217 = arith.index_cast %c4_i32 : i32 to index
    %c0_74 = arith.constant 0 : index
    %c0_75 = arith.constant 0 : index
    %218 = vector.load %arg3[%217, %c0_74, %c0_75] : memref<8x8x256xbf16, #tpu.memory_space<vmem>>, vector<1x8x256xbf16>
    %219 = vector.shape_cast %218 : vector<1x8x256xbf16> to vector<8x256xbf16>
    %220 = vector.shape_cast %216 : vector<8x256xbf16> to vector<1x8x256xbf16>
    tpu.vector_store %arg3[%217, %c0_74, %c0_75], %220 {strides = array<i32>} : memref<8x8x256xbf16, #tpu.memory_space<vmem>>, vector<1x8x256xbf16>,
    %c5_i32 = arith.constant 5 : i32
    %221 = arith.index_cast %c5_i32 : i32 to index
    %c0_76 = arith.constant 0 : index
    %c0_77 = arith.constant 0 : index
    %222 = vector.load %arg1[%221, %c0_76, %c0_77] : memref<8x8x1024xbf16, #tpu.memory_space<vmem>>, vector<1x8x1024xbf16>
    %223 = vector.shape_cast %222 : vector<1x8x1024xbf16> to vector<8x1024xbf16>
    %224 = arith.extf %223 : vector<8x1024xbf16> to vector<8x1024xf32>
    %225 = arith.truncf %215 : vector<8x256xf32> to vector<8x256xbf16>
    %cst_78 = arith.constant dense<0.000000e+00> : vector<8x1024xf32>
    %226 = tpu.matmul %225, %3, %cst_78 {dimension_numbers = #tpu.dot_dimension_numbers<[1], [0], [0], [1], [0, 0, 1, 1], [], []>} : vector<8x256xbf16>, vector<256x1024xbf16>, vector<8x1024xf32> -> vector<8x1024xf32>
    %227 = arith.addf %224, %226 : vector<8x1024xf32>
    %228 = vector.extract_strided_slice %227 {offsets = [0, 0], sizes = [8, 256], strides = [1, 1]} : vector<8x1024xf32> to vector<8x256xf32>
    %cst_79 = arith.constant 5.000000e-01 : f32
    %229 = vector.broadcast %cst_79 : f32 to vector<8x256xf32>
    %230 = arith.mulf %229, %228 : vector<8x256xf32>
    %231 = math.tanh %230 : vector<8x256xf32>
    %cst_80 = arith.constant 1.000000e+00 : f32
    %232 = vector.broadcast %cst_80 : f32 to vector<8x256xf32>
    %233 = arith.addf %231, %232 : vector<8x256xf32>
    %cst_81 = arith.constant 5.000000e-01 : f32
    %234 = vector.broadcast %cst_81 : f32 to vector<8x256xf32>
    %235 = arith.mulf %234, %233 : vector<8x256xf32>
    %236 = vector.extract_strided_slice %227 {offsets = [0, 256], sizes = [8, 256], strides = [1, 1]} : vector<8x1024xf32> to vector<8x256xf32>
    %cst_82 = arith.constant 5.000000e-01 : f32
    %237 = vector.broadcast %cst_82 : f32 to vector<8x256xf32>
    %238 = arith.mulf %237, %236 : vector<8x256xf32>
    %239 = math.tanh %238 : vector<8x256xf32>
    %cst_83 = arith.constant 1.000000e+00 : f32
    %240 = vector.broadcast %cst_83 : f32 to vector<8x256xf32>
    %241 = arith.addf %239, %240 : vector<8x256xf32>
    %cst_84 = arith.constant 5.000000e-01 : f32
    %242 = vector.broadcast %cst_84 : f32 to vector<8x256xf32>
    %243 = arith.mulf %242, %241 : vector<8x256xf32>
    %244 = vector.extract_strided_slice %227 {offsets = [0, 512], sizes = [8, 256], strides = [1, 1]} : vector<8x1024xf32> to vector<8x256xf32>
    %245 = math.tanh %244 : vector<8x256xf32>
    %246 = vector.extract_strided_slice %227 {offsets = [0, 768], sizes = [8, 256], strides = [1, 1]} : vector<8x1024xf32> to vector<8x256xf32>
    %cst_85 = arith.constant 5.000000e-01 : f32
    %247 = vector.broadcast %cst_85 : f32 to vector<8x256xf32>
    %248 = arith.mulf %247, %246 : vector<8x256xf32>
    %249 = math.tanh %248 : vector<8x256xf32>
    %cst_86 = arith.constant 1.000000e+00 : f32
    %250 = vector.broadcast %cst_86 : f32 to vector<8x256xf32>
    %251 = arith.addf %249, %250 : vector<8x256xf32>
    %cst_87 = arith.constant 5.000000e-01 : f32
    %252 = vector.broadcast %cst_87 : f32 to vector<8x256xf32>
    %253 = arith.mulf %252, %251 : vector<8x256xf32>
    %254 = arith.mulf %243, %213 : vector<8x256xf32>
    %255 = arith.mulf %235, %245 : vector<8x256xf32>
    %256 = arith.addf %254, %255 : vector<8x256xf32>
    %257 = math.tanh %256 : vector<8x256xf32>
    %258 = arith.mulf %253, %257 : vector<8x256xf32>
    %259 = arith.truncf %258 : vector<8x256xf32> to vector<8x256xbf16>
    %260 = arith.index_cast %c5_i32 : i32 to index
    %c0_88 = arith.constant 0 : index
    %c0_89 = arith.constant 0 : index
    %261 = vector.load %arg3[%260, %c0_88, %c0_89] : memref<8x8x256xbf16, #tpu.memory_space<vmem>>, vector<1x8x256xbf16>
    %262 = vector.shape_cast %261 : vector<1x8x256xbf16> to vector<8x256xbf16>
    %263 = vector.shape_cast %259 : vector<8x256xbf16> to vector<1x8x256xbf16>
    tpu.vector_store %arg3[%260, %c0_88, %c0_89], %263 {strides = array<i32>} : memref<8x8x256xbf16, #tpu.memory_space<vmem>>, vector<1x8x256xbf16>,
    %c6_i32 = arith.constant 6 : i32
    %264 = arith.index_cast %c6_i32 : i32 to index
    %c0_90 = arith.constant 0 : index
    %c0_91 = arith.constant 0 : index
    %265 = vector.load %arg1[%264, %c0_90, %c0_91] : memref<8x8x1024xbf16, #tpu.memory_space<vmem>>, vector<1x8x1024xbf16>
    %266 = vector.shape_cast %265 : vector<1x8x1024xbf16> to vector<8x1024xbf16>
    %267 = arith.extf %266 : vector<8x1024xbf16> to vector<8x1024xf32>
    %268 = arith.truncf %258 : vector<8x256xf32> to vector<8x256xbf16>
    %cst_92 = arith.constant dense<0.000000e+00> : vector<8x1024xf32>
    %269 = tpu.matmul %268, %3, %cst_92 {dimension_numbers = #tpu.dot_dimension_numbers<[1], [0], [0], [1], [0, 0, 1, 1], [], []>} : vector<8x256xbf16>, vector<256x1024xbf16>, vector<8x1024xf32> -> vector<8x1024xf32>
    %270 = arith.addf %267, %269 : vector<8x1024xf32>
    %271 = vector.extract_strided_slice %270 {offsets = [0, 0], sizes = [8, 256], strides = [1, 1]} : vector<8x1024xf32> to vector<8x256xf32>
    %cst_93 = arith.constant 5.000000e-01 : f32
    %272 = vector.broadcast %cst_93 : f32 to vector<8x256xf32>
    %273 = arith.mulf %272, %271 : vector<8x256xf32>
    %274 = math.tanh %273 : vector<8x256xf32>
    %cst_94 = arith.constant 1.000000e+00 : f32
    %275 = vector.broadcast %cst_94 : f32 to vector<8x256xf32>
    %276 = arith.addf %274, %275 : vector<8x256xf32>
    %cst_95 = arith.constant 5.000000e-01 : f32
    %277 = vector.broadcast %cst_95 : f32 to vector<8x256xf32>
    %278 = arith.mulf %277, %276 : vector<8x256xf32>
    %279 = vector.extract_strided_slice %270 {offsets = [0, 256], sizes = [8, 256], strides = [1, 1]} : vector<8x1024xf32> to vector<8x256xf32>
    %cst_96 = arith.constant 5.000000e-01 : f32
    %280 = vector.broadcast %cst_96 : f32 to vector<8x256xf32>
    %281 = arith.mulf %280, %279 : vector<8x256xf32>
    %282 = math.tanh %281 : vector<8x256xf32>
    %cst_97 = arith.constant 1.000000e+00 : f32
    %283 = vector.broadcast %cst_97 : f32 to vector<8x256xf32>
    %284 = arith.addf %282, %283 : vector<8x256xf32>
    %cst_98 = arith.constant 5.000000e-01 : f32
    %285 = vector.broadcast %cst_98 : f32 to vector<8x256xf32>
    %286 = arith.mulf %285, %284 : vector<8x256xf32>
    %287 = vector.extract_strided_slice %270 {offsets = [0, 512], sizes = [8, 256], strides = [1, 1]} : vector<8x1024xf32> to vector<8x256xf32>
    %288 = math.tanh %287 : vector<8x256xf32>
    %289 = vector.extract_strided_slice %270 {offsets = [0, 768], sizes = [8, 256], strides = [1, 1]} : vector<8x1024xf32> to vector<8x256xf32>
    %cst_99 = arith.constant 5.000000e-01 : f32
    %290 = vector.broadcast %cst_99 : f32 to vector<8x256xf32>
    %291 = arith.mulf %290, %289 : vector<8x256xf32>
    %292 = math.tanh %291 : vector<8x256xf32>
    %cst_100 = arith.constant 1.000000e+00 : f32
    %293 = vector.broadcast %cst_100 : f32 to vector<8x256xf32>
    %294 = arith.addf %292, %293 : vector<8x256xf32>
    %cst_101 = arith.constant 5.000000e-01 : f32
    %295 = vector.broadcast %cst_101 : f32 to vector<8x256xf32>
    %296 = arith.mulf %295, %294 : vector<8x256xf32>
    %297 = arith.mulf %286, %256 : vector<8x256xf32>
    %298 = arith.mulf %278, %288 : vector<8x256xf32>
    %299 = arith.addf %297, %298 : vector<8x256xf32>
    %300 = math.tanh %299 : vector<8x256xf32>
    %301 = arith.mulf %296, %300 : vector<8x256xf32>
    %302 = arith.truncf %301 : vector<8x256xf32> to vector<8x256xbf16>
    %303 = arith.index_cast %c6_i32 : i32 to index
    %c0_102 = arith.constant 0 : index
    %c0_103 = arith.constant 0 : index
    %304 = vector.load %arg3[%303, %c0_102, %c0_103] : memref<8x8x256xbf16, #tpu.memory_space<vmem>>, vector<1x8x256xbf16>
    %305 = vector.shape_cast %304 : vector<1x8x256xbf16> to vector<8x256xbf16>
    %306 = vector.shape_cast %302 : vector<8x256xbf16> to vector<1x8x256xbf16>
    tpu.vector_store %arg3[%303, %c0_102, %c0_103], %306 {strides = array<i32>} : memref<8x8x256xbf16, #tpu.memory_space<vmem>>, vector<1x8x256xbf16>,
    %c7_i32 = arith.constant 7 : i32
    %307 = arith.index_cast %c7_i32 : i32 to index
    %c0_104 = arith.constant 0 : index
    %c0_105 = arith.constant 0 : index
    %308 = vector.load %arg1[%307, %c0_104, %c0_105] : memref<8x8x1024xbf16, #tpu.memory_space<vmem>>, vector<1x8x1024xbf16>
    %309 = vector.shape_cast %308 : vector<1x8x1024xbf16> to vector<8x1024xbf16>
    %310 = arith.extf %309 : vector<8x1024xbf16> to vector<8x1024xf32>
    %311 = arith.truncf %301 : vector<8x256xf32> to vector<8x256xbf16>
    %cst_106 = arith.constant dense<0.000000e+00> : vector<8x1024xf32>
    %312 = tpu.matmul %311, %3, %cst_106 {dimension_numbers = #tpu.dot_dimension_numbers<[1], [0], [0], [1], [0, 0, 1, 1], [], []>} : vector<8x256xbf16>, vector<256x1024xbf16>, vector<8x1024xf32> -> vector<8x1024xf32>
    %313 = arith.addf %310, %312 : vector<8x1024xf32>
    %314 = vector.extract_strided_slice %313 {offsets = [0, 0], sizes = [8, 256], strides = [1, 1]} : vector<8x1024xf32> to vector<8x256xf32>
    %cst_107 = arith.constant 5.000000e-01 : f32
    %315 = vector.broadcast %cst_107 : f32 to vector<8x256xf32>
    %316 = arith.mulf %315, %314 : vector<8x256xf32>
    %317 = math.tanh %316 : vector<8x256xf32>
    %cst_108 = arith.constant 1.000000e+00 : f32
    %318 = vector.broadcast %cst_108 : f32 to vector<8x256xf32>
    %319 = arith.addf %317, %318 : vector<8x256xf32>
    %cst_109 = arith.constant 5.000000e-01 : f32
    %320 = vector.broadcast %cst_109 : f32 to vector<8x256xf32>
    %321 = arith.mulf %320, %319 : vector<8x256xf32>
    %322 = vector.extract_strided_slice %313 {offsets = [0, 256], sizes = [8, 256], strides = [1, 1]} : vector<8x1024xf32> to vector<8x256xf32>
    %cst_110 = arith.constant 5.000000e-01 : f32
    %323 = vector.broadcast %cst_110 : f32 to vector<8x256xf32>
    %324 = arith.mulf %323, %322 : vector<8x256xf32>
    %325 = math.tanh %324 : vector<8x256xf32>
    %cst_111 = arith.constant 1.000000e+00 : f32
    %326 = vector.broadcast %cst_111 : f32 to vector<8x256xf32>
    %327 = arith.addf %325, %326 : vector<8x256xf32>
    %cst_112 = arith.constant 5.000000e-01 : f32
    %328 = vector.broadcast %cst_112 : f32 to vector<8x256xf32>
    %329 = arith.mulf %328, %327 : vector<8x256xf32>
    %330 = vector.extract_strided_slice %313 {offsets = [0, 512], sizes = [8, 256], strides = [1, 1]} : vector<8x1024xf32> to vector<8x256xf32>
    %331 = math.tanh %330 : vector<8x256xf32>
    %332 = vector.extract_strided_slice %313 {offsets = [0, 768], sizes = [8, 256], strides = [1, 1]} : vector<8x1024xf32> to vector<8x256xf32>
    %cst_113 = arith.constant 5.000000e-01 : f32
    %333 = vector.broadcast %cst_113 : f32 to vector<8x256xf32>
    %334 = arith.mulf %333, %332 : vector<8x256xf32>
    %335 = math.tanh %334 : vector<8x256xf32>
    %cst_114 = arith.constant 1.000000e+00 : f32
    %336 = vector.broadcast %cst_114 : f32 to vector<8x256xf32>
    %337 = arith.addf %335, %336 : vector<8x256xf32>
    %cst_115 = arith.constant 5.000000e-01 : f32
    %338 = vector.broadcast %cst_115 : f32 to vector<8x256xf32>
    %339 = arith.mulf %338, %337 : vector<8x256xf32>
    %340 = arith.mulf %329, %299 : vector<8x256xf32>
    %341 = arith.mulf %321, %331 : vector<8x256xf32>
    %342 = arith.addf %340, %341 : vector<8x256xf32>
    %343 = math.tanh %342 : vector<8x256xf32>
    %344 = arith.mulf %339, %343 : vector<8x256xf32>
    %345 = arith.truncf %344 : vector<8x256xf32> to vector<8x256xbf16>
    %346 = arith.index_cast %c7_i32 : i32 to index
    %c0_116 = arith.constant 0 : index
    %c0_117 = arith.constant 0 : index
    %347 = vector.load %arg3[%346, %c0_116, %c0_117] : memref<8x8x256xbf16, #tpu.memory_space<vmem>>, vector<1x8x256xbf16>
    %348 = vector.shape_cast %347 : vector<1x8x256xbf16> to vector<8x256xbf16>
    %349 = vector.shape_cast %345 : vector<8x256xbf16> to vector<1x8x256xbf16>
    tpu.vector_store %arg3[%346, %c0_116, %c0_117], %349 {strides = array<i32>} : memref<8x8x256xbf16, #tpu.memory_space<vmem>>, vector<1x8x256xbf16>,
    %c8_i32 = arith.constant 8 : i32
    %c0_118 = arith.constant 0 : index
    %c0_119 = arith.constant 0 : index
    %350 = vector.load %arg4[%c0_118, %c0_119] : memref<8x256xf32, #tpu.memory_space<vmem>>, vector<8x256xf32>
    tpu.vector_store %arg4[%c0_118, %c0_119], %344 {strides = array<i32>} : memref<8x256xf32, #tpu.memory_space<vmem>>, vector<8x256xf32>,
    %c0_120 = arith.constant 0 : index
    %c0_121 = arith.constant 0 : index
    %351 = vector.load %arg5[%c0_120, %c0_121] : memref<8x256xf32, #tpu.memory_space<vmem>>, vector<8x256xf32>
    tpu.vector_store %arg5[%c0_120, %c0_121], %342 {strides = array<i32>} : memref<8x256xf32, #tpu.memory_space<vmem>>, vector<8x256xf32>,
    return
  }
  func.func @transform_0(%arg0: i32) -> (i32, i32, i32) {
    %c0_i32 = arith.constant 0 : i32
    %c0_i32_0 = arith.constant 0 : i32
    %c0_i32_1 = arith.constant 0 : i32
    return %arg0, %c0_i32, %c0_i32_0 : i32, i32, i32
  }
  func.func @transform_1(%arg0: i32) -> (i32, i32) {
    %c0_i32 = arith.constant 0 : i32
    %c0_i32_0 = arith.constant 0 : i32
    %c0_i32_1 = arith.constant 0 : i32
    return %c0_i32, %c0_i32_0 : i32, i32
  }
  func.func @transform_2(%arg0: i32) -> (i32, i32, i32) {
    %c0_i32 = arith.constant 0 : i32
    %c0_i32_0 = arith.constant 0 : i32
    %c0_i32_1 = arith.constant 0 : i32
    return %arg0, %c0_i32, %c0_i32_0 : i32, i32, i32
  }
  func.func @transform_3(%arg0: i32) -> (i32, i32) {
    %c0_i32 = arith.constant 0 : i32
    %c0_i32_0 = arith.constant 0 : i32
    %c0_i32_1 = arith.constant 0 : i32
    return %c0_i32, %c0_i32_0 : i32, i32
  }
  func.func @transform_4(%arg0: i32) -> (i32, i32) {
    %c0_i32 = arith.constant 0 : i32
    %c0_i32_0 = arith.constant 0 : i32
    %c0_i32_1 = arith.constant 0 : i32
    return %c0_i32, %c0_i32_0 : i32, i32
  }
}

</mosaic_0001>

<bundles_post_ra>
// kernel: lstm_poet_forward.1
= control target key start
LH: loop header
LB: loop body
LE: loop exit
PB: predicated region body
PF: predicated region fallthrough
CT: control target
= control target key end

     0   :  { %v4931_v14 = vmov 0.0|0.0   ;;  %s4926_s1 = inlined_call_operand.vmem [shape: bf16[256,1024], index: 1, kind: input, shape index: {}]   ;;  %s4927_s0 = inlined_call_operand.vmem [shape: bf16[8,8,1024], index: 0, kind: input, shape index: {}]   ;;  %s4928_s2 = inlined_call_operand.vmem [shape: bf16[8,8,256], index: 2, kind: output, shape index: {0}]   ;;  %s4929_s4 = inlined_call_operand.vmem [shape: f32[8,256], index: 4, kind: output, shape index: {2}]   ;;  %s4930_s3 = inlined_call_operand.vmem [shape: f32[8,256], index: 3, kind: output, shape index: {1}]  }
   0x1   :  { %v78_v0 = vld [vmem:[%s4926_s1 + $0x1c0] sm:$0xff]  ;;  %v79_v6 = vld [vmem:[%s4926_s1 + $0x1c8] sm:$0xff]  ;;  %840 = vmatprep.mubr.bf16.mxu0 %v4931_v14  ;;  %881 = vmatprep.mubr.bf16.mxu1 %v4931_v14 }
   0x2   :  { %v82_v1 = vld [vmem:[%s4926_s1 + $0x1e0] sm:$0xff]  ;;  %v83_v7 = vld [vmem:[%s4926_s1 + $0x1e8] sm:$0xff] }
   0x3   :  { %v70_v2 = vld [vmem:[%s4926_s1 + $0x180] sm:$0xff]  ;;  %v3033_v3 = vcombine.high %v78_v0, %v82_v1  ;;  %v3035_v4 = vcombine.low %v78_v0, %v82_v1  ;;  %v3048_v9 = vcombine.high %v79_v6, %v83_v7  ;;  %v3050_v10 = vcombine.low %v79_v6, %v83_v7  ;;  %v71_v13 = vld [vmem:[%s4926_s1 + $0x188] sm:$0xff] }
   0x4   :  { %v74_v5 = vld [vmem:[%s4926_s1 + $0x1a0] sm:$0xff]  ;;  %v75_v15 = vld [vmem:[%s4926_s1 + $0x1a8] sm:$0xff] }
   0x5   :  { %5204 = vst [vmem:[#allocation2_spill] sm:$0xff] %v3033_v3  ;;  %5205 = vst [vmem:[#allocation3_spill] sm:$0xff] %v3035_v4  ;;  %v3046_v8 = vcombine.high %v70_v2, %v74_v5  ;;  %v62_v11 = vld [vmem:[%s4926_s1 + $0x140] sm:$0xff]  ;;  %808 = vmatprep.subr.bf16.mxu0 %v3033_v3  ;;  %v3068_v16 = vcombine.low %v70_v2, %v74_v5  ;;  %849 = vmatprep.subr.bf16.mxu1 %v3048_v9  ;;  %v63_v18 = vld [vmem:[%s4926_s1 + $0x148] sm:$0xff] }
   0x6   :  { %5207 = vst [vmem:[#allocation5_spill] sm:$0xff] %v3048_v9  ;;  %5208 = vst [vmem:[#allocation6_spill] sm:$0xff] %v3050_v10  ;;  %v66_v12 = vld [vmem:[%s4926_s1 + $0x160] sm:$0xff]  ;;  %809 = vmatpush1.bf16.msra.mxu0 %v3035_v4  ;;  %v3071_v17 = vcombine.high %v71_v13, %v75_v15  ;;  %v67_v19 = vld [vmem:[%s4926_s1 + $0x168] sm:$0xff]  ;;  %850 = vmatpush1.bf16.msra.mxu1 %v3050_v10  ;;  %v3083_v21 = vcombine.low %v71_v13, %v75_v15 }
   0x7   :  { %5206 = vst [vmem:[#allocation4_spill] sm:$0xff] %v3046_v8  ;;  %5209 = vst [vmem:[#allocation7_spill] sm:$0xff] %v3068_v16  ;;  %810 = vmatprep.subr.bf16.mxu0 %v3046_v8  ;;  %v3081_v20 = vcombine.high %v62_v11, %v66_v12  ;;  %v54_v22 = vld [vmem:[%s4926_s1 + $0x100] sm:$0xff]  ;;  %v3092_v24 = vcombine.high %v63_v18, %v67_v19  ;;  %v55_v25 = vld [vmem:[%s4926_s1 + $0x108] sm:$0xff]  ;;  %v3101_v27 = vcombine.low %v62_v11, %v66_v12 }
   0x8   :  { %5210 = vst [vmem:[#allocation8_spill] sm:$0xff] %v3071_v17  ;;  %5212 = vst [vmem:[#allocation10_spill] sm:$0xff] %v3083_v21  ;;  %851 = vmatprep.subr.bf16.mxu1 %v3071_v17  ;;  %v58_v23 = vld [vmem:[%s4926_s1 + $0x120] sm:$0xff]  ;;  %v59_v26 = vld [vmem:[%s4926_s1 + $0x128] sm:$0xff]  ;;  %v3107_v29 = vcombine.low %v63_v18, %v67_v19 }
   0x9   :  { %5211 = vst [vmem:[#allocation9_spill] sm:$0xff] %v3081_v20  ;;  %5213 = vst [vmem:[#allocation11_spill] sm:$0xff] %v3092_v24  ;;  %v3105_v28 = vcombine.high %v54_v22, %v58_v23  ;;  %v46_v30 = vld [vmem:[%s4926_s1 + $0xc0] sm:$0xff]  ;;  %v3116_v32 = vcombine.high %v55_v25, %v59_v26  ;;  %v47_v33 = vld [vmem:[%s4926_s1 + $0xc8] sm:$0xff]  ;;  %v3125_v35 = vcombine.low %v54_v22, %v58_v23 }
   0xa   :  { %811 = vmatpush1.bf16.msra.mxu0 %v3068_v16  ;;  %5214 = vst [vmem:[#allocation12_spill] sm:$0xff] %v3101_v27  ;;  %852 = vmatpush1.bf16.msra.mxu1 %v3083_v21  ;;  %5216 = vst [vmem:[#allocation14_spill] sm:$0xff] %v3107_v29  ;;  %v50_v31 = vld [vmem:[%s4926_s1 + $0xe0] sm:$0xff]  ;;  %v51_v34 = vld [vmem:[%s4926_s1 + $0xe8] sm:$0xff]  ;;  %v3131_v37 = vcombine.low %v55_v25, %v59_v26 }
   0xb   :  { %812 = vmatprep.subr.bf16.mxu0 %v3081_v20  ;;  %5215 = vst [vmem:[#allocation13_spill] sm:$0xff] %v3105_v28  ;;  %853 = vmatprep.subr.bf16.mxu1 %v3092_v24  ;;  %5217 = vst [vmem:[#allocation15_spill] sm:$0xff] %v3116_v32  ;;  %v3129_v36 = vcombine.high %v46_v30, %v50_v31  ;;  %v38_v38 = vld [vmem:[%s4926_s1 + $0x80] sm:$0xff]  ;;  %v3140_v40 = vcombine.high %v47_v33, %v51_v34  ;;  %v39_v41 = vld [vmem:[%s4926_s1 + $0x88] sm:$0xff] }
   0xc   :  { %5218 = vst [vmem:[#allocation16_spill] sm:$0xff] %v3125_v35  ;;  %5220 = vst [vmem:[#allocation18_spill] sm:$0xff] %v3131_v37  ;;  %v42_v39 = vld [vmem:[%s4926_s1 + $0xa0] sm:$0xff]  ;;  %v43_v42 = vld [vmem:[%s4926_s1 + $0xa8] sm:$0xff]  ;;  %v3149_v43 = vcombine.low %v46_v30, %v50_v31  ;;  %v3155_v45 = vcombine.low %v47_v33, %v51_v34 }
   0xd   :  { %5219 = vst [vmem:[#allocation17_spill] sm:$0xff] %v3129_v36  ;;  %5221 = vst [vmem:[#allocation19_spill] sm:$0xff] %v3140_v40  ;;  %v3153_v44 = vcombine.high %v38_v38, %v42_v39  ;;  %v30_v46 = vld [vmem:[%s4926_s1 + $0x40] sm:$0xff]  ;;  %v3164_v48 = vcombine.high %v39_v41, %v43_v42  ;;  %v31_v49 = vld [vmem:[%s4926_s1 + $0x48] sm:$0xff]  ;;  %v3173_v51 = vcombine.low %v38_v38, %v42_v39 }
   0xe   :  { %813 = vmatpush1.bf16.msra.mxu0 %v3101_v27  ;;  %854 = vmatpush1.bf16.msra.mxu1 %v3107_v29  ;;  %5222 = vst [vmem:[#allocation20_spill] sm:$0xff] %v3149_v43  ;;  %5224 = vst [vmem:[#allocation22_spill] sm:$0xff] %v3155_v45  ;;  %v34_v47 = vld [vmem:[%s4926_s1 + $0x60] sm:$0xff]  ;;  %v35_v50 = vld [vmem:[%s4926_s1 + $0x68] sm:$0xff]  ;;  %v3179_v53 = vcombine.low %v39_v41, %v43_v42 }
   0xf   :  { %814 = vmatprep.subr.bf16.mxu0 %v3105_v28  ;;  %855 = vmatprep.subr.bf16.mxu1 %v3116_v32  ;;  %5223 = vst [vmem:[#allocation21_spill] sm:$0xff] %v3153_v44  ;;  %5225 = vst [vmem:[#allocation23_spill] sm:$0xff] %v3164_v48  ;;  %v3177_v52 = vcombine.high %v30_v46, %v34_v47  ;;  %v22_v54 = vld [vmem:[%s4926_s1] sm:$0xff]  ;;  %v3188_v56 = vcombine.high %v31_v49, %v35_v50  ;;  %v23_v57 = vld [vmem:[%s4926_s1 + $0x8] sm:$0xff] }
  0x10   :  { %5226 = vst [vmem:[#allocation24_spill] sm:$0xff] %v3173_v51  ;;  %5228 = vst [vmem:[#allocation26_spill] sm:$0xff] %v3179_v53  ;;  %v26_v55 = vld [vmem:[%s4926_s1 + $0x20] sm:$0xff]  ;;  %v27_v58 = vld [vmem:[%s4926_s1 + $0x28] sm:$0xff]  ;;  %v3197_v59 = vcombine.low %v30_v46, %v34_v47  ;;  %v3203_v61 = vcombine.low %v31_v49, %v35_v50 }
  0x11   :  { %5227 = vst [vmem:[#allocation25_spill] sm:$0xff] %v3177_v52  ;;  %5229 = vst [vmem:[#allocation27_spill] sm:$0xff] %v3188_v56  ;;  %v3201_v60 = vcombine.high %v22_v54, %v26_v55  ;;  %v142_v62 = vld [vmem:[%s4926_s1 + $0x3c0] sm:$0xff]  ;;  %v3212_v0 = vcombine.high %v23_v57, %v27_v58  ;;  %v143_v1 = vld [vmem:[%s4926_s1 + $0x3c8] sm:$0xff]  ;;  %v3221_v5 = vcombine.low %v22_v54, %v26_v55 }
  0x12   :  { %815 = vmatpush1.bf16.msra.mxu0 %v3125_v35  ;;  %856 = vmatpush1.bf16.msra.mxu1 %v3131_v37  ;;  %5230 = vst [vmem:[#allocation28_spill] sm:$0xff] %v3197_v59  ;;  %5232 = vst [vmem:[#allocation30_spill] sm:$0xff] %v3203_v61  ;;  %v146_v63 = vld [vmem:[%s4926_s1 + $0x3e0] sm:$0xff]  ;;  %v147_v2 = vld [vmem:[%s4926_s1 + $0x3e8] sm:$0xff]  ;;  %v3227_v7 = vcombine.low %v23_v57, %v27_v58 }
  0x13   :  { %816 = vmatprep.subr.bf16.mxu0 %v3129_v36  ;;  %857 = vmatprep.subr.bf16.mxu1 %v3140_v40  ;;  %5231 = vst [vmem:[#allocation29_spill] sm:$0xff] %v3201_v60  ;;  %5233 = vst [vmem:[#allocation31_spill] sm:$0xff] %v3212_v0  ;;  %v3225_v6 = vcombine.high %v142_v62, %v146_v63  ;;  %v134_v11 = vld [vmem:[%s4926_s1 + $0x380] sm:$0xff]  ;;  %v3236_v13 = vcombine.high %v143_v1, %v147_v2  ;;  %v135_v15 = vld [vmem:[%s4926_s1 + $0x388] sm:$0xff] }
  0x14   :  { %5234 = vst [vmem:[#allocation32_spill] sm:$0xff] %v3221_v5  ;;  %5236 = vst [vmem:[#allocation34_spill] sm:$0xff] %v3227_v7  ;;  %v138_v12 = vld [vmem:[%s4926_s1 + $0x3a0] sm:$0xff]  ;;  %v139_v18 = vld [vmem:[%s4926_s1 + $0x3a8] sm:$0xff]  ;;  %v3245_v19 = vcombine.low %v142_v62, %v146_v63  ;;  %v3251_v23 = vcombine.low %v143_v1, %v147_v2 }
  0x15   :  { %5235 = vst [vmem:[#allocation33_spill] sm:$0xff] %v3225_v6  ;;  %5237 = vst [vmem:[#allocation35_spill] sm:$0xff] %v3236_v13  ;;  %v3249_v22 = vcombine.high %v134_v11, %v138_v12  ;;  %v126_v25 = vld [vmem:[%s4926_s1 + $0x340] sm:$0xff]  ;;  %v3260_v30 = vcombine.high %v135_v15, %v139_v18  ;;  %v127_v31 = vld [vmem:[%s4926_s1 + $0x348] sm:$0xff]  ;;  %v3269_v34 = vcombine.low %v134_v11, %v138_v12 }
  0x16   :  { %817 = vmatpush1.bf16.msra.mxu0 %v3149_v43  ;;  %858 = vmatpush1.bf16.msra.mxu1 %v3155_v45  ;;  %5238 = vst [vmem:[#allocation36_spill] sm:$0xff] %v3245_v19  ;;  %5240 = vst [vmem:[#allocation38_spill] sm:$0xff] %v3251_v23  ;;  %v130_v26 = vld [vmem:[%s4926_s1 + $0x360] sm:$0xff]  ;;  %v131_v33 = vld [vmem:[%s4926_s1 + $0x368] sm:$0xff]  ;;  %v3275_v39 = vcombine.low %v135_v15, %v139_v18 }
  0x17   :  { %818 = vmatprep.subr.bf16.mxu0 %v3153_v44  ;;  %859 = vmatprep.subr.bf16.mxu1 %v3164_v48  ;;  %5239 = vst [vmem:[#allocation37_spill] sm:$0xff] %v3249_v22  ;;  %5241 = vst [vmem:[#allocation39_spill] sm:$0xff] %v3260_v30  ;;  %v3273_v38 = vcombine.high %v126_v25, %v130_v26  ;;  %v118_v41 = vld [vmem:[%s4926_s1 + $0x300] sm:$0xff]  ;;  %v3284_v46 = vcombine.high %v127_v31, %v131_v33  ;;  %v119_v47 = vld [vmem:[%s4926_s1 + $0x308] sm:$0xff] }
  0x18   :  { %5242 = vst [vmem:[#allocation40_spill] sm:$0xff] %v3269_v34  ;;  %5244 = vst [vmem:[#allocation42_spill] sm:$0xff] %v3275_v39  ;;  %v122_v42 = vld [vmem:[%s4926_s1 + $0x320] sm:$0xff]  ;;  %v123_v49 = vld [vmem:[%s4926_s1 + $0x328] sm:$0xff]  ;;  %v3293_v50 = vcombine.low %v126_v25, %v130_v26  ;;  %v3299_v55 = vcombine.low %v127_v31, %v131_v33 }
  0x19   :  { %5243 = vst [vmem:[#allocation41_spill] sm:$0xff] %v3273_v38  ;;  %5245 = vst [vmem:[#allocation43_spill] sm:$0xff] %v3284_v46  ;;  %v3297_v54 = vcombine.high %v118_v41, %v122_v42  ;;  %v110_v57 = vld [vmem:[%s4926_s1 + $0x2c0] sm:$0xff]  ;;  %v3308_v62 = vcombine.high %v119_v47, %v123_v49  ;;  %v111_v63 = vld [vmem:[%s4926_s1 + $0x2c8] sm:$0xff]  ;;  %v3317_v2 = vcombine.low %v118_v41, %v122_v42 }
  0x1a   :  { %819 = vmatpush1.bf16.msra.mxu0 %v3173_v51  ;;  %860 = vmatpush1.bf16.msra.mxu1 %v3179_v53  ;;  %5246 = vst [vmem:[#allocation44_spill] sm:$0xff] %v3293_v50  ;;  %5248 = vst [vmem:[#allocation46_spill] sm:$0xff] %v3299_v55  ;;  %v114_v58 = vld [vmem:[%s4926_s1 + $0x2e0] sm:$0xff]  ;;  %v115_v1 = vld [vmem:[%s4926_s1 + $0x2e8] sm:$0xff]  ;;  %v3323_v12 = vcombine.low %v119_v47, %v123_v49 }
  0x1b   :  { %820 = vmatprep.subr.bf16.mxu0 %v3177_v52  ;;  %861 = vmatprep.subr.bf16.mxu1 %v3188_v56  ;;  %5247 = vst [vmem:[#allocation45_spill] sm:$0xff] %v3297_v54  ;;  %5249 = vst [vmem:[#allocation47_spill] sm:$0xff] %v3308_v62  ;;  %v3321_v11 = vcombine.high %v110_v57, %v114_v58  ;;  %v102_v15 = vld [vmem:[%s4926_s1 + $0x280] sm:$0xff]  ;;  %v3332_v25 = vcombine.high %v111_v63, %v115_v1  ;;  %v103_v26 = vld [vmem:[%s4926_s1 + $0x288] sm:$0xff] }
  0x1c   :  { %5250 = vst [vmem:[#allocation48_spill] sm:$0xff] %v3317_v2  ;;  %5252 = vst [vmem:[#allocation50_spill] sm:$0xff] %v3323_v12  ;;  %v106_v18 = vld [vmem:[%s4926_s1 + $0x2a0] sm:$0xff]  ;;  %v107_v31 = vld [vmem:[%s4926_s1 + $0x2a8] sm:$0xff]  ;;  %v3341_v33 = vcombine.low %v110_v57, %v114_v58  ;;  %v3347_v42 = vcombine.low %v111_v63, %v115_v1 }
  0x1d   :  { %5251 = vst [vmem:[#allocation49_spill] sm:$0xff] %v3321_v11  ;;  %5253 = vst [vmem:[#allocation51_spill] sm:$0xff] %v3332_v25  ;;  %v3345_v41 = vcombine.high %v102_v15, %v106_v18  ;;  %v94_v47 = vld [vmem:[%s4926_s1 + $0x240] sm:$0xff]  ;;  %v3356_v57 = vcombine.high %v103_v26, %v107_v31  ;;  %v95_v58 = vld [vmem:[%s4926_s1 + $0x248] sm:$0xff]  ;;  %v3365_v1 = vcombine.low %v102_v15, %v106_v18 }
  0x1e   :  { %821 = vmatpush1.bf16.msra.mxu0 %v3197_v59  ;;  %862 = vmatpush1.bf16.msra.mxu1 %v3203_v61  ;;  %5254 = vst [vmem:[#allocation52_spill] sm:$0xff] %v3341_v33  ;;  %5256 = vst [vmem:[#allocation54_spill] sm:$0xff] %v3347_v42  ;;  %v98_v49 = vld [vmem:[%s4926_s1 + $0x260] sm:$0xff]  ;;  %v99_v63 = vld [vmem:[%s4926_s1 + $0x268] sm:$0xff] }
  0x1f   :  { %822 = vmatprep.subr.bf16.mxu0 %v3201_v60  ;;  %863 = vmatprep.subr.bf16.mxu1 %v3212_v0  ;;  %5255 = vst [vmem:[#allocation53_spill] sm:$0xff] %v3345_v41  ;;  %5257 = vst [vmem:[#allocation55_spill] sm:$0xff] %v3356_v57  ;;  %v3369_v14 = vcombine.high %v94_v47, %v98_v49  ;;  %v3380_v15 = vcombine.high %v95_v58, %v99_v63  ;;  %v87_v18 = vld [vmem:[%s4926_s1 + $0x208] sm:$0xff] }
  0x20   :  { %5258 = vst [vmem:[#allocation56_spill] sm:$0xff] %v3365_v1 }
  0x21   :  { %5259 = vst [vmem:[#allocation57_spill] sm:$0xff] %v3369_v14  ;;  %5261 = vst [vmem:[#allocation59_spill] sm:$0xff] %v3380_v15 }
  0x22   :  { %823 = vmatpush1.bf16.msra.mxu0 %v3221_v5  ;;  %864 = vmatpush1.bf16.msra.mxu1 %v3227_v7 }
  0x23   :  { %824 = vmatprep.subr.bf16.mxu0 %v3225_v6  ;;  %865 = vmatprep.subr.bf16.mxu1 %v3236_v13 }
  0x26   :  { %825 = vmatpush2.bf16.msra.mxu0 %v3245_v19  ;;  %866 = vmatpush2.bf16.msra.mxu1 %v3251_v23 }
  0x27   :  { %826 = vmatprep.subr.bf16.mxu0 %v3249_v22  ;;  %867 = vmatprep.subr.bf16.mxu1 %v3260_v30 }
  0x2a   :  { %827 = vmatpush2.bf16.msra.mxu0 %v3269_v34  ;;  %868 = vmatpush2.bf16.msra.mxu1 %v3275_v39 }
  0x2b   :  { %828 = vmatprep.subr.bf16.mxu0 %v3273_v38  ;;  %869 = vmatprep.subr.bf16.mxu1 %v3284_v46 }
  0x2e   :  { %829 = vmatpush2.bf16.msra.mxu0 %v3293_v50  ;;  %870 = vmatpush2.bf16.msra.mxu1 %v3299_v55 }
  0x2f   :  { %830 = vmatprep.subr.bf16.mxu0 %v3297_v54  ;;  %871 = vmatprep.subr.bf16.mxu1 %v3308_v62 }
  0x32   :  { %831 = vmatpush2.bf16.msra.mxu0 %v3317_v2  ;;  %872 = vmatpush2.bf16.msra.mxu1 %v3323_v12  ;;  %v56_v12 = vld [vmem:[%s4926_s1 + $0x110] sm:$0xff] }
  0x33   :  { %832 = vmatprep.subr.bf16.mxu0 %v3321_v11  ;;  %873 = vmatprep.subr.bf16.mxu1 %v3332_v25  ;;  %v3371_v25 = vcombine.low %v103_v26, %v107_v31  ;;  %v86_v11 = vld [vmem:[%s4926_s1 + $0x200] sm:$0xff]  ;;  %v91_v26 = vld [vmem:[%s4926_s1 + $0x228] sm:$0xff]  ;;  %v3389_v31 = vcombine.low %v94_v47, %v98_v49  ;;  %v81_v49 = vld [vmem:[%s4926_s1 + $0x1d8] sm:$0xff] }
  0x34   :  { %v3404_v47 = vcombine.high %v87_v18, %v91_v26 }
  0x35   :  { %5260 = vst [vmem:[#allocation58_spill] sm:$0xff] %v3371_v25  ;;  %5262 = vst [vmem:[#allocation60_spill] sm:$0xff] %v3389_v31 }
  0x36   :  { %833 = vmatpush2.bf16.msra.mxu0 %v3341_v33  ;;  %874 = vmatpush2.bf16.msra.mxu1 %v3347_v42  ;;  %v90_v33 = vld [vmem:[%s4926_s1 + $0x220] sm:$0xff]  ;;  %v80_v42 = vld [vmem:[%s4926_s1 + $0x1d0] sm:$0xff]  ;;  %5265 = vst [vmem:[#allocation63_spill] sm:$0xff] %v3404_v47 }
  0x37   :  { %834 = vmatprep.subr.bf16.mxu0 %v3345_v41  ;;  %875 = vmatprep.subr.bf16.mxu1 %v3356_v57  ;;  %v3393_v57 = vcombine.high %v86_v11, %v90_v33  ;;  %v3395_v41 = vcombine.low %v95_v58, %v99_v63  ;;  %v85_v58 = vld [vmem:[%s4926_s1 + $0x1f8] sm:$0xff]  ;;  %v3413_v63 = vcombine.low %v86_v11, %v90_v33 }
  0x38   :  { %v3428_v11 = vcombine.high %v81_v49, %v85_v58  ;;  %v73_v33 = vld [vmem:[%s4926_s1 + $0x198] sm:$0xff] }
  0x39   :  { %5263 = vst [vmem:[#allocation61_spill] sm:$0xff] %v3393_v57  ;;  %5264 = vst [vmem:[#allocation62_spill] sm:$0xff] %v3395_v41 }
  0x3a   :  { %835 = vmatpush2.bf16.msra.mxu0 %v3365_v1  ;;  %876 = vmatpush2.bf16.msra.mxu1 %v3371_v25  ;;  %v84_v1 = vld [vmem:[%s4926_s1 + $0x1f0] sm:$0xff]  ;;  %5266 = vst [vmem:[#allocation64_spill] sm:$0xff] %v3413_v63  ;;  %5269 = vst [vmem:[#allocation67_spill] sm:$0xff] %v3428_v11 }
  0x3b   :  { %836 = vmatprep.subr.bf16.mxu0 %v3369_v14  ;;  %877 = vmatprep.subr.bf16.mxu1 %v3380_v15  ;;  %v3417_v15 = vcombine.high %v80_v42, %v84_v1  ;;  %v3419_v14 = vcombine.low %v87_v18, %v91_v26  ;;  %v72_v25 = vld [vmem:[%s4926_s1 + $0x190] sm:$0xff]  ;;  %v77_v18 = vld [vmem:[%s4926_s1 + $0x1b8] sm:$0xff]  ;;  %v3437_v26 = vcombine.low %v80_v42, %v84_v1  ;;  %v5274_v1 = vmov 0.0|0.0  }
  0x3c   :  { %v3452_v42 = vcombine.high %v73_v33, %v77_v18 }
  0x3d   :  { %5267 = vst [vmem:[#allocation65_spill] sm:$0xff] %v3417_v15  ;;  %5268 = vst [vmem:[#allocation66_spill] sm:$0xff] %v3419_v14 }
  0x3e   :  { %837 = vmatpush2.bf16.msra.mxu0 %v3389_v31  ;;  %878 = vmatpush2.bf16.msra.mxu1 %v3395_v41  ;;  %v76_v31 = vld [vmem:[%s4926_s1 + $0x1b0] sm:$0xff]  ;;  %5270 = vst [vmem:[#allocation68_spill] sm:$0xff] %v3437_v26  ;;  %5273 = vst [vmem:[#allocation71_spill] sm:$0xff] %v3452_v42 }
  0x3f   :  { %838 = vmatprep.subr.bf16.mxu0 %v3393_v57  ;;  %879 = vmatprep.subr.bf16.mxu1 %v3404_v47  ;;  %v3441_v47 = vcombine.high %v72_v25, %v76_v31  ;;  %v3443_v57 = vcombine.low %v81_v49, %v85_v58  ;;  %v64_v41 = vld [vmem:[%s4926_s1 + $0x150] sm:$0xff]  ;;  %v69_v49 = vld [vmem:[%s4926_s1 + $0x178] sm:$0xff]  ;;  %v3462_v58 = vcombine.low %v72_v25, %v76_v31 }
  0x40   :  { %v60_v25 = vld [vmem:[%s4926_s1 + $0x130] sm:$0xff] }
  0x41   :  { %5271 = vst [vmem:[#allocation69_spill] sm:$0xff] %v3441_v47  ;;  %5272 = vst [vmem:[#allocation70_spill] sm:$0xff] %v3443_v57 }
  0x42   :  { %839 = vmatpush2.bf16.msra.mxu0 %v3413_v63  ;;  %880 = vmatpush2.bf16.msra.mxu1 %v3419_v14  ;;  %v68_v63 = vld [vmem:[%s4926_s1 + $0x170] sm:$0xff]  ;;  %5275 = vst [vmem:[#allocation72_spill] sm:$0xff] %v3462_v58  ;;  %v3469_v14 = vcombine.low %v73_v33, %v77_v18  ;;  %v61_v33 = vld [vmem:[%s4926_s1 + $0x138] sm:$0xff] }
  0x43   :  { %890 = vmatprep.subr.bf16.mxu0 %v3417_v15  ;;  %931 = vmatprep.subr.bf16.mxu1 %v3428_v11  ;;  %v65_v15 = vld [vmem:[%s4926_s1 + $0x158] sm:$0xff]  ;;  %v3467_v11 = vcombine.high %v64_v41, %v68_v63  ;;  %v3489_v18 = vcombine.low %v64_v41, %v68_v63 }
  0x44   :  { %5277 = vst [vmem:[#allocation74_spill] sm:$0xff] %v3469_v14  ;;  %v3478_v31 = vcombine.high %v65_v15, %v69_v49  ;;  %v49_v63 = vld [vmem:[%s4926_s1 + $0xd8] sm:$0xff] }
  0x45   :  { %841 = vmatmul.mubr.bf16.vlgmr.msra.gmra.mxu0 %v5274_v1  ;;  %882 = vmatmul.mubr.bf16.vlgmr.msra.gmra.mxu1 %v5274_v1  ;;  %5276 = vst [vmem:[#allocation73_spill] sm:$0xff] %v3467_v11  ;;  %5279 = vst [vmem:[#allocation76_spill] sm:$0xff] %v3489_v18 }
  0x46   :  { %891 = vmatpush1.bf16.msra.mxu0 %v3437_v26  ;;  %932 = vmatpush1.bf16.msra.mxu1 %v3443_v57  ;;  %5278 = vst [vmem:[#allocation75_spill] sm:$0xff] %v3478_v31  ;;  %v3495_v57 = vcombine.low %v65_v15, %v69_v49  ;;  %v48_v26 = vld [vmem:[%s4926_s1 + $0xd0] sm:$0xff]  ;;  %v53_v15 = vld [vmem:[%s4926_s1 + $0xf8] sm:$0xff]  ;;  %v3513_v49 = vcombine.low %v56_v12, %v60_v25 }
  0x47   :  { %892 = vmatprep.subr.bf16.mxu0 %v3441_v47  ;;  %933 = vmatprep.subr.bf16.mxu1 %v3452_v42  ;;  %v57_v47 = vld [vmem:[%s4926_s1 + $0x118] sm:$0xff]  ;;  %v3493_v42 = vcombine.high %v56_v12, %v60_v25  ;;  %v3528_v12 = vcombine.high %v49_v63, %v53_v15 }
  0x48   :  { %922 = vmatprep.mubr.bf16.mxu0 %v5274_v1  ;;  %963 = vmatprep.mubr.bf16.mxu1 %v5274_v1  ;;  %5281 = vst [vmem:[#allocation78_spill] sm:$0xff] %v3495_v57  ;;  %v3504_v41 = vcombine.high %v57_v47, %v61_v33  ;;  %5283 = vst [vmem:[#allocation80_spill] sm:$0xff] %v3513_v49  ;;  %v41_v25 = vld [vmem:[%s4926_s1 + $0x98] sm:$0xff] }
  0x49   :  { %5280 = vst [vmem:[#allocation77_spill] sm:$0xff] %v3493_v42  ;;  %5286 = vst [vmem:[#allocation83_spill] sm:$0xff] %v3528_v12 }
  0x4a   :  { %893 = vmatpush1.bf16.msra.mxu0 %v3462_v58  ;;  %934 = vmatpush1.bf16.msra.mxu1 %v3469_v14  ;;  %v52_v58 = vld [vmem:[%s4926_s1 + $0xf0] sm:$0xff]  ;;  %5282 = vst [vmem:[#allocation79_spill] sm:$0xff] %v3504_v41 }
  0x4b   :  { %894 = vmatprep.subr.bf16.mxu0 %v3467_v11  ;;  %935 = vmatprep.subr.bf16.mxu1 %v3478_v31  ;;  %v3517_v31 = vcombine.high %v48_v26, %v52_v58  ;;  %v3519_v11 = vcombine.low %v57_v47, %v61_v33  ;;  %v40_v14 = vld [vmem:[%s4926_s1 + $0x90] sm:$0xff]  ;;  %v45_v47 = vld [vmem:[%s4926_s1 + $0xb8] sm:$0xff]  ;;  %v3537_v33 = vcombine.low %v48_v26, %v52_v58 }
  0x4c   :  { %v3552_v26 = vcombine.high %v41_v25, %v45_v47  ;;  %v33_v58 = vld [vmem:[%s4926_s1 + $0x58] sm:$0xff] }
  0x4d   :  { %5284 = vst [vmem:[#allocation81_spill] sm:$0xff] %v3517_v31  ;;  %5285 = vst [vmem:[#allocation82_spill] sm:$0xff] %v3519_v11 }
  0x4e   :  { %895 = vmatpush1.bf16.msra.mxu0 %v3489_v18  ;;  %936 = vmatpush1.bf16.msra.mxu1 %v3495_v57  ;;  %v44_v18 = vld [vmem:[%s4926_s1 + $0xb0] sm:$0xff]  ;;  %5287 = vst [vmem:[#allocation84_spill] sm:$0xff] %v3537_v33  ;;  %5290 = vst [vmem:[#allocation87_spill] sm:$0xff] %v3552_v26 }
  0x4f   :  { %896 = vmatprep.subr.bf16.mxu0 %v3493_v42  ;;  %937 = vmatprep.subr.bf16.mxu1 %v3504_v41  ;;  %v3541_v41 = vcombine.high %v40_v14, %v44_v18  ;;  %v3543_v42 = vcombine.low %v49_v63, %v53_v15  ;;  %v32_v57 = vld [vmem:[%s4926_s1 + $0x50] sm:$0xff]  ;;  %v37_v63 = vld [vmem:[%s4926_s1 + $0x78] sm:$0xff]  ;;  %v3561_v15 = vcombine.low %v40_v14, %v44_v18 }
  0x50   :  { %v3576_v14 = vcombine.high %v33_v58, %v37_v63  ;;  %v25_v18 = vld [vmem:[%s4926_s1 + $0x18] sm:$0xff] }
  0x51   :  { %5288 = vst [vmem:[#allocation85_spill] sm:$0xff] %v3541_v41  ;;  %5289 = vst [vmem:[#allocation86_spill] sm:$0xff] %v3543_v42 }
  0x52   :  { %897 = vmatpush1.bf16.msra.mxu0 %v3513_v49  ;;  %938 = vmatpush1.bf16.msra.mxu1 %v3519_v11  ;;  %v36_v49 = vld [vmem:[%s4926_s1 + $0x70] sm:$0xff]  ;;  %5291 = vst [vmem:[#allocation88_spill] sm:$0xff] %v3561_v15  ;;  %5294 = vst [vmem:[#allocation91_spill] sm:$0xff] %v3576_v14 }
  0x53   :  { %898 = vmatprep.subr.bf16.mxu0 %v3517_v31  ;;  %939 = vmatprep.subr.bf16.mxu1 %v3528_v12  ;;  %v3565_v12 = vcombine.high %v32_v57, %v36_v49  ;;  %v3567_v31 = vcombine.low %v41_v25, %v45_v47  ;;  %v24_v11 = vld [vmem:[%s4926_s1 + $0x10] sm:$0xff]  ;;  %v29_v25 = vld [vmem:[%s4926_s1 + $0x38] sm:$0xff]  ;;  %v3585_v47 = vcombine.low %v32_v57, %v36_v49 }
  0x54   :  { %v3600_v57 = vcombine.high %v25_v18, %v29_v25  ;;  %v145_v49 = vld [vmem:[%s4926_s1 + $0x3d8] sm:$0xff] }
  0x55   :  { %5292 = vst [vmem:[#allocation89_spill] sm:$0xff] %v3565_v12  ;;  %5293 = vst [vmem:[#allocation90_spill] sm:$0xff] %v3567_v31 }
  0x56   :  { %899 = vmatpush1.bf16.msra.mxu0 %v3537_v33  ;;  %940 = vmatpush1.bf16.msra.mxu1 %v3543_v42  ;;  %v28_v33 = vld [vmem:[%s4926_s1 + $0x30] sm:$0xff]  ;;  %5295 = vst [vmem:[#allocation92_spill] sm:$0xff] %v3585_v47  ;;  %5298 = vst [vmem:[#allocation95_spill] sm:$0xff] %v3600_v57 }
  0x57   :  { %900 = vmatprep.subr.bf16.mxu0 %v3541_v41  ;;  %941 = vmatprep.subr.bf16.mxu1 %v3552_v26  ;;  %v3589_v26 = vcombine.high %v24_v11, %v28_v33  ;;  %v3591_v41 = vcombine.low %v33_v58, %v37_v63  ;;  %v144_v42 = vld [vmem:[%s4926_s1 + $0x3d0] sm:$0xff]  ;;  %v149_v58 = vld [vmem:[%s4926_s1 + $0x3f8] sm:$0xff]  ;;  %v3609_v63 = vcombine.low %v24_v11, %v28_v33 }
  0x58   :  { %v3624_v11 = vcombine.high %v145_v49, %v149_v58  ;;  %v137_v33 = vld [vmem:[%s4926_s1 + $0x398] sm:$0xff] }
  0x59   :  { %5296 = vst [vmem:[#allocation93_spill] sm:$0xff] %v3589_v26  ;;  %5297 = vst [vmem:[#allocation94_spill] sm:$0xff] %v3591_v41 }
  0x5a   :  { %901 = vmatpush1.bf16.msra.mxu0 %v3561_v15  ;;  %942 = vmatpush1.bf16.msra.mxu1 %v3567_v31  ;;  %v148_v15 = vld [vmem:[%s4926_s1 + $0x3f0] sm:$0xff]  ;;  %5299 = vst [vmem:[#allocation96_spill] sm:$0xff] %v3609_v63  ;;  %5302 = vst [vmem:[#allocation99_spill] sm:$0xff] %v3624_v11 }
  0x5b   :  { %902 = vmatprep.subr.bf16.mxu0 %v3565_v12  ;;  %943 = vmatprep.subr.bf16.mxu1 %v3576_v14  ;;  %v3613_v14 = vcombine.high %v144_v42, %v148_v15  ;;  %v3615_v12 = vcombine.low %v25_v18, %v29_v25  ;;  %v136_v31 = vld [vmem:[%s4926_s1 + $0x390] sm:$0xff]  ;;  %v141_v18 = vld [vmem:[%s4926_s1 + $0x3b8] sm:$0xff]  ;;  %v3633_v25 = vcombine.low %v144_v42, %v148_v15 }
  0x5c   :  { %v3648_v42 = vcombine.high %v137_v33, %v141_v18  ;;  %v129_v15 = vld [vmem:[%s4926_s1 + $0x358] sm:$0xff] }
  0x5d   :  { %5300 = vst [vmem:[#allocation97_spill] sm:$0xff] %v3613_v14  ;;  %5301 = vst [vmem:[#allocation98_spill] sm:$0xff] %v3615_v12 }
  0x5e   :  { %903 = vmatpush1.bf16.msra.mxu0 %v3585_v47  ;;  %944 = vmatpush1.bf16.msra.mxu1 %v3591_v41  ;;  %v140_v47 = vld [vmem:[%s4926_s1 + $0x3b0] sm:$0xff]  ;;  %5303 = vst [vmem:[#allocation100_spill] sm:$0xff] %v3633_v25  ;;  %5306 = vst [vmem:[#allocation103_spill] sm:$0xff] %v3648_v42 }
  0x5f   :  { %904 = vmatprep.subr.bf16.mxu0 %v3589_v26  ;;  %945 = vmatprep.subr.bf16.mxu1 %v3600_v57  ;;  %v3637_v57 = vcombine.high %v136_v31, %v140_v47  ;;  %v3639_v26 = vcombine.low %v145_v49, %v149_v58  ;;  %v128_v41 = vld [vmem:[%s4926_s1 + $0x350] sm:$0xff]  ;;  %v133_v49 = vld [vmem:[%s4926_s1 + $0x378] sm:$0xff]  ;;  %v3657_v58 = vcombine.low %v136_v31, %v140_v47 }
  0x60   :  { %v3672_v31 = vcombine.high %v129_v15, %v133_v49  ;;  %v121_v47 = vld [vmem:[%s4926_s1 + $0x318] sm:$0xff] }
  0x61   :  { %5304 = vst [vmem:[#allocation101_spill] sm:$0xff] %v3637_v57  ;;  %5305 = vst [vmem:[#allocation102_spill] sm:$0xff] %v3639_v26 }
  0x62   :  { %905 = vmatpush1.bf16.msra.mxu0 %v3609_v63  ;;  %946 = vmatpush1.bf16.msra.mxu1 %v3615_v12  ;;  %v132_v63 = vld [vmem:[%s4926_s1 + $0x370] sm:$0xff]  ;;  %5307 = vst [vmem:[#allocation104_spill] sm:$0xff] %v3657_v58  ;;  %5310 = vst [vmem:[#allocation107_spill] sm:$0xff] %v3672_v31 }
  0x63   :  { %906 = vmatprep.subr.bf16.mxu0 %v3613_v14  ;;  %947 = vmatprep.subr.bf16.mxu1 %v3624_v11  ;;  %v3661_v11 = vcombine.high %v128_v41, %v132_v63  ;;  %v3663_v14 = vcombine.low %v137_v33, %v141_v18  ;;  %v120_v12 = vld [vmem:[%s4926_s1 + $0x310] sm:$0xff]  ;;  %v125_v33 = vld [vmem:[%s4926_s1 + $0x338] sm:$0xff]  ;;  %v3681_v18 = vcombine.low %v128_v41, %v132_v63 }
  0x64   :  { %v3696_v41 = vcombine.high %v121_v47, %v125_v33  ;;  %v113_v63 = vld [vmem:[%s4926_s1 + $0x2d8] sm:$0xff] }
  0x65   :  { %5308 = vst [vmem:[#allocation105_spill] sm:$0xff] %v3661_v11  ;;  %5309 = vst [vmem:[#allocation106_spill] sm:$0xff] %v3663_v14 }
  0x66   :  { %907 = vmatpush2.bf16.msra.mxu0 %v3633_v25  ;;  %948 = vmatpush2.bf16.msra.mxu1 %v3639_v26  ;;  %v124_v25 = vld [vmem:[%s4926_s1 + $0x330] sm:$0xff]  ;;  %5311 = vst [vmem:[#allocation108_spill] sm:$0xff] %v3681_v18  ;;  %5314 = vst [vmem:[#allocation111_spill] sm:$0xff] %v3696_v41 }
  0x67   :  { %908 = vmatprep.subr.bf16.mxu0 %v3637_v57  ;;  %949 = vmatprep.subr.bf16.mxu1 %v3648_v42  ;;  %v3685_v42 = vcombine.high %v120_v12, %v124_v25  ;;  %v3687_v57 = vcombine.low %v129_v15, %v133_v49  ;;  %v112_v26 = vld [vmem:[%s4926_s1 + $0x2d0] sm:$0xff]  ;;  %v117_v15 = vld [vmem:[%s4926_s1 + $0x2f8] sm:$0xff]  ;;  %v3705_v49 = vcombine.low %v120_v12, %v124_v25 }
  0x68   :  { %v3720_v12 = vcombine.high %v113_v63, %v117_v15  ;;  %v105_v25 = vld [vmem:[%s4926_s1 + $0x298] sm:$0xff] }
  0x69   :  { %5312 = vst [vmem:[#allocation109_spill] sm:$0xff] %v3685_v42  ;;  %5313 = vst [vmem:[#allocation110_spill] sm:$0xff] %v3687_v57 }
  0x6a   :  { %909 = vmatpush2.bf16.msra.mxu0 %v3657_v58  ;;  %950 = vmatpush2.bf16.msra.mxu1 %v3663_v14  ;;  %v116_v58 = vld [vmem:[%s4926_s1 + $0x2f0] sm:$0xff]  ;;  %5315 = vst [vmem:[#allocation112_spill] sm:$0xff] %v3705_v49  ;;  %5318 = vst [vmem:[#allocation115_spill] sm:$0xff] %v3720_v12 }
  0x6b   :  { %910 = vmatprep.subr.bf16.mxu0 %v3661_v11  ;;  %951 = vmatprep.subr.bf16.mxu1 %v3672_v31  ;;  %v3709_v31 = vcombine.high %v112_v26, %v116_v58  ;;  %v3711_v11 = vcombine.low %v121_v47, %v125_v33  ;;  %v104_v14 = vld [vmem:[%s4926_s1 + $0x290] sm:$0xff]  ;;  %v109_v47 = vld [vmem:[%s4926_s1 + $0x2b8] sm:$0xff]  ;;  %v3729_v33 = vcombine.low %v112_v26, %v116_v58 }
  0x6c   :  { %v3744_v26 = vcombine.high %v105_v25, %v109_v47  ;;  %v97_v58 = vld [vmem:[%s4926_s1 + $0x258] sm:$0xff] }
  0x6d   :  { %5316 = vst [vmem:[#allocation113_spill] sm:$0xff] %v3709_v31  ;;  %5317 = vst [vmem:[#allocation114_spill] sm:$0xff] %v3711_v11 }
  0x6e   :  { %911 = vmatpush2.bf16.msra.mxu0 %v3681_v18  ;;  %952 = vmatpush2.bf16.msra.mxu1 %v3687_v57  ;;  %v108_v18 = vld [vmem:[%s4926_s1 + $0x2b0] sm:$0xff]  ;;  %5319 = vst [vmem:[#allocation116_spill] sm:$0xff] %v3729_v33  ;;  %5322 = vst [vmem:[#allocation119_spill] sm:$0xff] %v3744_v26 }
  0x6f   :  { %912 = vmatprep.subr.bf16.mxu0 %v3685_v42  ;;  %953 = vmatprep.subr.bf16.mxu1 %v3696_v41  ;;  %v3733_v41 = vcombine.high %v104_v14, %v108_v18  ;;  %v3735_v42 = vcombine.low %v113_v63, %v117_v15  ;;  %v96_v57 = vld [vmem:[%s4926_s1 + $0x250] sm:$0xff]  ;;  %v101_v63 = vld [vmem:[%s4926_s1 + $0x278] sm:$0xff]  ;;  %v3753_v15 = vcombine.low %v104_v14, %v108_v18 }
  0x70   :  { %v3768_v14 = vcombine.high %v97_v58, %v101_v63  ;;  %v89_v18 = vld [vmem:[%s4926_s1 + $0x218] sm:$0xff] }
  0x71   :  { %5320 = vst [vmem:[#allocation117_spill] sm:$0xff] %v3733_v41  ;;  %5321 = vst [vmem:[#allocation118_spill] sm:$0xff] %v3735_v42 }
  0x72   :  { %913 = vmatpush2.bf16.msra.mxu0 %v3705_v49  ;;  %954 = vmatpush2.bf16.msra.mxu1 %v3711_v11  ;;  %v100_v49 = vld [vmem:[%s4926_s1 + $0x270] sm:$0xff]  ;;  %5323 = vst [vmem:[#allocation120_spill] sm:$0xff] %v3753_v15  ;;  %5326 = vst [vmem:[#allocation123_spill] sm:$0xff] %v3768_v14 }
  0x73   :  { %914 = vmatprep.subr.bf16.mxu0 %v3709_v31  ;;  %955 = vmatprep.subr.bf16.mxu1 %v3720_v12  ;;  %v3757_v12 = vcombine.high %v96_v57, %v100_v49  ;;  %v3759_v31 = vcombine.low %v105_v25, %v109_v47  ;;  %v88_v11 = vld [vmem:[%s4926_s1 + $0x210] sm:$0xff]  ;;  %v93_v25 = vld [vmem:[%s4926_s1 + $0x238] sm:$0xff]  ;;  %v3777_v47 = vcombine.low %v96_v57, %v100_v49 }
  0x74   :  { %v3793_v57 = vcombine.low %v89_v18, %v93_v25  ;;  %v5335_v49 = vld [vmem:[#allocation49_spill] sm:$0xff] }
  0x75   :  { %5324 = vst [vmem:[#allocation121_spill] sm:$0xff] %v3757_v12  ;;  %5325 = vst [vmem:[#allocation122_spill] sm:$0xff] %v3759_v31 }
  0x76   :  { %915 = vmatpush2.bf16.msra.mxu0 %v3729_v33  ;;  %956 = vmatpush2.bf16.msra.mxu1 %v3735_v42  ;;  %v92_v33 = vld [vmem:[%s4926_s1 + $0x230] sm:$0xff]  ;;  %5327 = vst [vmem:[#allocation124_spill] sm:$0xff] %v3777_v47  ;;  %v3786_v42 = vcombine.high %v89_v18, %v93_v25  ;;  %5332 = vst [vmem:[#allocation129_spill] sm:$0xff] %v3793_v57  ;;  %v5339_v18 = vld [vmem:[#allocation53_spill] sm:$0xff] }
  0x77   :  { %916 = vmatprep.subr.bf16.mxu0 %v3733_v41  ;;  %957 = vmatprep.subr.bf16.mxu1 %v3744_v26  ;;  %v3781_v26 = vcombine.high %v88_v11, %v92_v33  ;;  %v3783_v41 = vcombine.low %v97_v58, %v101_v63  ;;  %v3789_v2 = vcombine.low %v88_v11, %v92_v33  ;;  %v5334_v11 = vld [vmem:[#allocation50_spill] sm:$0xff]  ;;  %v5336_v33 = vld [vmem:[#allocation51_spill] sm:$0xff]  ;;  %v5337_v58 = vld [vmem:[#allocation52_spill] sm:$0xff] }
  0x78   :  { %5330 = vst [vmem:[#allocation127_spill] sm:$0xff] %v3786_v42  ;;  %v5338_v63 = vld [vmem:[#allocation54_spill] sm:$0xff]  ;;  %v5340_v25 = vld [vmem:[#allocation55_spill] sm:$0xff] }
  0x79   :  { %5328 = vst [vmem:[#allocation125_spill] sm:$0xff] %v3781_v26  ;;  %5329 = vst [vmem:[#allocation126_spill] sm:$0xff] %v3783_v41 }
  0x7a   :  { %917 = vmatpush2.bf16.msra.mxu0 %v3753_v15  ;;  %958 = vmatpush2.bf16.msra.mxu1 %v3759_v31  ;;  %5331 = vst [vmem:[#allocation128_spill] sm:$0xff] %v3789_v2 }
  0x7b   :  { %918 = vmatprep.subr.bf16.mxu0 %v3757_v12  ;;  %959 = vmatprep.subr.bf16.mxu1 %v3768_v14 }
  0x7e   :  { %919 = vmatpush2.bf16.msra.mxu0 %v3777_v47  ;;  %960 = vmatpush2.bf16.msra.mxu1 %v3783_v41 }
  0x7f   :  { %920 = vmatprep.subr.bf16.mxu0 %v3781_v26  ;;  %961 = vmatprep.subr.bf16.mxu1 %v3786_v42 }
  0x82   :  { %921 = vmatpush2.bf16.msra.mxu0 %v3789_v2  ;;  %962 = vmatpush2.bf16.msra.mxu1 %v3793_v57 }
  0x83   :  { %1038 = vmatprep.subr.bf16.mxu0 %v3033_v3  ;;  %1079 = vmatprep.subr.bf16.mxu1 %v3048_v9 }
  0x85   :  { %923 = vmatmul.mubr.bf16.vlgmr.msra.gmra.mxu0 %v5274_v1  ;;  %964 = vmatmul.mubr.bf16.vlgmr.msra.gmra.mxu1 %v5274_v1  ;;  %v5333_v1 = vld [vmem:[#allocation48_spill] sm:$0xff] }
  0x86   :  { %1039 = vmatpush1.bf16.msra.mxu0 %v3035_v4  ;;  %1080 = vmatpush1.bf16.msra.mxu1 %v3050_v10 }
  0x87   :  { %1040 = vmatprep.subr.bf16.mxu0 %v3046_v8  ;;  %1081 = vmatprep.subr.bf16.mxu1 %v3071_v17 }
  0x8a   :  { %1041 = vmatpush1.bf16.msra.mxu0 %v3068_v16  ;;  %1082 = vmatpush1.bf16.msra.mxu1 %v3083_v21 }
  0x8b   :  { %1042 = vmatprep.subr.bf16.mxu0 %v3081_v20  ;;  %1083 = vmatprep.subr.bf16.mxu1 %v3092_v24 }
  0x8e   :  { %1043 = vmatpush1.bf16.msra.mxu0 %v3101_v27  ;;  %1084 = vmatpush1.bf16.msra.mxu1 %v3107_v29 }
  0x8f   :  { %1044 = vmatprep.subr.bf16.mxu0 %v3105_v28  ;;  %1085 = vmatprep.subr.bf16.mxu1 %v3116_v32 }
  0x92   :  { %1045 = vmatpush1.bf16.msra.mxu0 %v3125_v35  ;;  %1086 = vmatpush1.bf16.msra.mxu1 %v3131_v37 }
  0x93   :  { %1046 = vmatprep.subr.bf16.mxu0 %v3129_v36  ;;  %1087 = vmatprep.subr.bf16.mxu1 %v3140_v40 }
  0x96   :  { %1047 = vmatpush1.bf16.msra.mxu0 %v3149_v43  ;;  %1088 = vmatpush1.bf16.msra.mxu1 %v3155_v45 }
  0x97   :  { %1048 = vmatprep.subr.bf16.mxu0 %v3153_v44  ;;  %1089 = vmatprep.subr.bf16.mxu1 %v3164_v48 }
  0x9a   :  { %1049 = vmatpush1.bf16.msra.mxu0 %v3173_v51  ;;  %1090 = vmatpush1.bf16.msra.mxu1 %v3179_v53 }
  0x9b   :  { %1050 = vmatprep.subr.bf16.mxu0 %v3177_v52  ;;  %1091 = vmatprep.subr.bf16.mxu1 %v3188_v56 }
  0x9e   :  { %1051 = vmatpush1.bf16.msra.mxu0 %v3197_v59  ;;  %1092 = vmatpush1.bf16.msra.mxu1 %v3203_v61 }
  0x9f   :  { %1052 = vmatprep.subr.bf16.mxu0 %v3201_v60  ;;  %1093 = vmatprep.subr.bf16.mxu1 %v3212_v0 }
  0xa2   :  { %1053 = vmatpush1.bf16.msra.mxu0 %v3221_v5  ;;  %1094 = vmatpush1.bf16.msra.mxu1 %v3227_v7 }
  0xa3   :  { %1054 = vmatprep.subr.bf16.mxu0 %v3225_v6  ;;  %1095 = vmatprep.subr.bf16.mxu1 %v3236_v13 }
  0xa6   :  { %1055 = vmatpush2.bf16.msra.mxu0 %v3245_v19  ;;  %1096 = vmatpush2.bf16.msra.mxu1 %v3251_v23  ;;  %v156_v23 = vld [vmem:[%s4927_s0 + $0x10] sm:$0xff] }
  0xa7   :  { %1056 = vmatprep.subr.bf16.mxu0 %v3249_v22  ;;  %1097 = vmatprep.subr.bf16.mxu1 %v3260_v30  ;;  %v162_v19 = vunpack.c.l.bf16 %v156_v23 }
  0xaa   :  { %1057 = vmatpush2.bf16.msra.mxu0 %v3269_v34  ;;  %1098 = vmatpush2.bf16.msra.mxu1 %v3275_v39 }
  0xab   :  { %1058 = vmatprep.subr.bf16.mxu0 %v3273_v38  ;;  %1099 = vmatprep.subr.bf16.mxu1 %v3284_v46 }
  0xae   :  { %1059 = vmatpush2.bf16.msra.mxu0 %v3293_v50  ;;  %1100 = vmatpush2.bf16.msra.mxu1 %v3299_v55  ;;  %v5341_v55 = vld [vmem:[#allocation56_spill] sm:$0xff] }
  0xaf   :  { %1060 = vmatprep.subr.bf16.mxu0 %v3297_v54  ;;  %1101 = vmatprep.subr.bf16.mxu1 %v3308_v62  ;;  %v5342_v54 = vld [vmem:[#allocation58_spill] sm:$0xff]  ;;  %v5343_v62 = vld [vmem:[#allocation57_spill] sm:$0xff] }
  0xb2   :  { %1061 = vmatpush2.bf16.msra.mxu0 %v5333_v1  ;;  %1102 = vmatpush2.bf16.msra.mxu1 %v5334_v11  ;;  %v5344_v1 = vld [vmem:[#allocation59_spill] sm:$0xff]  ;;  %v5345_v11 = vld [vmem:[#allocation60_spill] sm:$0xff] }
  0xb3   :  { %1062 = vmatprep.subr.bf16.mxu0 %v5335_v49  ;;  %1103 = vmatprep.subr.bf16.mxu1 %v5336_v33  ;;  %v5346_v49 = vld [vmem:[#allocation62_spill] sm:$0xff]  ;;  %v5347_v33 = vld [vmem:[#allocation61_spill] sm:$0xff] }
  0xb6   :  { %1063 = vmatpush2.bf16.msra.mxu0 %v5337_v58  ;;  %1104 = vmatpush2.bf16.msra.mxu1 %v5338_v63  ;;  %v5348_v58 = vld [vmem:[#allocation63_spill] sm:$0xff]  ;;  %v5349_v63 = vld [vmem:[#allocation64_spill] sm:$0xff] }
  0xb7   :  { %1064 = vmatprep.subr.bf16.mxu0 %v5339_v18  ;;  %1105 = vmatprep.subr.bf16.mxu1 %v5340_v25  ;;  %v5350_v18 = vld [vmem:[#allocation66_spill] sm:$0xff]  ;;  %v5351_v25 = vld [vmem:[#allocation65_spill] sm:$0xff] }
  0xba   :  { %1065 = vmatpush2.bf16.msra.mxu0 %v5341_v55  ;;  %1106 = vmatpush2.bf16.msra.mxu1 %v5342_v54  ;;  %v5352_v55 = vld [vmem:[#allocation67_spill] sm:$0xff] }
  0xbb   :  { %1066 = vmatprep.subr.bf16.mxu0 %v5343_v62  ;;  %1107 = vmatprep.subr.bf16.mxu1 %v5344_v1 }
  0xbe   :  { %1067 = vmatpush2.bf16.msra.mxu0 %v5345_v11  ;;  %1108 = vmatpush2.bf16.msra.mxu1 %v5346_v49 }
  0xbf   :  { %1068 = vmatprep.subr.bf16.mxu0 %v5347_v33  ;;  %1109 = vmatprep.subr.bf16.mxu1 %v5348_v58  ;;  %v155_v58 = vld [vmem:[%s4927_s0 + $0x8] sm:$0xff] }
  0xc0   :  { %v161_v33 = vunpack.c.h.bf16 %v155_v58 }
  0xc2   :  { %1069 = vmatpush2.bf16.msra.mxu0 %v5349_v63  ;;  %1110 = vmatpush2.bf16.msra.mxu1 %v5350_v18  ;;  %v154_v18 = vld [vmem:[%s4927_s0] sm:$0xff]  ;;  %v160_v63 = vunpack.c.l.bf16 %v155_v58 }
  0xc3   :  { %1120 = vmatprep.subr.bf16.mxu0 %v5351_v25  ;;  %1161 = vmatprep.subr.bf16.mxu1 %v5352_v55  ;;  %v158_v25 = vunpack.c.l.bf16 %v154_v18  ;;  %v159_v55 = vunpack.c.h.bf16 %v154_v18 }
 0x105   :  { %v842_v54 = vpop.f32.mrf.mxu0  ;;  %v883_v62 = vpop.f32.mrf.mxu1 }
 0x106   :  { %v974_v39 = vadd.f32 %v883_v62, %v160_v63  ;;  %v972_v34 = vadd.f32 %v842_v54, %v158_v25  ;;  %v157_v62 = vld [vmem:[%s4927_s0 + $0x18] sm:$0xff]  ;;  %v163_v54 = vunpack.c.h.bf16 %v156_v23 }
 0x107   :  { %v844_v50 = vpop.f32.mrf.mxu0  ;;  %v885_v1 = vpop.f32.mrf.mxu1 }
 0x108   :  { %v975_v30 = vadd.f32 %v885_v1, %v161_v33  ;;  %v973_v22 = vadd.f32 %v844_v50, %v159_v55  ;;  %v164_v50 = vunpack.c.l.bf16 %v157_v62  ;;  %v165_v55 = vunpack.c.h.bf16 %v157_v62 }
 0x109   :  { %v846_v46 = vpop.f32.mrf.mxu0  ;;  %v887_v11 = vpop.f32.mrf.mxu1 }
 0x10a   :  { %v988_v46 = vmul.f32 0.5, %v974_v39  ;;  %v980_v11 = vmul.f32 0.5, %v972_v34 }
 0x10b   :  { %v847_v38 = vpop.f32.mrf.mxu0  ;;  %v888_v49 = vpop.f32.mrf.mxu1 }
 0x10c   :  { %v989_v38 = vmul.f32 0.5, %v975_v30  ;;  %v981_v49 = vmul.f32 0.5, %v973_v22  ;;  %2838 = vtanh.f32 %v988_v46 }
 0x10d   :  { %2840 = vtanh.f32 %v980_v11 }
 0x10e   :  { %2842 = vtanh.f32 %v989_v38 }
 0x10f   :  { %2844 = vtanh.f32 %v981_v49 }
 0x119   :  { %v2839_v25 = vpop.eup %2838 }
 0x11a   :  { %v2841_v11 = vpop.eup %2840  ;;  %v992_v6 = vadd.f32 1.0, %v2839_v25 }
 0x11b   :  { %v2843_v13 = vpop.eup %2842 }
 0x11c   :  { %v2845_v7 = vpop.eup %2844  ;;  %v994_v62 = vmul.f32 0.5, %v992_v6 }
 0x145   :  { %v924_v1 = vpop.f32.mrf.mxu0  ;;  %v965_v34 = vpop.f32.mrf.mxu1 }
 0x146   :  { %v976_v39 = vadd.f32 %v924_v1, %v162_v19  ;;  %v978_v63 = vadd.f32 %v965_v34, %v164_v50  ;;  %v984_v19 = vadd.f32 1.0, %v2841_v11  ;;  %v993_v1 = vadd.f32 1.0, %v2843_v13 }
 0x147   :  { %v926_v30 = vpop.f32.mrf.mxu0  ;;  %v967_v33 = vpop.f32.mrf.mxu1 }
 0x148   :  { %2846 = vtanh.f32 %v976_v39  ;;  %v977_v22 = vadd.f32 %v926_v30, %v163_v54  ;;  %v979_v38 = vadd.f32 %v967_v33, %v165_v55  ;;  %v998_v23 = vmul.f32 0.5, %v978_v63 }
 0x149   :  { %v928_v58 = vpop.f32.mrf.mxu0  ;;  %v969_v18 = vpop.f32.mrf.mxu1  ;;  %v985_v54 = vadd.f32 1.0, %v2845_v7  ;;  %v986_v39 = vmul.f32 0.5, %v984_v19  ;;  %v995_v30 = vmul.f32 0.5, %v993_v1 }
 0x14a   :  { %2848 = vtanh.f32 %v977_v22  ;;  %v999_v5 = vmul.f32 0.5, %v979_v38  ;;  %v1006_v22 = vmul.f32 0.0, %v994_v62 }
 0x14b   :  { %v929_v46 = vpop.f32.mrf.mxu0  ;;  %v970_v49 = vpop.f32.mrf.mxu1  ;;  %2850 = vtanh.f32 %v998_v23  ;;  %v987_v34 = vmul.f32 0.5, %v985_v54  ;;  %v1007_v55 = vmul.f32 0.0, %v995_v30  ;;  %v5354_v30 = vld [vmem:[#allocation70_spill] sm:$0xff] }
 0x14c   :  { %2852 = vtanh.f32 %v999_v5 }
 0x155   :  { %v2847_v50 = vpop.eup %2846 }
 0x156   :  { %v1008_v58 = vmul.f32 %v2847_v50, %v986_v39  ;;  %v5353_v39 = vld [vmem:[#allocation68_spill] sm:$0xff]  ;;  %v5355_v50 = vld [vmem:[#allocation69_spill] sm:$0xff] }
 0x157   :  { %v2849_v18 = vpop.eup %2848 }
 0x158   :  { %v3878_v33 = vadd.f32 %v1008_v58, %v1006_v22  ;;  %v1009_v63 = vmul.f32 %v2849_v18, %v987_v34  ;;  %v2851_v7 = vpop.eup %2850  ;;  %v5356_v34 = vld [vmem:[#allocation71_spill] sm:$0xff]  ;;  %v5357_v22 = vld [vmem:[#allocation72_spill] sm:$0xff]  ;;  %v5358_v58 = vld [vmem:[#allocation74_spill] sm:$0xff] }
 0x159   :  { %v2853_v6 = vpop.eup %2852  ;;  %v1002_v13 = vadd.f32 1.0, %v2851_v7  ;;  %v5359_v18 = vld [vmem:[#allocation73_spill] sm:$0xff]  ;;  %v5362_v7 = vld [vmem:[#allocation78_spill] sm:$0xff] }
 0x15a   :  { %2854 = vtanh.f32 %v3878_v33  ;;  %v3881_v25 = vadd.f32 %v1009_v63, %v1007_v55  ;;  %v1003_v46 = vadd.f32 1.0, %v2853_v6  ;;  %v5360_v55 = vld [vmem:[#allocation75_spill] sm:$0xff]  ;;  %v5361_v63 = vld [vmem:[#allocation76_spill] sm:$0xff]  ;;  %v5363_v6 = vld [vmem:[#allocation77_spill] sm:$0xff] }
 0x15b   :  { %v1004_v5 = vmul.f32 0.5, %v1002_v13  ;;  %v5364_v13 = vld [vmem:[#allocation79_spill] sm:$0xff] }
 0x15c   :  { %2856 = vtanh.f32 %v3881_v25  ;;  %v1005_v38 = vmul.f32 0.5, %v1003_v46  ;;  %v5365_v46 = vld [vmem:[#allocation80_spill] sm:$0xff] }
 0x167   :  { %v2855_v11 = vpop.eup %2854 }
 0x168   :  { %v1014_v23 = vmul.f32 %v2855_v11, %v1004_v5  ;;  %v5366_v5 = vld [vmem:[#allocation82_spill] sm:$0xff]  ;;  %v5367_v11 = vld [vmem:[#allocation81_spill] sm:$0xff] }
 0x169   :  { %v2857_v49 = vpop.eup %2856 }
 0x16a   :  { %v1015_v19 = vmul.f32 %v2857_v49, %v1005_v38  ;;  %v3884_v62 = vpack.c.bf16 %v1014_v23, %v1014_v23  ;;  %v5368_v38 = vld [vmem:[#allocation83_spill] sm:$0xff]  ;;  %v5369_v49 = vld [vmem:[#allocation84_spill] sm:$0xff] }
 0x16c   :  { %v2829_v1 = vpack.c.bf16 %v1015_v19, %v1014_v23  ;;  %v1017_v54 = vpack.c.bf16 %v1015_v19, %v1015_v19  ;;  %v5370_v23 = vld [vmem:[#allocation86_spill] sm:$0xff]  ;;  %v5371_v19 = vld [vmem:[#allocation85_spill] sm:$0xff] }
 0x16e   :  { %1024 = vst [vmem:[%s4928_s2] sm:$0xff] %v2829_v1  ;;  %1070 = vmatprep.mubr.bf16.mxu0 %v1017_v54  ;;  %1111 = vmatprep.mubr.bf16.mxu1 %v1017_v54  ;;  %v5372_v1 = vld [vmem:[#allocation87_spill] sm:$0xff] }
 0x16f   :  { %1071 = vmatmul.mubr.bf16.vlgmr.msra.gmra.mxu0 %v3884_v62  ;;  %1112 = vmatmul.mubr.bf16.vlgmr.msra.gmra.mxu1 %v3884_v62 }
 0x170   :  { %1121 = vmatpush1.bf16.msra.mxu0 %v5353_v39  ;;  %1162 = vmatpush1.bf16.msra.mxu1 %v5354_v30 }
 0x171   :  { %1152 = vmatprep.mubr.bf16.mxu0 %v1017_v54  ;;  %1193 = vmatprep.mubr.bf16.mxu1 %v1017_v54  ;;  %v5373_v54 = vld [vmem:[#allocation88_spill] sm:$0xff] }
 0x172   :  { %1122 = vmatprep.subr.bf16.mxu0 %v5355_v50  ;;  %1163 = vmatprep.subr.bf16.mxu1 %v5356_v34 }
 0x174   :  { %1123 = vmatpush1.bf16.msra.mxu0 %v5357_v22  ;;  %1164 = vmatpush1.bf16.msra.mxu1 %v5358_v58 }
 0x175   :  { %1124 = vmatprep.subr.bf16.mxu0 %v5359_v18  ;;  %1165 = vmatprep.subr.bf16.mxu1 %v5360_v55 }
 0x178   :  { %1125 = vmatpush1.bf16.msra.mxu0 %v5361_v63  ;;  %1166 = vmatpush1.bf16.msra.mxu1 %v5362_v7 }
 0x179   :  { %1126 = vmatprep.subr.bf16.mxu0 %v5363_v6  ;;  %1167 = vmatprep.subr.bf16.mxu1 %v5364_v13  ;;  %v5374_v6 = vld [vmem:[#allocation90_spill] sm:$0xff]  ;;  %v5375_v13 = vld [vmem:[#allocation89_spill] sm:$0xff] }
 0x17c   :  { %1127 = vmatpush1.bf16.msra.mxu0 %v5365_v46  ;;  %1168 = vmatpush1.bf16.msra.mxu1 %v5366_v5  ;;  %v5376_v46 = vld [vmem:[#allocation91_spill] sm:$0xff]  ;;  %v5377_v5 = vld [vmem:[#allocation92_spill] sm:$0xff] }
 0x17d   :  { %1128 = vmatprep.subr.bf16.mxu0 %v5367_v11  ;;  %1169 = vmatprep.subr.bf16.mxu1 %v5368_v38  ;;  %v5378_v11 = vld [vmem:[#allocation94_spill] sm:$0xff]  ;;  %v5379_v38 = vld [vmem:[#allocation93_spill] sm:$0xff] }
 0x180   :  { %1129 = vmatpush1.bf16.msra.mxu0 %v5369_v49  ;;  %1170 = vmatpush1.bf16.msra.mxu1 %v5370_v23  ;;  %v5380_v49 = vld [vmem:[#allocation95_spill] sm:$0xff]  ;;  %v5381_v23 = vld [vmem:[#allocation96_spill] sm:$0xff] }
 0x181   :  { %1130 = vmatprep.subr.bf16.mxu0 %v5371_v19  ;;  %1171 = vmatprep.subr.bf16.mxu1 %v5372_v1  ;;  %v5382_v19 = vld [vmem:[#allocation98_spill] sm:$0xff]  ;;  %v5383_v1 = vld [vmem:[#allocation97_spill] sm:$0xff] }
 0x184   :  { %1131 = vmatpush1.bf16.msra.mxu0 %v5373_v54  ;;  %1172 = vmatpush1.bf16.msra.mxu1 %v5374_v6  ;;  %v5384_v54 = vld [vmem:[#allocation99_spill] sm:$0xff]  ;;  %v5385_v6 = vld [vmem:[#allocation100_spill] sm:$0xff] }
 0x185   :  { %1132 = vmatprep.subr.bf16.mxu0 %v5375_v13  ;;  %1173 = vmatprep.subr.bf16.mxu1 %v5376_v46  ;;  %v5386_v13 = vld [vmem:[#allocation102_spill] sm:$0xff]  ;;  %v5387_v46 = vld [vmem:[#allocation101_spill] sm:$0xff] }
 0x188   :  { %1133 = vmatpush1.bf16.msra.mxu0 %v5377_v5  ;;  %1174 = vmatpush1.bf16.msra.mxu1 %v5378_v11  ;;  %v5388_v5 = vld [vmem:[#allocation103_spill] sm:$0xff]  ;;  %v5389_v11 = vld [vmem:[#allocation104_spill] sm:$0xff] }
 0x189   :  { %1134 = vmatprep.subr.bf16.mxu0 %v5379_v38  ;;  %1175 = vmatprep.subr.bf16.mxu1 %v5380_v49  ;;  %v5390_v38 = vld [vmem:[#allocation106_spill] sm:$0xff]  ;;  %v5391_v49 = vld [vmem:[#allocation105_spill] sm:$0xff] }
 0x18c   :  { %1135 = vmatpush1.bf16.msra.mxu0 %v5381_v23  ;;  %1176 = vmatpush1.bf16.msra.mxu1 %v5382_v19  ;;  %v5392_v23 = vld [vmem:[#allocation107_spill] sm:$0xff]  ;;  %v5393_v19 = vld [vmem:[#allocation108_spill] sm:$0xff] }
 0x18d   :  { %1136 = vmatprep.subr.bf16.mxu0 %v5383_v1  ;;  %1177 = vmatprep.subr.bf16.mxu1 %v5384_v54  ;;  %v5394_v1 = vld [vmem:[#allocation110_spill] sm:$0xff]  ;;  %v5395_v54 = vld [vmem:[#allocation109_spill] sm:$0xff] }
 0x190   :  { %1137 = vmatpush2.bf16.msra.mxu0 %v5385_v6  ;;  %1178 = vmatpush2.bf16.msra.mxu1 %v5386_v13  ;;  %v5396_v6 = vld [vmem:[#allocation111_spill] sm:$0xff]  ;;  %v5397_v13 = vld [vmem:[#allocation112_spill] sm:$0xff] }
 0x191   :  { %1138 = vmatprep.subr.bf16.mxu0 %v5387_v46  ;;  %1179 = vmatprep.subr.bf16.mxu1 %v5388_v5  ;;  %v5398_v46 = vld [vmem:[#allocation114_spill] sm:$0xff]  ;;  %v5399_v5 = vld [vmem:[#allocation113_spill] sm:$0xff] }
 0x194   :  { %1139 = vmatpush2.bf16.msra.mxu0 %v5389_v11  ;;  %1180 = vmatpush2.bf16.msra.mxu1 %v5390_v38  ;;  %v5400_v11 = vld [vmem:[#allocation115_spill] sm:$0xff]  ;;  %v5401_v38 = vld [vmem:[#allocation116_spill] sm:$0xff] }
 0x195   :  { %1140 = vmatprep.subr.bf16.mxu0 %v5391_v49  ;;  %1181 = vmatprep.subr.bf16.mxu1 %v5392_v23  ;;  %v5402_v49 = vld [vmem:[#allocation118_spill] sm:$0xff]  ;;  %v5403_v23 = vld [vmem:[#allocation117_spill] sm:$0xff] }
 0x198   :  { %1141 = vmatpush2.bf16.msra.mxu0 %v5393_v19  ;;  %1182 = vmatpush2.bf16.msra.mxu1 %v5394_v1  ;;  %v5404_v19 = vld [vmem:[#allocation119_spill] sm:$0xff] }
 0x199   :  { %1142 = vmatprep.subr.bf16.mxu0 %v5395_v54  ;;  %1183 = vmatprep.subr.bf16.mxu1 %v5396_v6 }
 0x19c   :  { %1143 = vmatpush2.bf16.msra.mxu0 %v5397_v13  ;;  %1184 = vmatpush2.bf16.msra.mxu1 %v5398_v46 }
 0x19d   :  { %1144 = vmatprep.subr.bf16.mxu0 %v5399_v5  ;;  %1185 = vmatprep.subr.bf16.mxu1 %v5400_v11 }
 0x1a0   :  { %1145 = vmatpush2.bf16.msra.mxu0 %v5401_v38  ;;  %1186 = vmatpush2.bf16.msra.mxu1 %v5402_v49 }
 0x1a1   :  { %1146 = vmatprep.subr.bf16.mxu0 %v5403_v23  ;;  %1187 = vmatprep.subr.bf16.mxu1 %v5404_v19 }
 0x1a4   :  { %1147 = vmatpush2.bf16.msra.mxu0 %v3753_v15  ;;  %1188 = vmatpush2.bf16.msra.mxu1 %v3759_v31 }
 0x1a5   :  { %1148 = vmatprep.subr.bf16.mxu0 %v3757_v12  ;;  %1189 = vmatprep.subr.bf16.mxu1 %v3768_v14 }
 0x1a8   :  { %1149 = vmatpush2.bf16.msra.mxu0 %v3777_v47  ;;  %1190 = vmatpush2.bf16.msra.mxu1 %v3783_v41 }
 0x1a9   :  { %1150 = vmatprep.subr.bf16.mxu0 %v3781_v26  ;;  %1191 = vmatprep.subr.bf16.mxu1 %v3786_v42 }
 0x1ac   :  { %1151 = vmatpush2.bf16.msra.mxu0 %v3789_v2  ;;  %1192 = vmatpush2.bf16.msra.mxu1 %v3793_v57 }
 0x1ad   :  { %1269 = vmatprep.subr.bf16.mxu0 %v3033_v3  ;;  %1310 = vmatprep.subr.bf16.mxu1 %v3048_v9 }
 0x1af   :  { %1153 = vmatmul.mubr.bf16.vlgmr.msra.gmra.mxu0 %v3884_v62  ;;  %1194 = vmatmul.mubr.bf16.vlgmr.msra.gmra.mxu1 %v3884_v62  ;;  %v5405_v62 = vld [vmem:[#allocation32_spill] sm:$0xff] }
 0x1b0   :  { %1270 = vmatpush1.bf16.msra.mxu0 %v3035_v4  ;;  %1311 = vmatpush1.bf16.msra.mxu1 %v3050_v10 }
 0x1b1   :  { %1271 = vmatprep.subr.bf16.mxu0 %v3046_v8  ;;  %1312 = vmatprep.subr.bf16.mxu1 %v3071_v17 }
 0x1b4   :  { %1272 = vmatpush1.bf16.msra.mxu0 %v3068_v16  ;;  %1313 = vmatpush1.bf16.msra.mxu1 %v3083_v21 }
 0x1b5   :  { %1273 = vmatprep.subr.bf16.mxu0 %v3081_v20  ;;  %1314 = vmatprep.subr.bf16.mxu1 %v3092_v24 }
 0x1b8   :  { %1274 = vmatpush1.bf16.msra.mxu0 %v3101_v27  ;;  %1315 = vmatpush1.bf16.msra.mxu1 %v3107_v29 }
 0x1b9   :  { %1275 = vmatprep.subr.bf16.mxu0 %v3105_v28  ;;  %1316 = vmatprep.subr.bf16.mxu1 %v3116_v32  ;;  %v2789_v28 = vld [vmem:[%s4927_s0 + $0x30] sm:$0xff] }
 0x1ba   :  { %v1034_v29 = vunpack.c.l.bf16 %v2789_v28  ;;  %v1035_v27 = vunpack.c.h.bf16 %v2789_v28 }
 0x1bc   :  { %1276 = vmatpush1.bf16.msra.mxu0 %v3125_v35  ;;  %1317 = vmatpush1.bf16.msra.mxu1 %v3131_v37 }
 0x1bd   :  { %1277 = vmatprep.subr.bf16.mxu0 %v3129_v36  ;;  %1318 = vmatprep.subr.bf16.mxu1 %v3140_v40 }
 0x1c0   :  { %1278 = vmatpush1.bf16.msra.mxu0 %v3149_v43  ;;  %1319 = vmatpush1.bf16.msra.mxu1 %v3155_v45 }
 0x1c1   :  { %1279 = vmatprep.subr.bf16.mxu0 %v3153_v44  ;;  %1320 = vmatprep.subr.bf16.mxu1 %v3164_v48  ;;  %v5406_v44 = vld [vmem:[#allocation34_spill] sm:$0xff]  ;;  %v5407_v48 = vld [vmem:[#allocation33_spill] sm:$0xff] }
 0x1c4   :  { %1280 = vmatpush1.bf16.msra.mxu0 %v3173_v51  ;;  %1321 = vmatpush1.bf16.msra.mxu1 %v3179_v53  ;;  %v5408_v51 = vld [vmem:[#allocation35_spill] sm:$0xff]  ;;  %v5409_v53 = vld [vmem:[#allocation36_spill] sm:$0xff] }
 0x1c5   :  { %1281 = vmatprep.subr.bf16.mxu0 %v3177_v52  ;;  %1322 = vmatprep.subr.bf16.mxu1 %v3188_v56  ;;  %v5410_v52 = vld [vmem:[#allocation38_spill] sm:$0xff]  ;;  %v5411_v56 = vld [vmem:[#allocation37_spill] sm:$0xff] }
 0x1c8   :  { %1282 = vmatpush1.bf16.msra.mxu0 %v3197_v59  ;;  %1323 = vmatpush1.bf16.msra.mxu1 %v3203_v61  ;;  %v5412_v59 = vld [vmem:[#allocation39_spill] sm:$0xff]  ;;  %v5413_v61 = vld [vmem:[#allocation40_spill] sm:$0xff] }
 0x1c9   :  { %1283 = vmatprep.subr.bf16.mxu0 %v3201_v60  ;;  %1324 = vmatprep.subr.bf16.mxu1 %v3212_v0  ;;  %v5414_v60 = vld [vmem:[#allocation42_spill] sm:$0xff]  ;;  %v5415_v0 = vld [vmem:[#allocation41_spill] sm:$0xff] }
 0x1cc   :  { %1284 = vmatpush1.bf16.msra.mxu0 %v5405_v62  ;;  %1325 = vmatpush1.bf16.msra.mxu1 %v5406_v44  ;;  %v5416_v62 = vld [vmem:[#allocation43_spill] sm:$0xff]  ;;  %v5417_v44 = vld [vmem:[#allocation44_spill] sm:$0xff] }
 0x1cd   :  { %1285 = vmatprep.subr.bf16.mxu0 %v5407_v48  ;;  %1326 = vmatprep.subr.bf16.mxu1 %v5408_v51  ;;  %v5418_v48 = vld [vmem:[#allocation46_spill] sm:$0xff]  ;;  %v5419_v51 = vld [vmem:[#allocation45_spill] sm:$0xff] }
 0x1d0   :  { %1286 = vmatpush2.bf16.msra.mxu0 %v5409_v53  ;;  %1327 = vmatpush2.bf16.msra.mxu1 %v5410_v52  ;;  %v5420_v53 = vld [vmem:[#allocation47_spill] sm:$0xff]  ;;  %v5421_v52 = vld [vmem:[#allocation48_spill] sm:$0xff] }
 0x1d1   :  { %1287 = vmatprep.subr.bf16.mxu0 %v5411_v56  ;;  %1328 = vmatprep.subr.bf16.mxu1 %v5412_v59  ;;  %v5422_v56 = vld [vmem:[#allocation50_spill] sm:$0xff]  ;;  %v5423_v59 = vld [vmem:[#allocation49_spill] sm:$0xff] }
 0x1d4   :  { %1288 = vmatpush2.bf16.msra.mxu0 %v5413_v61  ;;  %1329 = vmatpush2.bf16.msra.mxu1 %v5414_v60  ;;  %v5424_v61 = vld [vmem:[#allocation51_spill] sm:$0xff]  ;;  %v5425_v60 = vld [vmem:[#allocation52_spill] sm:$0xff] }
 0x1d5   :  { %1289 = vmatprep.subr.bf16.mxu0 %v5415_v0  ;;  %1330 = vmatprep.subr.bf16.mxu1 %v5416_v62  ;;  %v5426_v0 = vld [vmem:[#allocation54_spill] sm:$0xff]  ;;  %v5427_v62 = vld [vmem:[#allocation53_spill] sm:$0xff] }
 0x1d8   :  { %1290 = vmatpush2.bf16.msra.mxu0 %v5417_v44  ;;  %1331 = vmatpush2.bf16.msra.mxu1 %v5418_v48  ;;  %v5428_v44 = vld [vmem:[#allocation55_spill] sm:$0xff]  ;;  %v5429_v48 = vld [vmem:[#allocation56_spill] sm:$0xff] }
 0x1d9   :  { %1291 = vmatprep.subr.bf16.mxu0 %v5419_v51  ;;  %1332 = vmatprep.subr.bf16.mxu1 %v5420_v53  ;;  %v5430_v51 = vld [vmem:[#allocation58_spill] sm:$0xff]  ;;  %v5431_v53 = vld [vmem:[#allocation57_spill] sm:$0xff] }
 0x1dc   :  { %1292 = vmatpush2.bf16.msra.mxu0 %v5421_v52  ;;  %1333 = vmatpush2.bf16.msra.mxu1 %v5422_v56  ;;  %v5432_v52 = vld [vmem:[#allocation59_spill] sm:$0xff]  ;;  %v5433_v56 = vld [vmem:[#allocation60_spill] sm:$0xff] }
 0x1dd   :  { %1293 = vmatprep.subr.bf16.mxu0 %v5423_v59  ;;  %1334 = vmatprep.subr.bf16.mxu1 %v5424_v61  ;;  %v5434_v59 = vld [vmem:[#allocation62_spill] sm:$0xff]  ;;  %v5435_v61 = vld [vmem:[#allocation61_spill] sm:$0xff] }
 0x1e0   :  { %1294 = vmatpush2.bf16.msra.mxu0 %v5425_v60  ;;  %1335 = vmatpush2.bf16.msra.mxu1 %v5426_v0  ;;  %v5436_v60 = vld [vmem:[#allocation63_spill] sm:$0xff]  ;;  %v5437_v0 = vld [vmem:[#allocation64_spill] sm:$0xff] }
 0x1e1   :  { %1295 = vmatprep.subr.bf16.mxu0 %v5427_v62  ;;  %1336 = vmatprep.subr.bf16.mxu1 %v5428_v44  ;;  %v5438_v62 = vld [vmem:[#allocation66_spill] sm:$0xff]  ;;  %v5439_v44 = vld [vmem:[#allocation65_spill] sm:$0xff] }
 0x1e4   :  { %1296 = vmatpush2.bf16.msra.mxu0 %v5429_v48  ;;  %1337 = vmatpush2.bf16.msra.mxu1 %v5430_v51  ;;  %v5440_v48 = vld [vmem:[#allocation67_spill] sm:$0xff] }
 0x1e5   :  { %1297 = vmatprep.subr.bf16.mxu0 %v5431_v53  ;;  %1338 = vmatprep.subr.bf16.mxu1 %v5432_v52 }
 0x1e8   :  { %1298 = vmatpush2.bf16.msra.mxu0 %v5433_v56  ;;  %1339 = vmatpush2.bf16.msra.mxu1 %v5434_v59 }
 0x1e9   :  { %1299 = vmatprep.subr.bf16.mxu0 %v5435_v61  ;;  %1340 = vmatprep.subr.bf16.mxu1 %v5436_v60  ;;  %v2788_v60 = vld [vmem:[%s4927_s0 + $0x28] sm:$0xff] }
 0x1ea   :  { %v1033_v61 = vunpack.c.h.bf16 %v2788_v60 }
 0x1ec   :  { %1300 = vmatpush2.bf16.msra.mxu0 %v5437_v0  ;;  %1341 = vmatpush2.bf16.msra.mxu1 %v5438_v62  ;;  %v2787_v62 = vld [vmem:[%s4927_s0 + $0x20] sm:$0xff]  ;;  %v1032_v0 = vunpack.c.l.bf16 %v2788_v60 }
 0x1ed   :  { %1351 = vmatprep.subr.bf16.mxu0 %v5439_v44  ;;  %1392 = vmatprep.subr.bf16.mxu1 %v5440_v48  ;;  %v1030_v44 = vunpack.c.l.bf16 %v2787_v62  ;;  %v1031_v36 = vunpack.c.h.bf16 %v2787_v62 }
 0x22f   :  { %v1072_v51 = vpop.f32.mrf.mxu0  ;;  %v1113_v53 = vpop.f32.mrf.mxu1 }
 0x230   :  { %v1204_v48 = vadd.f32 %v1113_v53, %v1032_v0  ;;  %v1202_v37 = vadd.f32 %v1072_v51, %v1030_v44  ;;  %v2790_v44 = vld [vmem:[%s4927_s0 + $0x38] sm:$0xff] }
 0x231   :  { %v1074_v45 = vpop.f32.mrf.mxu0  ;;  %v1115_v52 = vpop.f32.mrf.mxu1  ;;  %v1037_v51 = vunpack.c.h.bf16 %v2790_v44 }
 0x232   :  { %v1205_v35 = vadd.f32 %v1115_v52, %v1033_v61  ;;  %v1218_v32 = vmul.f32 0.5, %v1204_v48 }
 0x233   :  { %v1076_v43 = vpop.f32.mrf.mxu0  ;;  %v1117_v56 = vpop.f32.mrf.mxu1 }
 0x234   :  { %v1203_v43 = vadd.f32 %v1074_v45, %v1031_v36  ;;  %v1210_v56 = vmul.f32 0.5, %v1202_v37  ;;  %2858 = vtanh.f32 %v1218_v32  ;;  %v1036_v32 = vunpack.c.l.bf16 %v2790_v44 }
 0x235   :  { %v1077_v40 = vpop.f32.mrf.mxu0  ;;  %v1118_v59 = vpop.f32.mrf.mxu1 }
 0x236   :  { %v1219_v40 = vmul.f32 0.5, %v1205_v35  ;;  %v1211_v59 = vmul.f32 0.5, %v1203_v43  ;;  %2860 = vtanh.f32 %v1210_v56 }
 0x238   :  { %2862 = vtanh.f32 %v1219_v40 }
 0x239   :  { %2864 = vtanh.f32 %v1211_v59 }
 0x241   :  { %v2859_v61 = vpop.eup %2858 }
 0x242   :  { %v1222_v59 = vadd.f32 1.0, %v2859_v61 }
 0x243   :  { %v2861_v43 = vpop.eup %2860 }
 0x244   :  { %v1214_v20 = vadd.f32 1.0, %v2861_v43 }
 0x245   :  { %v2863_v40 = vpop.eup %2862 }
 0x246   :  { %v2865_v24 = vpop.eup %2864 }
 0x247   :  { %v1215_v16 = vadd.f32 1.0, %v2865_v24 }
 0x26f   :  { %v1154_v60 = vpop.f32.mrf.mxu0  ;;  %v1195_v48 = vpop.f32.mrf.mxu1 }
 0x270   :  { %v1206_v36 = vadd.f32 %v1154_v60, %v1034_v29  ;;  %v1208_v28 = vadd.f32 %v1195_v48, %v1036_v32  ;;  %v1223_v60 = vadd.f32 1.0, %v2863_v40  ;;  %v1217_v48 = vmul.f32 0.5, %v1215_v16 }
 0x271   :  { %v1156_v37 = vpop.f32.mrf.mxu0  ;;  %v1197_v35 = vpop.f32.mrf.mxu1 }
 0x272   :  { %2866 = vtanh.f32 %v1206_v36  ;;  %v1207_v45 = vadd.f32 %v1156_v37, %v1035_v27  ;;  %v1209_v56 = vadd.f32 %v1197_v35, %v1037_v51  ;;  %v1228_v29 = vmul.f32 0.5, %v1208_v28 }
 0x273   :  { %v1158_v52 = vpop.f32.mrf.mxu0  ;;  %v1199_v53 = vpop.f32.mrf.mxu1  ;;  %v1224_v36 = vmul.f32 0.5, %v1222_v59  ;;  %v1216_v27 = vmul.f32 0.5, %v1214_v20  ;;  %v1225_v37 = vmul.f32 0.5, %v1223_v60  ;;  %v5442_v60 = vld [vmem:[#allocation79_spill] sm:$0xff] }
 0x274   :  { %2868 = vtanh.f32 %v1207_v45  ;;  %v1229_v21 = vmul.f32 0.5, %v1209_v56 }
 0x275   :  { %v1159_v0 = vpop.f32.mrf.mxu0  ;;  %v1200_v62 = vpop.f32.mrf.mxu1  ;;  %2870 = vtanh.f32 %v1228_v29  ;;  %v1236_v45 = vmul.f32 %v1224_v36, %v3878_v33  ;;  %v1237_v51 = vmul.f32 %v1225_v37, %v3881_v25  ;;  %v5441_v29 = vld [vmem:[#allocation77_spill] sm:$0xff]  ;;  %v5443_v36 = vld [vmem:[#allocation80_spill] sm:$0xff]  ;;  %v5446_v37 = vld [vmem:[#allocation83_spill] sm:$0xff] }
 0x276   :  { %2872 = vtanh.f32 %v1229_v21 }
 0x27f   :  { %v2867_v44 = vpop.eup %2866 }
 0x280   :  { %v1238_v52 = vmul.f32 %v2867_v44, %v1216_v27  ;;  %v5444_v27 = vld [vmem:[#allocation82_spill] sm:$0xff]  ;;  %v5445_v44 = vld [vmem:[#allocation81_spill] sm:$0xff] }
 0x281   :  { %v2869_v32 = vpop.eup %2868 }
 0x282   :  { %v4034_v35 = vadd.f32 %v1238_v52, %v1236_v45  ;;  %v1239_v53 = vmul.f32 %v2869_v32, %v1217_v48  ;;  %v2871_v20 = vpop.eup %2870  ;;  %v5447_v45 = vld [vmem:[#allocation84_spill] sm:$0xff]  ;;  %v5448_v52 = vld [vmem:[#allocation86_spill] sm:$0xff]  ;;  %v5449_v48 = vld [vmem:[#allocation85_spill] sm:$0xff] }
 0x283   :  { %v2873_v24 = vpop.eup %2872  ;;  %v1232_v0 = vadd.f32 1.0, %v2871_v20  ;;  %v5450_v32 = vld [vmem:[#allocation87_spill] sm:$0xff]  ;;  %v5453_v20 = vld [vmem:[#allocation89_spill] sm:$0xff] }
 0x284   :  { %2874 = vtanh.f32 %v4034_v35  ;;  %v4038_v61 = vadd.f32 %v1239_v53, %v1237_v51  ;;  %v1233_v21 = vadd.f32 1.0, %v2873_v24  ;;  %v5451_v51 = vld [vmem:[#allocation88_spill] sm:$0xff]  ;;  %v5452_v53 = vld [vmem:[#allocation90_spill] sm:$0xff]  ;;  %v5454_v24 = vld [vmem:[#allocation91_spill] sm:$0xff] }
 0x285   :  { %v1234_v33 = vmul.f32 0.5, %v1232_v0  ;;  %v5455_v0 = vld [vmem:[#allocation92_spill] sm:$0xff] }
 0x286   :  { %2876 = vtanh.f32 %v4038_v61  ;;  %v1235_v28 = vmul.f32 0.5, %v1233_v21  ;;  %v5456_v21 = vld [vmem:[#allocation94_spill] sm:$0xff] }
 0x291   :  { %v2875_v62 = vpop.eup %2874 }
 0x292   :  { %v1244_v43 = vmul.f32 %v2875_v62, %v1234_v33  ;;  %v5457_v62 = vld [vmem:[#allocation93_spill] sm:$0xff]  ;;  %v5458_v33 = vld [vmem:[#allocation95_spill] sm:$0xff] }
 0x293   :  { %v2877_v16 = vpop.eup %2876 }
 0x294   :  { %v1245_v56 = vmul.f32 %v2877_v16, %v1235_v28  ;;  %v4041_v25 = vpack.c.bf16 %v1244_v43, %v1244_v43  ;;  %v5459_v28 = vld [vmem:[#allocation96_spill] sm:$0xff]  ;;  %v5460_v16 = vld [vmem:[#allocation98_spill] sm:$0xff] }
 0x296   :  { %v2830_v40 = vpack.c.bf16 %v1245_v56, %v1244_v43  ;;  %v1247_v59 = vpack.c.bf16 %v1245_v56, %v1245_v56  ;;  %v5461_v43 = vld [vmem:[#allocation97_spill] sm:$0xff]  ;;  %v5462_v56 = vld [vmem:[#allocation99_spill] sm:$0xff] }
 0x298   :  { %2792 = vst [vmem:[%s4928_s2 + $0x8] sm:$0xff] %v2830_v40  ;;  %1301 = vmatprep.mubr.bf16.mxu0 %v1247_v59  ;;  %1342 = vmatprep.mubr.bf16.mxu1 %v1247_v59  ;;  %v5463_v40 = vld [vmem:[#allocation100_spill] sm:$0xff] }
 0x299   :  { %1302 = vmatmul.mubr.bf16.vlgmr.msra.gmra.mxu0 %v4041_v25  ;;  %1343 = vmatmul.mubr.bf16.vlgmr.msra.gmra.mxu1 %v4041_v25 }
 0x29a   :  { %1352 = vmatpush1.bf16.msra.mxu0 %v5353_v39  ;;  %1393 = vmatpush1.bf16.msra.mxu1 %v5354_v30 }
 0x29b   :  { %1383 = vmatprep.mubr.bf16.mxu0 %v1247_v59  ;;  %1424 = vmatprep.mubr.bf16.mxu1 %v1247_v59  ;;  %v5464_v59 = vld [vmem:[#allocation102_spill] sm:$0xff] }
 0x29c   :  { %1353 = vmatprep.subr.bf16.mxu0 %v5355_v50  ;;  %1394 = vmatprep.subr.bf16.mxu1 %v5356_v34 }
 0x29e   :  { %1354 = vmatpush1.bf16.msra.mxu0 %v5357_v22  ;;  %1395 = vmatpush1.bf16.msra.mxu1 %v5358_v58 }
 0x29f   :  { %1355 = vmatprep.subr.bf16.mxu0 %v5359_v18  ;;  %1396 = vmatprep.subr.bf16.mxu1 %v5360_v55 }
 0x2a2   :  { %1356 = vmatpush1.bf16.msra.mxu0 %v5361_v63  ;;  %1397 = vmatpush1.bf16.msra.mxu1 %v5362_v7 }
 0x2a3   :  { %1357 = vmatprep.subr.bf16.mxu0 %v5441_v29  ;;  %1398 = vmatprep.subr.bf16.mxu1 %v5442_v60 }
 0x2a6   :  { %1358 = vmatpush1.bf16.msra.mxu0 %v5443_v36  ;;  %1399 = vmatpush1.bf16.msra.mxu1 %v5444_v27 }
 0x2a7   :  { %1359 = vmatprep.subr.bf16.mxu0 %v5445_v44  ;;  %1400 = vmatprep.subr.bf16.mxu1 %v5446_v37 }
 0x2aa   :  { %1360 = vmatpush1.bf16.msra.mxu0 %v5447_v45  ;;  %1401 = vmatpush1.bf16.msra.mxu1 %v5448_v52 }
 0x2ab   :  { %1361 = vmatprep.subr.bf16.mxu0 %v5449_v48  ;;  %1402 = vmatprep.subr.bf16.mxu1 %v5450_v32 }
 0x2ae   :  { %1362 = vmatpush1.bf16.msra.mxu0 %v5451_v51  ;;  %1403 = vmatpush1.bf16.msra.mxu1 %v5452_v53 }
 0x2af   :  { %1363 = vmatprep.subr.bf16.mxu0 %v5453_v20  ;;  %1404 = vmatprep.subr.bf16.mxu1 %v5454_v24  ;;  %v5465_v24 = vld [vmem:[#allocation101_spill] sm:$0xff] }
 0x2b2   :  { %1364 = vmatpush1.bf16.msra.mxu0 %v5455_v0  ;;  %1405 = vmatpush1.bf16.msra.mxu1 %v5456_v21  ;;  %v5466_v0 = vld [vmem:[#allocation103_spill] sm:$0xff]  ;;  %v5467_v21 = vld [vmem:[#allocation104_spill] sm:$0xff] }
 0x2b3   :  { %1365 = vmatprep.subr.bf16.mxu0 %v5457_v62  ;;  %1406 = vmatprep.subr.bf16.mxu1 %v5458_v33  ;;  %v5468_v62 = vld [vmem:[#allocation106_spill] sm:$0xff]  ;;  %v5469_v33 = vld [vmem:[#allocation105_spill] sm:$0xff] }
 0x2b6   :  { %1366 = vmatpush1.bf16.msra.mxu0 %v5459_v28  ;;  %1407 = vmatpush1.bf16.msra.mxu1 %v5460_v16  ;;  %v5470_v28 = vld [vmem:[#allocation107_spill] sm:$0xff]  ;;  %v5471_v16 = vld [vmem:[#allocation108_spill] sm:$0xff] }
 0x2b7   :  { %1367 = vmatprep.subr.bf16.mxu0 %v5461_v43  ;;  %1408 = vmatprep.subr.bf16.mxu1 %v5462_v56 }
 0x2ba   :  { %1368 = vmatpush2.bf16.msra.mxu0 %v5463_v40  ;;  %1409 = vmatpush2.bf16.msra.mxu1 %v5464_v59 }
 0x2bb   :  { %1369 = vmatprep.subr.bf16.mxu0 %v5465_v24  ;;  %1410 = vmatprep.subr.bf16.mxu1 %v5466_v0 }
 0x2be   :  { %1370 = vmatpush2.bf16.msra.mxu0 %v5467_v21  ;;  %1411 = vmatpush2.bf16.msra.mxu1 %v5468_v62 }
 0x2bf   :  { %1371 = vmatprep.subr.bf16.mxu0 %v5469_v33  ;;  %1412 = vmatprep.subr.bf16.mxu1 %v5470_v28 }
 0x2c2   :  { %1372 = vmatpush2.bf16.msra.mxu0 %v5471_v16  ;;  %1413 = vmatpush2.bf16.msra.mxu1 %v5394_v1 }
 0x2c3   :  { %1373 = vmatprep.subr.bf16.mxu0 %v5395_v54  ;;  %1414 = vmatprep.subr.bf16.mxu1 %v5396_v6 }
 0x2c6   :  { %1374 = vmatpush2.bf16.msra.mxu0 %v5397_v13  ;;  %1415 = vmatpush2.bf16.msra.mxu1 %v5398_v46 }
 0x2c7   :  { %1375 = vmatprep.subr.bf16.mxu0 %v5399_v5  ;;  %1416 = vmatprep.subr.bf16.mxu1 %v5400_v11 }
 0x2ca   :  { %1376 = vmatpush2.bf16.msra.mxu0 %v5401_v38  ;;  %1417 = vmatpush2.bf16.msra.mxu1 %v5402_v49 }
 0x2cb   :  { %1377 = vmatprep.subr.bf16.mxu0 %v5403_v23  ;;  %1418 = vmatprep.subr.bf16.mxu1 %v5404_v19  ;;  %v2795_v23 = vld [vmem:[%s4927_s0 + $0x50] sm:$0xff] }
 0x2cc   :  { %v1265_v49 = vunpack.c.l.bf16 %v2795_v23  ;;  %v1266_v38 = vunpack.c.h.bf16 %v2795_v23 }
 0x2ce   :  { %1378 = vmatpush2.bf16.msra.mxu0 %v3753_v15  ;;  %1419 = vmatpush2.bf16.msra.mxu1 %v3759_v31 }
 0x2cf   :  { %1379 = vmatprep.subr.bf16.mxu0 %v3757_v12  ;;  %1420 = vmatprep.subr.bf16.mxu1 %v3768_v14 }
 0x2d2   :  { %1380 = vmatpush2.bf16.msra.mxu0 %v3777_v47  ;;  %1421 = vmatpush2.bf16.msra.mxu1 %v3783_v41 }
 0x2d3   :  { %1381 = vmatprep.subr.bf16.mxu0 %v3781_v26  ;;  %1422 = vmatprep.subr.bf16.mxu1 %v3786_v42  ;;  %v5472_v42 = vld [vmem:[#allocation7_spill] sm:$0xff]  ;;  %v5477_v26 = vld [vmem:[#allocation14_spill] sm:$0xff] }
 0x2d6   :  { %1382 = vmatpush2.bf16.msra.mxu0 %v3789_v2  ;;  %1423 = vmatpush2.bf16.msra.mxu1 %v3793_v57  ;;  %v5473_v2 = vld [vmem:[#allocation10_spill] sm:$0xff]  ;;  %v5474_v57 = vld [vmem:[#allocation9_spill] sm:$0xff] }
 0x2d7   :  { %1500 = vmatprep.subr.bf16.mxu0 %v3033_v3  ;;  %1541 = vmatprep.subr.bf16.mxu1 %v3048_v9  ;;  %v5475_v3 = vld [vmem:[#allocation11_spill] sm:$0xff]  ;;  %v5476_v9 = vld [vmem:[#allocation12_spill] sm:$0xff] }
 0x2d9   :  { %1384 = vmatmul.mubr.bf16.vlgmr.msra.gmra.mxu0 %v4041_v25  ;;  %1425 = vmatmul.mubr.bf16.vlgmr.msra.gmra.mxu1 %v4041_v25  ;;  %v5478_v25 = vld [vmem:[#allocation13_spill] sm:$0xff] }
 0x2da   :  { %1501 = vmatpush1.bf16.msra.mxu0 %v3035_v4  ;;  %1542 = vmatpush1.bf16.msra.mxu1 %v3050_v10  ;;  %v5479_v4 = vld [vmem:[#allocation15_spill] sm:$0xff]  ;;  %v5480_v10 = vld [vmem:[#allocation16_spill] sm:$0xff] }
 0x2db   :  { %1502 = vmatprep.subr.bf16.mxu0 %v3046_v8  ;;  %1543 = vmatprep.subr.bf16.mxu1 %v3071_v17  ;;  %v5481_v8 = vld [vmem:[#allocation18_spill] sm:$0xff]  ;;  %v5482_v17 = vld [vmem:[#allocation17_spill] sm:$0xff] }
 0x2de   :  { %1503 = vmatpush1.bf16.msra.mxu0 %v5472_v42  ;;  %1544 = vmatpush1.bf16.msra.mxu1 %v5473_v2  ;;  %v5483_v42 = vld [vmem:[#allocation19_spill] sm:$0xff]  ;;  %v5484_v2 = vld [vmem:[#allocation20_spill] sm:$0xff] }
 0x2df   :  { %1504 = vmatprep.subr.bf16.mxu0 %v5474_v57  ;;  %1545 = vmatprep.subr.bf16.mxu1 %v5475_v3  ;;  %v5485_v57 = vld [vmem:[#allocation22_spill] sm:$0xff]  ;;  %v5486_v3 = vld [vmem:[#allocation21_spill] sm:$0xff] }
 0x2e2   :  { %1505 = vmatpush1.bf16.msra.mxu0 %v5476_v9  ;;  %1546 = vmatpush1.bf16.msra.mxu1 %v5477_v26  ;;  %v5487_v9 = vld [vmem:[#allocation23_spill] sm:$0xff]  ;;  %v5488_v26 = vld [vmem:[#allocation24_spill] sm:$0xff] }
 0x2e3   :  { %1506 = vmatprep.subr.bf16.mxu0 %v5478_v25  ;;  %1547 = vmatprep.subr.bf16.mxu1 %v5479_v4  ;;  %v5489_v25 = vld [vmem:[#allocation26_spill] sm:$0xff]  ;;  %v5490_v4 = vld [vmem:[#allocation25_spill] sm:$0xff] }
 0x2e6   :  { %1507 = vmatpush1.bf16.msra.mxu0 %v5480_v10  ;;  %1548 = vmatpush1.bf16.msra.mxu1 %v5481_v8  ;;  %v5491_v10 = vld [vmem:[#allocation27_spill] sm:$0xff]  ;;  %v5492_v8 = vld [vmem:[#allocation28_spill] sm:$0xff] }
 0x2e7   :  { %1508 = vmatprep.subr.bf16.mxu0 %v5482_v17  ;;  %1549 = vmatprep.subr.bf16.mxu1 %v5483_v42  ;;  %v5493_v17 = vld [vmem:[#allocation30_spill] sm:$0xff]  ;;  %v5494_v42 = vld [vmem:[#allocation29_spill] sm:$0xff] }
 0x2ea   :  { %1509 = vmatpush1.bf16.msra.mxu0 %v5484_v2  ;;  %1550 = vmatpush1.bf16.msra.mxu1 %v5485_v57  ;;  %v5495_v2 = vld [vmem:[#allocation31_spill] sm:$0xff]  ;;  %v5496_v57 = vld [vmem:[#allocation32_spill] sm:$0xff] }
 0x2eb   :  { %1510 = vmatprep.subr.bf16.mxu0 %v5486_v3  ;;  %1551 = vmatprep.subr.bf16.mxu1 %v5487_v9  ;;  %v5497_v3 = vld [vmem:[#allocation34_spill] sm:$0xff]  ;;  %v5498_v9 = vld [vmem:[#allocation33_spill] sm:$0xff] }
 0x2ee   :  { %1511 = vmatpush1.bf16.msra.mxu0 %v5488_v26  ;;  %1552 = vmatpush1.bf16.msra.mxu1 %v5489_v25  ;;  %v5499_v26 = vld [vmem:[#allocation35_spill] sm:$0xff]  ;;  %v5500_v25 = vld [vmem:[#allocation36_spill] sm:$0xff] }
 0x2ef   :  { %1512 = vmatprep.subr.bf16.mxu0 %v5490_v4  ;;  %1553 = vmatprep.subr.bf16.mxu1 %v5491_v10  ;;  %v5501_v4 = vld [vmem:[#allocation38_spill] sm:$0xff]  ;;  %v5502_v10 = vld [vmem:[#allocation37_spill] sm:$0xff] }
 0x2f2   :  { %1513 = vmatpush1.bf16.msra.mxu0 %v5492_v8  ;;  %1554 = vmatpush1.bf16.msra.mxu1 %v5493_v17  ;;  %v5503_v8 = vld [vmem:[#allocation39_spill] sm:$0xff]  ;;  %v5504_v17 = vld [vmem:[#allocation40_spill] sm:$0xff] }
 0x2f3   :  { %1514 = vmatprep.subr.bf16.mxu0 %v5494_v42  ;;  %1555 = vmatprep.subr.bf16.mxu1 %v5495_v2  ;;  %v5505_v42 = vld [vmem:[#allocation42_spill] sm:$0xff]  ;;  %v5506_v2 = vld [vmem:[#allocation41_spill] sm:$0xff] }
 0x2f6   :  { %1515 = vmatpush1.bf16.msra.mxu0 %v5496_v57  ;;  %1556 = vmatpush1.bf16.msra.mxu1 %v5497_v3  ;;  %v5507_v57 = vld [vmem:[#allocation43_spill] sm:$0xff]  ;;  %v5508_v3 = vld [vmem:[#allocation44_spill] sm:$0xff] }
 0x2f7   :  { %1516 = vmatprep.subr.bf16.mxu0 %v5498_v9  ;;  %1557 = vmatprep.subr.bf16.mxu1 %v5499_v26  ;;  %v5509_v9 = vld [vmem:[#allocation46_spill] sm:$0xff]  ;;  %v5510_v26 = vld [vmem:[#allocation45_spill] sm:$0xff] }
 0x2fa   :  { %1517 = vmatpush2.bf16.msra.mxu0 %v5500_v25  ;;  %1558 = vmatpush2.bf16.msra.mxu1 %v5501_v4  ;;  %v5511_v25 = vld [vmem:[#allocation47_spill] sm:$0xff]  ;;  %v5512_v4 = vld [vmem:[#allocation48_spill] sm:$0xff] }
 0x2fb   :  { %1518 = vmatprep.subr.bf16.mxu0 %v5502_v10  ;;  %1559 = vmatprep.subr.bf16.mxu1 %v5503_v8  ;;  %v5513_v10 = vld [vmem:[#allocation50_spill] sm:$0xff]  ;;  %v5514_v8 = vld [vmem:[#allocation49_spill] sm:$0xff] }
 0x2fe   :  { %1519 = vmatpush2.bf16.msra.mxu0 %v5504_v17  ;;  %1560 = vmatpush2.bf16.msra.mxu1 %v5505_v42  ;;  %v5515_v17 = vld [vmem:[#allocation51_spill] sm:$0xff]  ;;  %v5516_v42 = vld [vmem:[#allocation52_spill] sm:$0xff] }
 0x2ff   :  { %1520 = vmatprep.subr.bf16.mxu0 %v5506_v2  ;;  %1561 = vmatprep.subr.bf16.mxu1 %v5507_v57  ;;  %v5517_v2 = vld [vmem:[#allocation54_spill] sm:$0xff]  ;;  %v5518_v57 = vld [vmem:[#allocation53_spill] sm:$0xff] }
 0x302   :  { %1521 = vmatpush2.bf16.msra.mxu0 %v5508_v3  ;;  %1562 = vmatpush2.bf16.msra.mxu1 %v5509_v9  ;;  %v5519_v3 = vld [vmem:[#allocation55_spill] sm:$0xff]  ;;  %v5520_v9 = vld [vmem:[#allocation56_spill] sm:$0xff] }
 0x303   :  { %1522 = vmatprep.subr.bf16.mxu0 %v5510_v26  ;;  %1563 = vmatprep.subr.bf16.mxu1 %v5511_v25  ;;  %v5521_v26 = vld [vmem:[#allocation58_spill] sm:$0xff]  ;;  %v5522_v25 = vld [vmem:[#allocation57_spill] sm:$0xff] }
 0x306   :  { %1523 = vmatpush2.bf16.msra.mxu0 %v5512_v4  ;;  %1564 = vmatpush2.bf16.msra.mxu1 %v5513_v10  ;;  %v5523_v4 = vld [vmem:[#allocation59_spill] sm:$0xff]  ;;  %v5524_v10 = vld [vmem:[#allocation60_spill] sm:$0xff] }
 0x307   :  { %1524 = vmatprep.subr.bf16.mxu0 %v5514_v8  ;;  %1565 = vmatprep.subr.bf16.mxu1 %v5515_v17  ;;  %v5525_v8 = vld [vmem:[#allocation62_spill] sm:$0xff]  ;;  %v5526_v17 = vld [vmem:[#allocation61_spill] sm:$0xff] }
 0x30a   :  { %1525 = vmatpush2.bf16.msra.mxu0 %v5516_v42  ;;  %1566 = vmatpush2.bf16.msra.mxu1 %v5517_v2  ;;  %v5527_v42 = vld [vmem:[#allocation63_spill] sm:$0xff]  ;;  %v5528_v2 = vld [vmem:[#allocation64_spill] sm:$0xff] }
 0x30b   :  { %1526 = vmatprep.subr.bf16.mxu0 %v5518_v57  ;;  %1567 = vmatprep.subr.bf16.mxu1 %v5519_v3  ;;  %v5529_v57 = vld [vmem:[#allocation66_spill] sm:$0xff]  ;;  %v5530_v3 = vld [vmem:[#allocation65_spill] sm:$0xff] }
 0x30e   :  { %1527 = vmatpush2.bf16.msra.mxu0 %v5520_v9  ;;  %1568 = vmatpush2.bf16.msra.mxu1 %v5521_v26  ;;  %v5531_v9 = vld [vmem:[#allocation67_spill] sm:$0xff] }
 0x30f   :  { %1528 = vmatprep.subr.bf16.mxu0 %v5522_v25  ;;  %1569 = vmatprep.subr.bf16.mxu1 %v5523_v4 }
 0x312   :  { %1529 = vmatpush2.bf16.msra.mxu0 %v5524_v10  ;;  %1570 = vmatpush2.bf16.msra.mxu1 %v5525_v8 }
 0x313   :  { %1530 = vmatprep.subr.bf16.mxu0 %v5526_v17  ;;  %1571 = vmatprep.subr.bf16.mxu1 %v5527_v42  ;;  %v2794_v42 = vld [vmem:[%s4927_s0 + $0x48] sm:$0xff] }
 0x314   :  { %v1264_v17 = vunpack.c.h.bf16 %v2794_v42 }
 0x316   :  { %1531 = vmatpush2.bf16.msra.mxu0 %v5528_v2  ;;  %1572 = vmatpush2.bf16.msra.mxu1 %v5529_v57  ;;  %v2793_v57 = vld [vmem:[%s4927_s0 + $0x40] sm:$0xff]  ;;  %v1263_v2 = vunpack.c.l.bf16 %v2794_v42 }
 0x317   :  { %1582 = vmatprep.subr.bf16.mxu0 %v5530_v3  ;;  %1623 = vmatprep.subr.bf16.mxu1 %v5531_v9  ;;  %v1261_v3 = vunpack.c.l.bf16 %v2793_v57  ;;  %v1262_v12 = vunpack.c.h.bf16 %v2793_v57 }
 0x359   :  { %v1303_v26 = vpop.f32.mrf.mxu0  ;;  %v1344_v25 = vpop.f32.mrf.mxu1 }
 0x35a   :  { %v1435_v9 = vadd.f32 %v1344_v25, %v1263_v2  ;;  %v1433_v31 = vadd.f32 %v1303_v26, %v1261_v3  ;;  %v2796_v3 = vld [vmem:[%s4927_s0 + $0x58] sm:$0xff] }
 0x35b   :  { %v1305_v41 = vpop.f32.mrf.mxu0  ;;  %v1346_v4 = vpop.f32.mrf.mxu1 }
 0x35c   :  { %v1436_v15 = vadd.f32 %v1346_v4, %v1264_v17  ;;  %v1449_v19 = vmul.f32 0.5, %v1435_v9 }
 0x35d   :  { %v1307_v47 = vpop.f32.mrf.mxu0  ;;  %v1348_v10 = vpop.f32.mrf.mxu1 }
 0x35e   :  { %v1434_v47 = vadd.f32 %v1305_v41, %v1262_v12  ;;  %v1441_v10 = vmul.f32 0.5, %v1433_v31  ;;  %2878 = vtanh.f32 %v1449_v19  ;;  %v1267_v31 = vunpack.c.l.bf16 %v2796_v3 }
 0x35f   :  { %v1308_v14 = vpop.f32.mrf.mxu0  ;;  %v1349_v8 = vpop.f32.mrf.mxu1  ;;  %v1268_v12 = vunpack.c.h.bf16 %v2796_v3 }
 0x360   :  { %v1450_v14 = vmul.f32 0.5, %v1436_v15  ;;  %v1442_v8 = vmul.f32 0.5, %v1434_v47  ;;  %2880 = vtanh.f32 %v1441_v10 }
 0x362   :  { %2882 = vtanh.f32 %v1450_v14 }
 0x363   :  { %2884 = vtanh.f32 %v1442_v8 }
 0x36b   :  { %v2879_v57 = vpop.eup %2878 }
 0x36c   :  { %v1453_v8 = vadd.f32 1.0, %v2879_v57 }
 0x36d   :  { %v2881_v47 = vpop.eup %2880 }
 0x36e   :  { %v1445_v5 = vadd.f32 1.0, %v2881_v47 }
 0x36f   :  { %v2883_v14 = vpop.eup %2882 }
 0x370   :  { %v2885_v11 = vpop.eup %2884 }
 0x371   :  { %v1446_v13 = vadd.f32 1.0, %v2885_v11 }
 0x399   :  { %v1385_v42 = vpop.f32.mrf.mxu0  ;;  %v1426_v4 = vpop.f32.mrf.mxu1 }
 0x39a   :  { %v1437_v9 = vadd.f32 %v1385_v42, %v1265_v49  ;;  %v1439_v23 = vadd.f32 %v1426_v4, %v1267_v31  ;;  %v1454_v42 = vadd.f32 1.0, %v2883_v14  ;;  %v1448_v4 = vmul.f32 0.5, %v1446_v13 }
 0x39b   :  { %v1387_v17 = vpop.f32.mrf.mxu0  ;;  %v1428_v2 = vpop.f32.mrf.mxu1 }
 0x39c   :  { %2886 = vtanh.f32 %v1437_v9  ;;  %v1438_v41 = vadd.f32 %v1387_v17, %v1266_v38  ;;  %v1440_v10 = vadd.f32 %v1428_v2, %v1268_v12  ;;  %v1459_v49 = vmul.f32 0.5, %v1439_v23 }
 0x39d   :  { %v1389_v26 = vpop.f32.mrf.mxu0  ;;  %v1430_v15 = vpop.f32.mrf.mxu1  ;;  %v1455_v9 = vmul.f32 0.5, %v1453_v8  ;;  %v1447_v38 = vmul.f32 0.5, %v1445_v5  ;;  %v1456_v17 = vmul.f32 0.5, %v1454_v42  ;;  %v5533_v42 = vld [vmem:[#allocation92_spill] sm:$0xff] }
 0x39e   :  { %2888 = vtanh.f32 %v1438_v41  ;;  %v1460_v46 = vmul.f32 0.5, %v1440_v10 }
 0x39f   :  { %v1390_v19 = vpop.f32.mrf.mxu0  ;;  %v1431_v25 = vpop.f32.mrf.mxu1  ;;  %2890 = vtanh.f32 %v1459_v49  ;;  %v1467_v41 = vmul.f32 %v1455_v9, %v4034_v35  ;;  %v1468_v12 = vmul.f32 %v1456_v17, %v4038_v61  ;;  %v5532_v49 = vld [vmem:[#allocation91_spill] sm:$0xff]  ;;  %v5534_v9 = vld [vmem:[#allocation94_spill] sm:$0xff]  ;;  %v5537_v17 = vld [vmem:[#allocation96_spill] sm:$0xff] }
 0x3a0   :  { %2892 = vtanh.f32 %v1460_v46 }
 0x3a9   :  { %v2887_v3 = vpop.eup %2886 }
 0x3aa   :  { %v1469_v26 = vmul.f32 %v2887_v3, %v1447_v38  ;;  %v5535_v38 = vld [vmem:[#allocation93_spill] sm:$0xff]  ;;  %v5536_v3 = vld [vmem:[#allocation95_spill] sm:$0xff] }
 0x3ab   :  { %v2889_v31 = vpop.eup %2888 }
 0x3ac   :  { %v4191_v2 = vadd.f32 %v1469_v26, %v1467_v41  ;;  %v1470_v15 = vmul.f32 %v2889_v31, %v1448_v4  ;;  %v2891_v5 = vpop.eup %2890  ;;  %v5538_v41 = vld [vmem:[#allocation98_spill] sm:$0xff]  ;;  %v5539_v26 = vld [vmem:[#allocation112_spill] sm:$0xff]  ;;  %v5541_v31 = vld [vmem:[#allocation113_spill] sm:$0xff] }
 0x3ad   :  { %v2893_v11 = vpop.eup %2892  ;;  %v1463_v19 = vadd.f32 1.0, %v2891_v5  ;;  %v5540_v4 = vld [vmem:[#allocation114_spill] sm:$0xff] }
 0x3ae   :  { %2894 = vtanh.f32 %v4191_v2  ;;  %v4195_v57 = vadd.f32 %v1470_v15, %v1468_v12  ;;  %v1464_v46 = vadd.f32 1.0, %v2893_v11  ;;  %v5542_v12 = vld [vmem:[#allocation115_spill] sm:$0xff]  ;;  %v5543_v15 = vld [vmem:[#allocation116_spill] sm:$0xff]  ;;  %v5544_v5 = vld [vmem:[#allocation118_spill] sm:$0xff] }
 0x3af   :  { %v1465_v35 = vmul.f32 0.5, %v1463_v19  ;;  %v5545_v11 = vld [vmem:[#allocation117_spill] sm:$0xff]  ;;  %v5546_v19 = vld [vmem:[#allocation119_spill] sm:$0xff] }
 0x3b0   :  { %2896 = vtanh.f32 %v4195_v57  ;;  %v1466_v23 = vmul.f32 0.5, %v1464_v46  ;;  %v5547_v46 = vld [vmem:[#allocation120_spill] sm:$0xff] }
 0x3bb   :  { %v2895_v25 = vpop.eup %2894 }
 0x3bc   :  { %v1475_v47 = vmul.f32 %v2895_v25, %v1465_v35  ;;  %v5548_v25 = vld [vmem:[#allocation122_spill] sm:$0xff]  ;;  %v5549_v35 = vld [vmem:[#allocation121_spill] sm:$0xff] }
 0x3bd   :  { %v2897_v13 = vpop.eup %2896 }
 0x3be   :  { %v1476_v10 = vmul.f32 %v2897_v13, %v1466_v23  ;;  %v4198_v61 = vpack.c.bf16 %v1475_v47, %v1475_v47  ;;  %v5550_v23 = vld [vmem:[#allocation123_spill] sm:$0xff]  ;;  %v5551_v13 = vld [vmem:[#allocation124_spill] sm:$0xff] }
 0x3c0   :  { %v2831_v14 = vpack.c.bf16 %v1476_v10, %v1475_v47  ;;  %v1478_v8 = vpack.c.bf16 %v1476_v10, %v1476_v10  ;;  %v5552_v47 = vld [vmem:[#allocation126_spill] sm:$0xff]  ;;  %v5553_v10 = vld [vmem:[#allocation125_spill] sm:$0xff] }
 0x3c2   :  { %2798 = vst [vmem:[%s4928_s2 + $0x10] sm:$0xff] %v2831_v14  ;;  %1532 = vmatprep.mubr.bf16.mxu0 %v1478_v8  ;;  %1573 = vmatprep.mubr.bf16.mxu1 %v1478_v8  ;;  %v5554_v14 = vld [vmem:[#allocation127_spill] sm:$0xff] }
 0x3c3   :  { %1533 = vmatmul.mubr.bf16.vlgmr.msra.gmra.mxu0 %v4198_v61  ;;  %1574 = vmatmul.mubr.bf16.vlgmr.msra.gmra.mxu1 %v4198_v61 }
 0x3c4   :  { %1583 = vmatpush1.bf16.msra.mxu0 %v5353_v39  ;;  %1624 = vmatpush1.bf16.msra.mxu1 %v5354_v30 }
 0x3c5   :  { %1614 = vmatprep.mubr.bf16.mxu0 %v1478_v8  ;;  %1655 = vmatprep.mubr.bf16.mxu1 %v1478_v8  ;;  %v5555_v8 = vld [vmem:[#allocation128_spill] sm:$0xff] }
 0x3c6   :  { %1584 = vmatprep.subr.bf16.mxu0 %v5355_v50  ;;  %1625 = vmatprep.subr.bf16.mxu1 %v5356_v34 }
 0x3c8   :  { %1585 = vmatpush1.bf16.msra.mxu0 %v5357_v22  ;;  %1626 = vmatpush1.bf16.msra.mxu1 %v5358_v58 }
 0x3c9   :  { %1586 = vmatprep.subr.bf16.mxu0 %v5359_v18  ;;  %1627 = vmatprep.subr.bf16.mxu1 %v5360_v55 }
 0x3cc   :  { %1587 = vmatpush1.bf16.msra.mxu0 %v5361_v63  ;;  %1628 = vmatpush1.bf16.msra.mxu1 %v5362_v7 }
 0x3cd   :  { %1588 = vmatprep.subr.bf16.mxu0 %v5441_v29  ;;  %1629 = vmatprep.subr.bf16.mxu1 %v5442_v60 }
 0x3d0   :  { %1589 = vmatpush1.bf16.msra.mxu0 %v5443_v36  ;;  %1630 = vmatpush1.bf16.msra.mxu1 %v5444_v27 }
 0x3d1   :  { %1590 = vmatprep.subr.bf16.mxu0 %v5445_v44  ;;  %1631 = vmatprep.subr.bf16.mxu1 %v5446_v37 }
 0x3d4   :  { %1591 = vmatpush1.bf16.msra.mxu0 %v5447_v45  ;;  %1632 = vmatpush1.bf16.msra.mxu1 %v5448_v52 }
 0x3d5   :  { %1592 = vmatprep.subr.bf16.mxu0 %v5449_v48  ;;  %1633 = vmatprep.subr.bf16.mxu1 %v5450_v32 }
 0x3d8   :  { %1593 = vmatpush1.bf16.msra.mxu0 %v5451_v51  ;;  %1634 = vmatpush1.bf16.msra.mxu1 %v5452_v53 }
 0x3d9   :  { %1594 = vmatprep.subr.bf16.mxu0 %v5453_v20  ;;  %1635 = vmatprep.subr.bf16.mxu1 %v5532_v49 }
 0x3dc   :  { %1595 = vmatpush1.bf16.msra.mxu0 %v5533_v42  ;;  %1636 = vmatpush1.bf16.msra.mxu1 %v5534_v9 }
 0x3dd   :  { %1596 = vmatprep.subr.bf16.mxu0 %v5535_v38  ;;  %1637 = vmatprep.subr.bf16.mxu1 %v5536_v3 }
 0x3e0   :  { %1597 = vmatpush1.bf16.msra.mxu0 %v5537_v17  ;;  %1638 = vmatpush1.bf16.msra.mxu1 %v5538_v41 }
 0x3e1   :  { %1598 = vmatprep.subr.bf16.mxu0 %v5461_v43  ;;  %1639 = vmatprep.subr.bf16.mxu1 %v5462_v56 }
 0x3e4   :  { %1599 = vmatpush2.bf16.msra.mxu0 %v5463_v40  ;;  %1640 = vmatpush2.bf16.msra.mxu1 %v5464_v59 }
 0x3e5   :  { %1600 = vmatprep.subr.bf16.mxu0 %v5465_v24  ;;  %1641 = vmatprep.subr.bf16.mxu1 %v5466_v0 }
 0x3e8   :  { %1601 = vmatpush2.bf16.msra.mxu0 %v5467_v21  ;;  %1642 = vmatpush2.bf16.msra.mxu1 %v5468_v62 }
 0x3e9   :  { %1602 = vmatprep.subr.bf16.mxu0 %v5469_v33  ;;  %1643 = vmatprep.subr.bf16.mxu1 %v5470_v28 }
 0x3ec   :  { %1603 = vmatpush2.bf16.msra.mxu0 %v5471_v16  ;;  %1644 = vmatpush2.bf16.msra.mxu1 %v5394_v1 }
 0x3ed   :  { %1604 = vmatprep.subr.bf16.mxu0 %v5395_v54  ;;  %1645 = vmatprep.subr.bf16.mxu1 %v5396_v6  ;;  %v2801_v6 = vld [vmem:[%s4927_s0 + $0x70] sm:$0xff] }
 0x3ee   :  { %v1496_v54 = vunpack.c.l.bf16 %v2801_v6  ;;  %v1497_v1 = vunpack.c.h.bf16 %v2801_v6 }
 0x3f0   :  { %1605 = vmatpush2.bf16.msra.mxu0 %v5539_v26  ;;  %1646 = vmatpush2.bf16.msra.mxu1 %v5540_v4 }
 0x3f1   :  { %1606 = vmatprep.subr.bf16.mxu0 %v5541_v31  ;;  %1647 = vmatprep.subr.bf16.mxu1 %v5542_v12 }
 0x3f4   :  { %1607 = vmatpush2.bf16.msra.mxu0 %v5543_v15  ;;  %1648 = vmatpush2.bf16.msra.mxu1 %v5544_v5 }
 0x3f5   :  { %1608 = vmatprep.subr.bf16.mxu0 %v5545_v11  ;;  %1649 = vmatprep.subr.bf16.mxu1 %v5546_v19  ;;  %v5556_v11 = vld [vmem:[#allocation129_spill] sm:$0xff]  ;;  %v5557_v19 = vld [vmem:[#allocation2_spill] sm:$0xff] }
 0x3f8   :  { %1609 = vmatpush2.bf16.msra.mxu0 %v5547_v46  ;;  %1650 = vmatpush2.bf16.msra.mxu1 %v5548_v25  ;;  %v5558_v46 = vld [vmem:[#allocation5_spill] sm:$0xff] }
 0x3f9   :  { %1610 = vmatprep.subr.bf16.mxu0 %v5549_v35  ;;  %1651 = vmatprep.subr.bf16.mxu1 %v5550_v23  ;;  %v5559_v23 = vld [vmem:[#allocation3_spill] sm:$0xff]  ;;  %v5568_v35 = vld [vmem:[#allocation14_spill] sm:$0xff] }
 0x3fc   :  { %1611 = vmatpush2.bf16.msra.mxu0 %v5551_v13  ;;  %1652 = vmatpush2.bf16.msra.mxu1 %v5552_v47  ;;  %v5560_v13 = vld [vmem:[#allocation6_spill] sm:$0xff]  ;;  %v5561_v47 = vld [vmem:[#allocation4_spill] sm:$0xff] }
 0x3fd   :  { %1612 = vmatprep.subr.bf16.mxu0 %v5553_v10  ;;  %1653 = vmatprep.subr.bf16.mxu1 %v5554_v14  ;;  %v5562_v10 = vld [vmem:[#allocation8_spill] sm:$0xff]  ;;  %v5563_v14 = vld [vmem:[#allocation7_spill] sm:$0xff] }
 0x400   :  { %1613 = vmatpush2.bf16.msra.mxu0 %v5555_v8  ;;  %1654 = vmatpush2.bf16.msra.mxu1 %v5556_v11  ;;  %v5564_v8 = vld [vmem:[#allocation10_spill] sm:$0xff]  ;;  %v5565_v11 = vld [vmem:[#allocation9_spill] sm:$0xff] }
 0x401   :  { %1731 = vmatprep.subr.bf16.mxu0 %v5557_v19  ;;  %1772 = vmatprep.subr.bf16.mxu1 %v5558_v46  ;;  %v5566_v19 = vld [vmem:[#allocation11_spill] sm:$0xff]  ;;  %v5567_v46 = vld [vmem:[#allocation12_spill] sm:$0xff] }
 0x403   :  { %1615 = vmatmul.mubr.bf16.vlgmr.msra.gmra.mxu0 %v4198_v61  ;;  %1656 = vmatmul.mubr.bf16.vlgmr.msra.gmra.mxu1 %v4198_v61  ;;  %v5569_v61 = vld [vmem:[#allocation13_spill] sm:$0xff] }
 0x404   :  { %1732 = vmatpush1.bf16.msra.mxu0 %v5559_v23  ;;  %1773 = vmatpush1.bf16.msra.mxu1 %v5560_v13  ;;  %v5570_v23 = vld [vmem:[#allocation15_spill] sm:$0xff]  ;;  %v5571_v13 = vld [vmem:[#allocation16_spill] sm:$0xff] }
 0x405   :  { %1733 = vmatprep.subr.bf16.mxu0 %v5561_v47  ;;  %1774 = vmatprep.subr.bf16.mxu1 %v5562_v10  ;;  %v5572_v47 = vld [vmem:[#allocation18_spill] sm:$0xff]  ;;  %v5573_v10 = vld [vmem:[#allocation17_spill] sm:$0xff] }
 0x408   :  { %1734 = vmatpush1.bf16.msra.mxu0 %v5563_v14  ;;  %1775 = vmatpush1.bf16.msra.mxu1 %v5564_v8  ;;  %v5574_v14 = vld [vmem:[#allocation19_spill] sm:$0xff]  ;;  %v5575_v8 = vld [vmem:[#allocation20_spill] sm:$0xff] }
 0x409   :  { %1735 = vmatprep.subr.bf16.mxu0 %v5565_v11  ;;  %1776 = vmatprep.subr.bf16.mxu1 %v5566_v19  ;;  %v5576_v11 = vld [vmem:[#allocation22_spill] sm:$0xff]  ;;  %v5577_v19 = vld [vmem:[#allocation21_spill] sm:$0xff] }
 0x40c   :  { %1736 = vmatpush1.bf16.msra.mxu0 %v5567_v46  ;;  %1777 = vmatpush1.bf16.msra.mxu1 %v5568_v35  ;;  %v5578_v46 = vld [vmem:[#allocation23_spill] sm:$0xff]  ;;  %v5579_v35 = vld [vmem:[#allocation24_spill] sm:$0xff] }
 0x40d   :  { %1737 = vmatprep.subr.bf16.mxu0 %v5569_v61  ;;  %1778 = vmatprep.subr.bf16.mxu1 %v5570_v23  ;;  %v5580_v61 = vld [vmem:[#allocation26_spill] sm:$0xff]  ;;  %v5581_v23 = vld [vmem:[#allocation25_spill] sm:$0xff] }
 0x410   :  { %1738 = vmatpush1.bf16.msra.mxu0 %v5571_v13  ;;  %1779 = vmatpush1.bf16.msra.mxu1 %v5572_v47  ;;  %v5582_v13 = vld [vmem:[#allocation27_spill] sm:$0xff]  ;;  %v5583_v47 = vld [vmem:[#allocation28_spill] sm:$0xff] }
 0x411   :  { %1739 = vmatprep.subr.bf16.mxu0 %v5573_v10  ;;  %1780 = vmatprep.subr.bf16.mxu1 %v5574_v14  ;;  %v5584_v10 = vld [vmem:[#allocation30_spill] sm:$0xff]  ;;  %v5585_v14 = vld [vmem:[#allocation29_spill] sm:$0xff] }
 0x414   :  { %1740 = vmatpush1.bf16.msra.mxu0 %v5575_v8  ;;  %1781 = vmatpush1.bf16.msra.mxu1 %v5576_v11  ;;  %v5586_v8 = vld [vmem:[#allocation31_spill] sm:$0xff]  ;;  %v5587_v11 = vld [vmem:[#allocation32_spill] sm:$0xff] }
 0x415   :  { %1741 = vmatprep.subr.bf16.mxu0 %v5577_v19  ;;  %1782 = vmatprep.subr.bf16.mxu1 %v5578_v46  ;;  %v5588_v19 = vld [vmem:[#allocation34_spill] sm:$0xff]  ;;  %v5589_v46 = vld [vmem:[#allocation33_spill] sm:$0xff] }
 0x418   :  { %1742 = vmatpush1.bf16.msra.mxu0 %v5579_v35  ;;  %1783 = vmatpush1.bf16.msra.mxu1 %v5580_v61  ;;  %v5590_v35 = vld [vmem:[#allocation35_spill] sm:$0xff]  ;;  %v5591_v61 = vld [vmem:[#allocation36_spill] sm:$0xff] }
 0x419   :  { %1743 = vmatprep.subr.bf16.mxu0 %v5581_v23  ;;  %1784 = vmatprep.subr.bf16.mxu1 %v5582_v13  ;;  %v5592_v23 = vld [vmem:[#allocation38_spill] sm:$0xff]  ;;  %v5593_v13 = vld [vmem:[#allocation37_spill] sm:$0xff] }
 0x41c   :  { %1744 = vmatpush1.bf16.msra.mxu0 %v5583_v47  ;;  %1785 = vmatpush1.bf16.msra.mxu1 %v5584_v10  ;;  %v5594_v47 = vld [vmem:[#allocation39_spill] sm:$0xff]  ;;  %v5595_v10 = vld [vmem:[#allocation40_spill] sm:$0xff] }
 0x41d   :  { %1745 = vmatprep.subr.bf16.mxu0 %v5585_v14  ;;  %1786 = vmatprep.subr.bf16.mxu1 %v5586_v8  ;;  %v5596_v14 = vld [vmem:[#allocation42_spill] sm:$0xff]  ;;  %v5597_v8 = vld [vmem:[#allocation41_spill] sm:$0xff] }
 0x420   :  { %1746 = vmatpush1.bf16.msra.mxu0 %v5587_v11  ;;  %1787 = vmatpush1.bf16.msra.mxu1 %v5588_v19  ;;  %v5598_v11 = vld [vmem:[#allocation43_spill] sm:$0xff]  ;;  %v5599_v19 = vld [vmem:[#allocation44_spill] sm:$0xff] }
 0x421   :  { %1747 = vmatprep.subr.bf16.mxu0 %v5589_v46  ;;  %1788 = vmatprep.subr.bf16.mxu1 %v5590_v35  ;;  %v5600_v46 = vld [vmem:[#allocation46_spill] sm:$0xff]  ;;  %v5601_v35 = vld [vmem:[#allocation45_spill] sm:$0xff] }
 0x424   :  { %1748 = vmatpush2.bf16.msra.mxu0 %v5591_v61  ;;  %1789 = vmatpush2.bf16.msra.mxu1 %v5592_v23  ;;  %v5602_v61 = vld [vmem:[#allocation47_spill] sm:$0xff]  ;;  %v5603_v23 = vld [vmem:[#allocation48_spill] sm:$0xff] }
 0x425   :  { %1749 = vmatprep.subr.bf16.mxu0 %v5593_v13  ;;  %1790 = vmatprep.subr.bf16.mxu1 %v5594_v47  ;;  %v5604_v13 = vld [vmem:[#allocation50_spill] sm:$0xff]  ;;  %v5605_v47 = vld [vmem:[#allocation49_spill] sm:$0xff] }
 0x428   :  { %1750 = vmatpush2.bf16.msra.mxu0 %v5595_v10  ;;  %1791 = vmatpush2.bf16.msra.mxu1 %v5596_v14  ;;  %v5606_v10 = vld [vmem:[#allocation51_spill] sm:$0xff]  ;;  %v5607_v14 = vld [vmem:[#allocation52_spill] sm:$0xff] }
 0x429   :  { %1751 = vmatprep.subr.bf16.mxu0 %v5597_v8  ;;  %1792 = vmatprep.subr.bf16.mxu1 %v5598_v11  ;;  %v5608_v8 = vld [vmem:[#allocation54_spill] sm:$0xff]  ;;  %v5609_v11 = vld [vmem:[#allocation53_spill] sm:$0xff] }
 0x42c   :  { %1752 = vmatpush2.bf16.msra.mxu0 %v5599_v19  ;;  %1793 = vmatpush2.bf16.msra.mxu1 %v5600_v46  ;;  %v5610_v19 = vld [vmem:[#allocation55_spill] sm:$0xff]  ;;  %v5611_v46 = vld [vmem:[#allocation56_spill] sm:$0xff] }
 0x42d   :  { %1753 = vmatprep.subr.bf16.mxu0 %v5601_v35  ;;  %1794 = vmatprep.subr.bf16.mxu1 %v5602_v61  ;;  %v5612_v35 = vld [vmem:[#allocation58_spill] sm:$0xff]  ;;  %v5613_v61 = vld [vmem:[#allocation57_spill] sm:$0xff] }
 0x430   :  { %1754 = vmatpush2.bf16.msra.mxu0 %v5603_v23  ;;  %1795 = vmatpush2.bf16.msra.mxu1 %v5604_v13  ;;  %v5614_v23 = vld [vmem:[#allocation59_spill] sm:$0xff]  ;;  %v5615_v13 = vld [vmem:[#allocation60_spill] sm:$0xff] }
 0x431   :  { %1755 = vmatprep.subr.bf16.mxu0 %v5605_v47  ;;  %1796 = vmatprep.subr.bf16.mxu1 %v5606_v10  ;;  %v5616_v47 = vld [vmem:[#allocation62_spill] sm:$0xff]  ;;  %v5617_v10 = vld [vmem:[#allocation61_spill] sm:$0xff] }
 0x434   :  { %1756 = vmatpush2.bf16.msra.mxu0 %v5607_v14  ;;  %1797 = vmatpush2.bf16.msra.mxu1 %v5608_v8  ;;  %v5618_v14 = vld [vmem:[#allocation63_spill] sm:$0xff]  ;;  %v5619_v8 = vld [vmem:[#allocation64_spill] sm:$0xff] }
 0x435   :  { %1757 = vmatprep.subr.bf16.mxu0 %v5609_v11  ;;  %1798 = vmatprep.subr.bf16.mxu1 %v5610_v19  ;;  %v5620_v11 = vld [vmem:[#allocation66_spill] sm:$0xff]  ;;  %v5621_v19 = vld [vmem:[#allocation65_spill] sm:$0xff] }
 0x438   :  { %1758 = vmatpush2.bf16.msra.mxu0 %v5611_v46  ;;  %1799 = vmatpush2.bf16.msra.mxu1 %v5612_v35  ;;  %v5622_v46 = vld [vmem:[#allocation67_spill] sm:$0xff] }
 0x439   :  { %1759 = vmatprep.subr.bf16.mxu0 %v5613_v61  ;;  %1800 = vmatprep.subr.bf16.mxu1 %v5614_v23 }
 0x43c   :  { %1760 = vmatpush2.bf16.msra.mxu0 %v5615_v13  ;;  %1801 = vmatpush2.bf16.msra.mxu1 %v5616_v47 }
 0x43d   :  { %1761 = vmatprep.subr.bf16.mxu0 %v5617_v10  ;;  %1802 = vmatprep.subr.bf16.mxu1 %v5618_v14  ;;  %v2800_v14 = vld [vmem:[%s4927_s0 + $0x68] sm:$0xff] }
 0x43e   :  { %v1495_v10 = vunpack.c.h.bf16 %v2800_v14 }
 0x440   :  { %1762 = vmatpush2.bf16.msra.mxu0 %v5619_v8  ;;  %1803 = vmatpush2.bf16.msra.mxu1 %v5620_v11  ;;  %v2799_v11 = vld [vmem:[%s4927_s0 + $0x60] sm:$0xff]  ;;  %v1494_v8 = vunpack.c.l.bf16 %v2800_v14 }
 0x441   :  { %1813 = vmatprep.subr.bf16.mxu0 %v5621_v19  ;;  %1854 = vmatprep.subr.bf16.mxu1 %v5622_v46  ;;  %v1492_v19 = vunpack.c.l.bf16 %v2799_v11  ;;  %v1493_v12 = vunpack.c.h.bf16 %v2799_v11  ;;  %v2802_v11 = vld [vmem:[%s4927_s0 + $0x78] sm:$0xff] }
 0x483   :  { %v1534_v35 = vpop.f32.mrf.mxu0  ;;  %v1575_v61 = vpop.f32.mrf.mxu1 }
 0x484   :  { %v1666_v46 = vadd.f32 %v1575_v61, %v1494_v8  ;;  %v1664_v31 = vadd.f32 %v1534_v35, %v1492_v19 }
 0x485   :  { %v1536_v25 = vpop.f32.mrf.mxu0  ;;  %v1577_v23 = vpop.f32.mrf.mxu1 }
 0x486   :  { %v1667_v4 = vadd.f32 %v1577_v23, %v1495_v10  ;;  %v1680_v26 = vmul.f32 0.5, %v1666_v46 }
 0x487   :  { %v1538_v5 = vpop.f32.mrf.mxu0  ;;  %v1579_v13 = vpop.f32.mrf.mxu1 }
 0x488   :  { %v1665_v5 = vadd.f32 %v1536_v25, %v1493_v12  ;;  %v1672_v13 = vmul.f32 0.5, %v1664_v31  ;;  %2898 = vtanh.f32 %v1680_v26  ;;  %v1498_v26 = vunpack.c.l.bf16 %v2802_v11 }
 0x489   :  { %v1539_v15 = vpop.f32.mrf.mxu0  ;;  %v1580_v47 = vpop.f32.mrf.mxu1  ;;  %v1499_v25 = vunpack.c.h.bf16 %v2802_v11 }
 0x48a   :  { %v1681_v15 = vmul.f32 0.5, %v1667_v4  ;;  %v1673_v47 = vmul.f32 0.5, %v1665_v5  ;;  %2900 = vtanh.f32 %v1672_v13 }
 0x48c   :  { %2902 = vtanh.f32 %v1681_v15 }
 0x48d   :  { %2904 = vtanh.f32 %v1673_v47 }
 0x495   :  { %v2899_v10 = vpop.eup %2898 }
 0x496   :  { %v1684_v47 = vadd.f32 1.0, %v2899_v10 }
 0x497   :  { %v2901_v5 = vpop.eup %2900 }
 0x498   :  { %v1676_v28 = vadd.f32 1.0, %v2901_v5 }
 0x499   :  { %v2903_v15 = vpop.eup %2902 }
 0x49a   :  { %v2905_v16 = vpop.eup %2904 }
 0x49b   :  { %v1677_v62 = vadd.f32 1.0, %v2905_v16 }
 0x4c3   :  { %v1616_v14 = vpop.f32.mrf.mxu0  ;;  %v1657_v19 = vpop.f32.mrf.mxu1 }
 0x4c4   :  { %v1668_v12 = vadd.f32 %v1616_v14, %v1496_v54  ;;  %v1670_v6 = vadd.f32 %v1657_v19, %v1498_v26  ;;  %v1685_v14 = vadd.f32 1.0, %v2903_v15  ;;  %v1679_v19 = vmul.f32 0.5, %v1677_v62 }
 0x4c5   :  { %v1618_v31 = vpop.f32.mrf.mxu0  ;;  %v1659_v4 = vpop.f32.mrf.mxu1 }
 0x4c6   :  { %2906 = vtanh.f32 %v1668_v12  ;;  %v1669_v46 = vadd.f32 %v1618_v31, %v1497_v1  ;;  %v1671_v13 = vadd.f32 %v1659_v4, %v1499_v25  ;;  %v1690_v54 = vmul.f32 0.5, %v1670_v6 }
 0x4c7   :  { %v1620_v35 = vpop.f32.mrf.mxu0  ;;  %v1661_v23 = vpop.f32.mrf.mxu1  ;;  %v1686_v12 = vmul.f32 0.5, %v1684_v47  ;;  %v1678_v1 = vmul.f32 0.5, %v1676_v28  ;;  %v1687_v31 = vmul.f32 0.5, %v1685_v14  ;;  %v5624_v14 = vld [vmem:[#allocation105_spill] sm:$0xff] }
 0x4c8   :  { %2908 = vtanh.f32 %v1669_v46  ;;  %v1691_v33 = vmul.f32 0.5, %v1671_v13 }
 0x4c9   :  { %v1621_v8 = vpop.f32.mrf.mxu0  ;;  %v1662_v61 = vpop.f32.mrf.mxu1  ;;  %2910 = vtanh.f32 %v1690_v54  ;;  %v1698_v46 = vmul.f32 %v1686_v12, %v4191_v2  ;;  %v1699_v25 = vmul.f32 %v1687_v31, %v4195_v57  ;;  %v5623_v54 = vld [vmem:[#allocation106_spill] sm:$0xff]  ;;  %v5625_v12 = vld [vmem:[#allocation107_spill] sm:$0xff]  ;;  %v5628_v31 = vld [vmem:[#allocation109_spill] sm:$0xff] }
 0x4ca   :  { %2912 = vtanh.f32 %v1691_v33 }
 0x4d3   :  { %v2907_v11 = vpop.eup %2906 }
 0x4d4   :  { %v1700_v35 = vmul.f32 %v2907_v11, %v1678_v1  ;;  %v5626_v1 = vld [vmem:[#allocation108_spill] sm:$0xff]  ;;  %v5627_v11 = vld [vmem:[#allocation110_spill] sm:$0xff] }
 0x4d5   :  { %v2909_v26 = vpop.eup %2908 }
 0x4d6   :  { %v4348_v4 = vadd.f32 %v1700_v35, %v1698_v46  ;;  %v1701_v23 = vmul.f32 %v2909_v26, %v1679_v19  ;;  %v2911_v28 = vpop.eup %2910  ;;  %v5629_v46 = vld [vmem:[#allocation111_spill] sm:$0xff]  ;;  %v5630_v35 = vld [vmem:[#allocation112_spill] sm:$0xff]  ;;  %v5631_v19 = vld [vmem:[#allocation114_spill] sm:$0xff] }
 0x4d7   :  { %v2913_v16 = vpop.eup %2912  ;;  %v1694_v8 = vadd.f32 1.0, %v2911_v28  ;;  %v5632_v26 = vld [vmem:[#allocation113_spill] sm:$0xff]  ;;  %v5635_v28 = vld [vmem:[#allocation118_spill] sm:$0xff] }
 0x4d8   :  { %2914 = vtanh.f32 %v4348_v4  ;;  %v4352_v10 = vadd.f32 %v1701_v23, %v1699_v25  ;;  %v1695_v33 = vadd.f32 1.0, %v2913_v16  ;;  %v5633_v25 = vld [vmem:[#allocation115_spill] sm:$0xff]  ;;  %v5634_v23 = vld [vmem:[#allocation116_spill] sm:$0xff]  ;;  %v5636_v16 = vld [vmem:[#allocation117_spill] sm:$0xff] }
 0x4d9   :  { %v1696_v2 = vmul.f32 0.5, %v1694_v8  ;;  %v5637_v8 = vld [vmem:[#allocation119_spill] sm:$0xff] }
 0x4da   :  { %2916 = vtanh.f32 %v4352_v10  ;;  %v1697_v6 = vmul.f32 0.5, %v1695_v33  ;;  %v5638_v33 = vld [vmem:[#allocation120_spill] sm:$0xff] }
 0x4e5   :  { %v2915_v61 = vpop.eup %2914 }
 0x4e6   :  { %v1706_v5 = vmul.f32 %v2915_v61, %v1696_v2  ;;  %v5639_v61 = vld [vmem:[#allocation122_spill] sm:$0xff]  ;;  %v5640_v2 = vld [vmem:[#allocation121_spill] sm:$0xff] }
 0x4e7   :  { %v2917_v62 = vpop.eup %2916 }
 0x4e8   :  { %v1707_v13 = vmul.f32 %v2917_v62, %v1697_v6  ;;  %v4355_v57 = vpack.c.bf16 %v1706_v5, %v1706_v5  ;;  %v5641_v6 = vld [vmem:[#allocation123_spill] sm:$0xff]  ;;  %v5642_v62 = vld [vmem:[#allocation124_spill] sm:$0xff] }
 0x4ea   :  { %v2832_v15 = vpack.c.bf16 %v1707_v13, %v1706_v5  ;;  %v1709_v47 = vpack.c.bf16 %v1707_v13, %v1707_v13  ;;  %v5643_v5 = vld [vmem:[#allocation126_spill] sm:$0xff]  ;;  %v5644_v13 = vld [vmem:[#allocation125_spill] sm:$0xff] }
 0x4ec   :  { %2804 = vst [vmem:[%s4928_s2 + $0x18] sm:$0xff] %v2832_v15  ;;  %1763 = vmatprep.mubr.bf16.mxu0 %v1709_v47  ;;  %1804 = vmatprep.mubr.bf16.mxu1 %v1709_v47  ;;  %v5645_v15 = vld [vmem:[#allocation127_spill] sm:$0xff] }
 0x4ed   :  { %1764 = vmatmul.mubr.bf16.vlgmr.msra.gmra.mxu0 %v4355_v57  ;;  %1805 = vmatmul.mubr.bf16.vlgmr.msra.gmra.mxu1 %v4355_v57 }
 0x4ee   :  { %1814 = vmatpush1.bf16.msra.mxu0 %v5353_v39  ;;  %1855 = vmatpush1.bf16.msra.mxu1 %v5354_v30 }
 0x4ef   :  { %1845 = vmatprep.mubr.bf16.mxu0 %v1709_v47  ;;  %1886 = vmatprep.mubr.bf16.mxu1 %v1709_v47  ;;  %v5646_v47 = vld [vmem:[#allocation128_spill] sm:$0xff] }
 0x4f0   :  { %1815 = vmatprep.subr.bf16.mxu0 %v5355_v50  ;;  %1856 = vmatprep.subr.bf16.mxu1 %v5356_v34 }
 0x4f2   :  { %1816 = vmatpush1.bf16.msra.mxu0 %v5357_v22  ;;  %1857 = vmatpush1.bf16.msra.mxu1 %v5358_v58 }
 0x4f3   :  { %1817 = vmatprep.subr.bf16.mxu0 %v5359_v18  ;;  %1858 = vmatprep.subr.bf16.mxu1 %v5360_v55 }
 0x4f6   :  { %1818 = vmatpush1.bf16.msra.mxu0 %v5361_v63  ;;  %1859 = vmatpush1.bf16.msra.mxu1 %v5362_v7 }
 0x4f7   :  { %1819 = vmatprep.subr.bf16.mxu0 %v5441_v29  ;;  %1860 = vmatprep.subr.bf16.mxu1 %v5442_v60 }
 0x4fa   :  { %1820 = vmatpush1.bf16.msra.mxu0 %v5443_v36  ;;  %1861 = vmatpush1.bf16.msra.mxu1 %v5444_v27 }
 0x4fb   :  { %1821 = vmatprep.subr.bf16.mxu0 %v5445_v44  ;;  %1862 = vmatprep.subr.bf16.mxu1 %v5446_v37 }
 0x4fe   :  { %1822 = vmatpush1.bf16.msra.mxu0 %v5447_v45  ;;  %1863 = vmatpush1.bf16.msra.mxu1 %v5448_v52 }
 0x4ff   :  { %1823 = vmatprep.subr.bf16.mxu0 %v5449_v48  ;;  %1864 = vmatprep.subr.bf16.mxu1 %v5450_v32 }
 0x502   :  { %1824 = vmatpush1.bf16.msra.mxu0 %v5451_v51  ;;  %1865 = vmatpush1.bf16.msra.mxu1 %v5452_v53 }
 0x503   :  { %1825 = vmatprep.subr.bf16.mxu0 %v5453_v20  ;;  %1866 = vmatprep.subr.bf16.mxu1 %v5532_v49 }
 0x506   :  { %1826 = vmatpush1.bf16.msra.mxu0 %v5533_v42  ;;  %1867 = vmatpush1.bf16.msra.mxu1 %v5534_v9 }
 0x507   :  { %1827 = vmatprep.subr.bf16.mxu0 %v5535_v38  ;;  %1868 = vmatprep.subr.bf16.mxu1 %v5536_v3 }
 0x50a   :  { %1828 = vmatpush1.bf16.msra.mxu0 %v5537_v17  ;;  %1869 = vmatpush1.bf16.msra.mxu1 %v5538_v41 }
 0x50b   :  { %1829 = vmatprep.subr.bf16.mxu0 %v5461_v43  ;;  %1870 = vmatprep.subr.bf16.mxu1 %v5462_v56 }
 0x50e   :  { %1830 = vmatpush2.bf16.msra.mxu0 %v5463_v40  ;;  %1871 = vmatpush2.bf16.msra.mxu1 %v5464_v59 }
 0x50f   :  { %1831 = vmatprep.subr.bf16.mxu0 %v5465_v24  ;;  %1872 = vmatprep.subr.bf16.mxu1 %v5466_v0 }
 0x512   :  { %1832 = vmatpush2.bf16.msra.mxu0 %v5467_v21  ;;  %1873 = vmatpush2.bf16.msra.mxu1 %v5623_v54 }
 0x513   :  { %1833 = vmatprep.subr.bf16.mxu0 %v5624_v14  ;;  %1874 = vmatprep.subr.bf16.mxu1 %v5625_v12 }
 0x516   :  { %1834 = vmatpush2.bf16.msra.mxu0 %v5626_v1  ;;  %1875 = vmatpush2.bf16.msra.mxu1 %v5627_v11 }
 0x517   :  { %1835 = vmatprep.subr.bf16.mxu0 %v5628_v31  ;;  %1876 = vmatprep.subr.bf16.mxu1 %v5629_v46  ;;  %v2807_v46 = vld [vmem:[%s4927_s0 + $0x90] sm:$0xff] }
 0x518   :  { %v1727_v31 = vunpack.c.l.bf16 %v2807_v46  ;;  %v1728_v11 = vunpack.c.h.bf16 %v2807_v46 }
 0x51a   :  { %1836 = vmatpush2.bf16.msra.mxu0 %v5630_v35  ;;  %1877 = vmatpush2.bf16.msra.mxu1 %v5631_v19 }
 0x51b   :  { %1837 = vmatprep.subr.bf16.mxu0 %v5632_v26  ;;  %1878 = vmatprep.subr.bf16.mxu1 %v5633_v25 }
 0x51e   :  { %1838 = vmatpush2.bf16.msra.mxu0 %v5634_v23  ;;  %1879 = vmatpush2.bf16.msra.mxu1 %v5635_v28 }
 0x51f   :  { %1839 = vmatprep.subr.bf16.mxu0 %v5636_v16  ;;  %1880 = vmatprep.subr.bf16.mxu1 %v5637_v8  ;;  %v5647_v16 = vld [vmem:[#allocation129_spill] sm:$0xff]  ;;  %v5648_v8 = vld [vmem:[#allocation2_spill] sm:$0xff] }
 0x522   :  { %1840 = vmatpush2.bf16.msra.mxu0 %v5638_v33  ;;  %1881 = vmatpush2.bf16.msra.mxu1 %v5639_v61  ;;  %v5649_v33 = vld [vmem:[#allocation5_spill] sm:$0xff] }
 0x523   :  { %1841 = vmatprep.subr.bf16.mxu0 %v5640_v2  ;;  %1882 = vmatprep.subr.bf16.mxu1 %v5641_v6  ;;  %v5650_v6 = vld [vmem:[#allocation3_spill] sm:$0xff]  ;;  %v5659_v2 = vld [vmem:[#allocation14_spill] sm:$0xff] }
 0x526   :  { %1842 = vmatpush2.bf16.msra.mxu0 %v5642_v62  ;;  %1883 = vmatpush2.bf16.msra.mxu1 %v5643_v5  ;;  %v5651_v62 = vld [vmem:[#allocation6_spill] sm:$0xff]  ;;  %v5652_v5 = vld [vmem:[#allocation4_spill] sm:$0xff] }
 0x527   :  { %1843 = vmatprep.subr.bf16.mxu0 %v5644_v13  ;;  %1884 = vmatprep.subr.bf16.mxu1 %v5645_v15  ;;  %v5653_v13 = vld [vmem:[#allocation8_spill] sm:$0xff]  ;;  %v5654_v15 = vld [vmem:[#allocation7_spill] sm:$0xff] }
 0x52a   :  { %1844 = vmatpush2.bf16.msra.mxu0 %v5646_v47  ;;  %1885 = vmatpush2.bf16.msra.mxu1 %v5647_v16  ;;  %v5655_v47 = vld [vmem:[#allocation10_spill] sm:$0xff]  ;;  %v5656_v16 = vld [vmem:[#allocation9_spill] sm:$0xff] }
 0x52b   :  { %1962 = vmatprep.subr.bf16.mxu0 %v5648_v8  ;;  %2003 = vmatprep.subr.bf16.mxu1 %v5649_v33  ;;  %v5657_v8 = vld [vmem:[#allocation11_spill] sm:$0xff]  ;;  %v5658_v33 = vld [vmem:[#allocation12_spill] sm:$0xff] }
 0x52d   :  { %1846 = vmatmul.mubr.bf16.vlgmr.msra.gmra.mxu0 %v4355_v57  ;;  %1887 = vmatmul.mubr.bf16.vlgmr.msra.gmra.mxu1 %v4355_v57  ;;  %v5660_v57 = vld [vmem:[#allocation13_spill] sm:$0xff] }
 0x52e   :  { %1963 = vmatpush1.bf16.msra.mxu0 %v5650_v6  ;;  %2004 = vmatpush1.bf16.msra.mxu1 %v5651_v62  ;;  %v5661_v6 = vld [vmem:[#allocation15_spill] sm:$0xff]  ;;  %v5662_v62 = vld [vmem:[#allocation16_spill] sm:$0xff] }
 0x52f   :  { %1964 = vmatprep.subr.bf16.mxu0 %v5652_v5  ;;  %2005 = vmatprep.subr.bf16.mxu1 %v5653_v13  ;;  %v5663_v5 = vld [vmem:[#allocation18_spill] sm:$0xff]  ;;  %v5664_v13 = vld [vmem:[#allocation17_spill] sm:$0xff] }
 0x532   :  { %1965 = vmatpush1.bf16.msra.mxu0 %v5654_v15  ;;  %2006 = vmatpush1.bf16.msra.mxu1 %v5655_v47  ;;  %v5665_v15 = vld [vmem:[#allocation19_spill] sm:$0xff]  ;;  %v5666_v47 = vld [vmem:[#allocation20_spill] sm:$0xff] }
 0x533   :  { %1966 = vmatprep.subr.bf16.mxu0 %v5656_v16  ;;  %2007 = vmatprep.subr.bf16.mxu1 %v5657_v8  ;;  %v5667_v16 = vld [vmem:[#allocation22_spill] sm:$0xff]  ;;  %v5668_v8 = vld [vmem:[#allocation21_spill] sm:$0xff] }
 0x536   :  { %1967 = vmatpush1.bf16.msra.mxu0 %v5658_v33  ;;  %2008 = vmatpush1.bf16.msra.mxu1 %v5659_v2  ;;  %v5669_v33 = vld [vmem:[#allocation23_spill] sm:$0xff]  ;;  %v5670_v2 = vld [vmem:[#allocation24_spill] sm:$0xff] }
 0x537   :  { %1968 = vmatprep.subr.bf16.mxu0 %v5660_v57  ;;  %2009 = vmatprep.subr.bf16.mxu1 %v5661_v6  ;;  %v5671_v57 = vld [vmem:[#allocation26_spill] sm:$0xff]  ;;  %v5672_v6 = vld [vmem:[#allocation25_spill] sm:$0xff] }
 0x53a   :  { %1969 = vmatpush1.bf16.msra.mxu0 %v5662_v62  ;;  %2010 = vmatpush1.bf16.msra.mxu1 %v5663_v5  ;;  %v5673_v62 = vld [vmem:[#allocation27_spill] sm:$0xff]  ;;  %v5674_v5 = vld [vmem:[#allocation28_spill] sm:$0xff] }
 0x53b   :  { %1970 = vmatprep.subr.bf16.mxu0 %v5664_v13  ;;  %2011 = vmatprep.subr.bf16.mxu1 %v5665_v15  ;;  %v5675_v13 = vld [vmem:[#allocation30_spill] sm:$0xff]  ;;  %v5676_v15 = vld [vmem:[#allocation29_spill] sm:$0xff] }
 0x53e   :  { %1971 = vmatpush1.bf16.msra.mxu0 %v5666_v47  ;;  %2012 = vmatpush1.bf16.msra.mxu1 %v5667_v16  ;;  %v5677_v47 = vld [vmem:[#allocation31_spill] sm:$0xff]  ;;  %v5678_v16 = vld [vmem:[#allocation32_spill] sm:$0xff] }
 0x53f   :  { %1972 = vmatprep.subr.bf16.mxu0 %v5668_v8  ;;  %2013 = vmatprep.subr.bf16.mxu1 %v5669_v33  ;;  %v5679_v8 = vld [vmem:[#allocation34_spill] sm:$0xff]  ;;  %v5680_v33 = vld [vmem:[#allocation33_spill] sm:$0xff] }
 0x542   :  { %1973 = vmatpush1.bf16.msra.mxu0 %v5670_v2  ;;  %2014 = vmatpush1.bf16.msra.mxu1 %v5671_v57  ;;  %v5681_v2 = vld [vmem:[#allocation35_spill] sm:$0xff]  ;;  %v5682_v57 = vld [vmem:[#allocation36_spill] sm:$0xff] }
 0x543   :  { %1974 = vmatprep.subr.bf16.mxu0 %v5672_v6  ;;  %2015 = vmatprep.subr.bf16.mxu1 %v5673_v62  ;;  %v5683_v6 = vld [vmem:[#allocation38_spill] sm:$0xff]  ;;  %v5684_v62 = vld [vmem:[#allocation37_spill] sm:$0xff] }
 0x546   :  { %1975 = vmatpush1.bf16.msra.mxu0 %v5674_v5  ;;  %2016 = vmatpush1.bf16.msra.mxu1 %v5675_v13  ;;  %v5685_v5 = vld [vmem:[#allocation39_spill] sm:$0xff]  ;;  %v5686_v13 = vld [vmem:[#allocation40_spill] sm:$0xff] }
 0x547   :  { %1976 = vmatprep.subr.bf16.mxu0 %v5676_v15  ;;  %2017 = vmatprep.subr.bf16.mxu1 %v5677_v47  ;;  %v5687_v15 = vld [vmem:[#allocation42_spill] sm:$0xff]  ;;  %v5688_v47 = vld [vmem:[#allocation41_spill] sm:$0xff] }
 0x54a   :  { %1977 = vmatpush1.bf16.msra.mxu0 %v5678_v16  ;;  %2018 = vmatpush1.bf16.msra.mxu1 %v5679_v8  ;;  %v5689_v16 = vld [vmem:[#allocation43_spill] sm:$0xff]  ;;  %v5690_v8 = vld [vmem:[#allocation44_spill] sm:$0xff] }
 0x54b   :  { %1978 = vmatprep.subr.bf16.mxu0 %v5680_v33  ;;  %2019 = vmatprep.subr.bf16.mxu1 %v5681_v2  ;;  %v5691_v33 = vld [vmem:[#allocation46_spill] sm:$0xff]  ;;  %v5692_v2 = vld [vmem:[#allocation45_spill] sm:$0xff] }
 0x54e   :  { %1979 = vmatpush2.bf16.msra.mxu0 %v5682_v57  ;;  %2020 = vmatpush2.bf16.msra.mxu1 %v5683_v6  ;;  %v5693_v57 = vld [vmem:[#allocation47_spill] sm:$0xff]  ;;  %v5694_v6 = vld [vmem:[#allocation48_spill] sm:$0xff] }
 0x54f   :  { %1980 = vmatprep.subr.bf16.mxu0 %v5684_v62  ;;  %2021 = vmatprep.subr.bf16.mxu1 %v5685_v5  ;;  %v5695_v62 = vld [vmem:[#allocation50_spill] sm:$0xff]  ;;  %v5696_v5 = vld [vmem:[#allocation49_spill] sm:$0xff] }
 0x552   :  { %1981 = vmatpush2.bf16.msra.mxu0 %v5686_v13  ;;  %2022 = vmatpush2.bf16.msra.mxu1 %v5687_v15  ;;  %v5697_v13 = vld [vmem:[#allocation51_spill] sm:$0xff]  ;;  %v5698_v15 = vld [vmem:[#allocation52_spill] sm:$0xff] }
 0x553   :  { %1982 = vmatprep.subr.bf16.mxu0 %v5688_v47  ;;  %2023 = vmatprep.subr.bf16.mxu1 %v5689_v16  ;;  %v5699_v47 = vld [vmem:[#allocation54_spill] sm:$0xff]  ;;  %v5700_v16 = vld [vmem:[#allocation53_spill] sm:$0xff] }
 0x556   :  { %1983 = vmatpush2.bf16.msra.mxu0 %v5690_v8  ;;  %2024 = vmatpush2.bf16.msra.mxu1 %v5691_v33  ;;  %v5701_v8 = vld [vmem:[#allocation55_spill] sm:$0xff]  ;;  %v5702_v33 = vld [vmem:[#allocation56_spill] sm:$0xff] }
 0x557   :  { %1984 = vmatprep.subr.bf16.mxu0 %v5692_v2  ;;  %2025 = vmatprep.subr.bf16.mxu1 %v5693_v57  ;;  %v5703_v2 = vld [vmem:[#allocation58_spill] sm:$0xff]  ;;  %v5704_v57 = vld [vmem:[#allocation57_spill] sm:$0xff] }
 0x55a   :  { %1985 = vmatpush2.bf16.msra.mxu0 %v5694_v6  ;;  %2026 = vmatpush2.bf16.msra.mxu1 %v5695_v62  ;;  %v5705_v6 = vld [vmem:[#allocation59_spill] sm:$0xff]  ;;  %v5706_v62 = vld [vmem:[#allocation60_spill] sm:$0xff] }
 0x55b   :  { %1986 = vmatprep.subr.bf16.mxu0 %v5696_v5  ;;  %2027 = vmatprep.subr.bf16.mxu1 %v5697_v13  ;;  %v5707_v5 = vld [vmem:[#allocation62_spill] sm:$0xff]  ;;  %v5708_v13 = vld [vmem:[#allocation61_spill] sm:$0xff] }
 0x55e   :  { %1987 = vmatpush2.bf16.msra.mxu0 %v5698_v15  ;;  %2028 = vmatpush2.bf16.msra.mxu1 %v5699_v47  ;;  %v5709_v15 = vld [vmem:[#allocation63_spill] sm:$0xff]  ;;  %v5710_v47 = vld [vmem:[#allocation64_spill] sm:$0xff] }
 0x55f   :  { %1988 = vmatprep.subr.bf16.mxu0 %v5700_v16  ;;  %2029 = vmatprep.subr.bf16.mxu1 %v5701_v8  ;;  %v5711_v16 = vld [vmem:[#allocation66_spill] sm:$0xff]  ;;  %v5712_v8 = vld [vmem:[#allocation65_spill] sm:$0xff] }
 0x562   :  { %1989 = vmatpush2.bf16.msra.mxu0 %v5702_v33  ;;  %2030 = vmatpush2.bf16.msra.mxu1 %v5703_v2  ;;  %v5713_v33 = vld [vmem:[#allocation67_spill] sm:$0xff] }
 0x563   :  { %1990 = vmatprep.subr.bf16.mxu0 %v5704_v57  ;;  %2031 = vmatprep.subr.bf16.mxu1 %v5705_v6 }
 0x566   :  { %1991 = vmatpush2.bf16.msra.mxu0 %v5706_v62  ;;  %2032 = vmatpush2.bf16.msra.mxu1 %v5707_v5 }
 0x567   :  { %1992 = vmatprep.subr.bf16.mxu0 %v5708_v13  ;;  %2033 = vmatprep.subr.bf16.mxu1 %v5709_v15  ;;  %v2806_v15 = vld [vmem:[%s4927_s0 + $0x88] sm:$0xff] }
 0x568   :  { %v1726_v13 = vunpack.c.h.bf16 %v2806_v15 }
 0x56a   :  { %1993 = vmatpush2.bf16.msra.mxu0 %v5710_v47  ;;  %2034 = vmatpush2.bf16.msra.mxu1 %v5711_v16  ;;  %v2805_v16 = vld [vmem:[%s4927_s0 + $0x80] sm:$0xff]  ;;  %v1725_v47 = vunpack.c.l.bf16 %v2806_v15 }
 0x56b   :  { %2044 = vmatprep.subr.bf16.mxu0 %v5712_v8  ;;  %2085 = vmatprep.subr.bf16.mxu1 %v5713_v33  ;;  %v1723_v8 = vunpack.c.l.bf16 %v2805_v16  ;;  %v1724_v25 = vunpack.c.h.bf16 %v2805_v16  ;;  %v2808_v16 = vld [vmem:[%s4927_s0 + $0x98] sm:$0xff] }
 0x5ad   :  { %v1765_v2 = vpop.f32.mrf.mxu0  ;;  %v1806_v57 = vpop.f32.mrf.mxu1 }
 0x5ae   :  { %v1897_v33 = vadd.f32 %v1806_v57, %v1725_v47  ;;  %v1895_v26 = vadd.f32 %v1765_v2, %v1723_v8 }
 0x5af   :  { %v1767_v61 = vpop.f32.mrf.mxu0  ;;  %v1808_v6 = vpop.f32.mrf.mxu1 }
 0x5b0   :  { %v1898_v19 = vadd.f32 %v1808_v6, %v1726_v13  ;;  %v1911_v35 = vmul.f32 0.5, %v1897_v33 }
 0x5b1   :  { %v1769_v28 = vpop.f32.mrf.mxu0  ;;  %v1810_v62 = vpop.f32.mrf.mxu1 }
 0x5b2   :  { %v1896_v28 = vadd.f32 %v1767_v61, %v1724_v25  ;;  %v1903_v62 = vmul.f32 0.5, %v1895_v26  ;;  %2918 = vtanh.f32 %v1911_v35  ;;  %v1729_v35 = vunpack.c.l.bf16 %v2808_v16 }
 0x5b3   :  { %v1770_v23 = vpop.f32.mrf.mxu0  ;;  %v1811_v5 = vpop.f32.mrf.mxu1  ;;  %v1730_v61 = vunpack.c.h.bf16 %v2808_v16 }
 0x5b4   :  { %v1912_v23 = vmul.f32 0.5, %v1898_v19  ;;  %v1904_v5 = vmul.f32 0.5, %v1896_v28  ;;  %2920 = vtanh.f32 %v1903_v62 }
 0x5b6   :  { %2922 = vtanh.f32 %v1912_v23 }
 0x5b7   :  { %2924 = vtanh.f32 %v1904_v5 }
 0x5bf   :  { %v2919_v13 = vpop.eup %2918 }
 0x5c0   :  { %v1915_v5 = vadd.f32 1.0, %v2919_v13 }
 0x5c1   :  { %v2921_v28 = vpop.eup %2920 }
 0x5c2   :  { %v1907_v12 = vadd.f32 1.0, %v2921_v28 }
 0x5c3   :  { %v2923_v23 = vpop.eup %2922 }
 0x5c4   :  { %v2925_v1 = vpop.eup %2924 }
 0x5c5   :  { %v1908_v54 = vadd.f32 1.0, %v2925_v1 }
 0x5ed   :  { %v1847_v15 = vpop.f32.mrf.mxu0  ;;  %v1888_v8 = vpop.f32.mrf.mxu1 }
 0x5ee   :  { %v1899_v25 = vadd.f32 %v1847_v15, %v1727_v31  ;;  %v1901_v46 = vadd.f32 %v1888_v8, %v1729_v35  ;;  %v1916_v15 = vadd.f32 1.0, %v2923_v23  ;;  %v1910_v8 = vmul.f32 0.5, %v1908_v54 }
 0x5ef   :  { %v1849_v26 = vpop.f32.mrf.mxu0  ;;  %v1890_v19 = vpop.f32.mrf.mxu1 }
 0x5f0   :  { %2926 = vtanh.f32 %v1899_v25  ;;  %v1900_v33 = vadd.f32 %v1849_v26, %v1728_v11  ;;  %v1902_v62 = vadd.f32 %v1890_v19, %v1730_v61  ;;  %v1921_v31 = vmul.f32 0.5, %v1901_v46 }
 0x5f1   :  { %v1851_v2 = vpop.f32.mrf.mxu0  ;;  %v1892_v6 = vpop.f32.mrf.mxu1  ;;  %v1917_v25 = vmul.f32 0.5, %v1915_v5  ;;  %v1909_v11 = vmul.f32 0.5, %v1907_v12  ;;  %v1918_v26 = vmul.f32 0.5, %v1916_v15  ;;  %v5715_v15 = vld [vmem:[#allocation105_spill] sm:$0xff] }
 0x5f2   :  { %2928 = vtanh.f32 %v1900_v33  ;;  %v1922_v14 = vmul.f32 0.5, %v1902_v62 }
 0x5f3   :  { %v1852_v47 = vpop.f32.mrf.mxu0  ;;  %v1893_v57 = vpop.f32.mrf.mxu1  ;;  %2930 = vtanh.f32 %v1921_v31  ;;  %v1929_v33 = vmul.f32 %v1917_v25, %v4348_v4  ;;  %v1930_v61 = vmul.f32 %v1918_v26, %v4352_v10  ;;  %v5714_v31 = vld [vmem:[#allocation106_spill] sm:$0xff]  ;;  %v5716_v25 = vld [vmem:[#allocation107_spill] sm:$0xff]  ;;  %v5719_v26 = vld [vmem:[#allocation109_spill] sm:$0xff] }
 0x5f4   :  { %2932 = vtanh.f32 %v1922_v14 }
 0x5fd   :  { %v2927_v16 = vpop.eup %2926 }
 0x5fe   :  { %v1931_v2 = vmul.f32 %v2927_v16, %v1909_v11  ;;  %v5717_v11 = vld [vmem:[#allocation108_spill] sm:$0xff]  ;;  %v5718_v16 = vld [vmem:[#allocation110_spill] sm:$0xff] }
 0x5ff   :  { %v2929_v35 = vpop.eup %2928 }
 0x600   :  { %v4505_v19 = vadd.f32 %v1931_v2, %v1929_v33  ;;  %v1932_v6 = vmul.f32 %v2929_v35, %v1910_v8  ;;  %v2931_v12 = vpop.eup %2930  ;;  %v5720_v33 = vld [vmem:[#allocation111_spill] sm:$0xff]  ;;  %v5721_v2 = vld [vmem:[#allocation112_spill] sm:$0xff]  ;;  %v5722_v8 = vld [vmem:[#allocation114_spill] sm:$0xff] }
 0x601   :  { %v2933_v1 = vpop.eup %2932  ;;  %v1925_v47 = vadd.f32 1.0, %v2931_v12  ;;  %v5723_v35 = vld [vmem:[#allocation113_spill] sm:$0xff]  ;;  %v5726_v12 = vld [vmem:[#allocation118_spill] sm:$0xff] }
 0x602   :  { %2934 = vtanh.f32 %v4505_v19  ;;  %v4509_v13 = vadd.f32 %v1932_v6, %v1930_v61  ;;  %v1926_v14 = vadd.f32 1.0, %v2933_v1  ;;  %v5724_v61 = vld [vmem:[#allocation115_spill] sm:$0xff]  ;;  %v5725_v6 = vld [vmem:[#allocation116_spill] sm:$0xff]  ;;  %v5727_v1 = vld [vmem:[#allocation117_spill] sm:$0xff] }
 0x603   :  { %v1927_v4 = vmul.f32 0.5, %v1925_v47  ;;  %v5728_v47 = vld [vmem:[#allocation119_spill] sm:$0xff] }
 0x604   :  { %2936 = vtanh.f32 %v4509_v13  ;;  %v1928_v46 = vmul.f32 0.5, %v1926_v14  ;;  %v5729_v14 = vld [vmem:[#allocation120_spill] sm:$0xff] }
 0x60f   :  { %v2935_v57 = vpop.eup %2934 }
 0x610   :  { %v1937_v28 = vmul.f32 %v2935_v57, %v1927_v4  ;;  %v5730_v57 = vld [vmem:[#allocation122_spill] sm:$0xff]  ;;  %v5731_v4 = vld [vmem:[#allocation121_spill] sm:$0xff] }
 0x611   :  { %v2937_v54 = vpop.eup %2936 }
 0x612   :  { %v1938_v62 = vmul.f32 %v2937_v54, %v1928_v46  ;;  %v4512_v10 = vpack.c.bf16 %v1937_v28, %v1937_v28  ;;  %v5732_v46 = vld [vmem:[#allocation123_spill] sm:$0xff]  ;;  %v5733_v54 = vld [vmem:[#allocation124_spill] sm:$0xff] }
 0x614   :  { %v2833_v23 = vpack.c.bf16 %v1938_v62, %v1937_v28  ;;  %v1940_v5 = vpack.c.bf16 %v1938_v62, %v1938_v62  ;;  %v5734_v28 = vld [vmem:[#allocation126_spill] sm:$0xff]  ;;  %v5735_v62 = vld [vmem:[#allocation125_spill] sm:$0xff] }
 0x616   :  { %2810 = vst [vmem:[%s4928_s2 + $0x20] sm:$0xff] %v2833_v23  ;;  %1994 = vmatprep.mubr.bf16.mxu0 %v1940_v5  ;;  %2035 = vmatprep.mubr.bf16.mxu1 %v1940_v5  ;;  %v5736_v23 = vld [vmem:[#allocation127_spill] sm:$0xff] }
 0x617   :  { %1995 = vmatmul.mubr.bf16.vlgmr.msra.gmra.mxu0 %v4512_v10  ;;  %2036 = vmatmul.mubr.bf16.vlgmr.msra.gmra.mxu1 %v4512_v10 }
 0x618   :  { %2045 = vmatpush1.bf16.msra.mxu0 %v5353_v39  ;;  %2086 = vmatpush1.bf16.msra.mxu1 %v5354_v30 }
 0x619   :  { %2076 = vmatprep.mubr.bf16.mxu0 %v1940_v5  ;;  %2117 = vmatprep.mubr.bf16.mxu1 %v1940_v5  ;;  %v5737_v5 = vld [vmem:[#allocation128_spill] sm:$0xff] }
 0x61a   :  { %2046 = vmatprep.subr.bf16.mxu0 %v5355_v50  ;;  %2087 = vmatprep.subr.bf16.mxu1 %v5356_v34 }
 0x61c   :  { %2047 = vmatpush1.bf16.msra.mxu0 %v5357_v22  ;;  %2088 = vmatpush1.bf16.msra.mxu1 %v5358_v58 }
 0x61d   :  { %2048 = vmatprep.subr.bf16.mxu0 %v5359_v18  ;;  %2089 = vmatprep.subr.bf16.mxu1 %v5360_v55 }
 0x620   :  { %2049 = vmatpush1.bf16.msra.mxu0 %v5361_v63  ;;  %2090 = vmatpush1.bf16.msra.mxu1 %v5362_v7 }
 0x621   :  { %2050 = vmatprep.subr.bf16.mxu0 %v5441_v29  ;;  %2091 = vmatprep.subr.bf16.mxu1 %v5442_v60 }
 0x624   :  { %2051 = vmatpush1.bf16.msra.mxu0 %v5443_v36  ;;  %2092 = vmatpush1.bf16.msra.mxu1 %v5444_v27 }
 0x625   :  { %2052 = vmatprep.subr.bf16.mxu0 %v5445_v44  ;;  %2093 = vmatprep.subr.bf16.mxu1 %v5446_v37 }
 0x628   :  { %2053 = vmatpush1.bf16.msra.mxu0 %v5447_v45  ;;  %2094 = vmatpush1.bf16.msra.mxu1 %v5448_v52 }
 0x629   :  { %2054 = vmatprep.subr.bf16.mxu0 %v5449_v48  ;;  %2095 = vmatprep.subr.bf16.mxu1 %v5450_v32 }
 0x62c   :  { %2055 = vmatpush1.bf16.msra.mxu0 %v5451_v51  ;;  %2096 = vmatpush1.bf16.msra.mxu1 %v5452_v53 }
 0x62d   :  { %2056 = vmatprep.subr.bf16.mxu0 %v5453_v20  ;;  %2097 = vmatprep.subr.bf16.mxu1 %v5532_v49 }
 0x630   :  { %2057 = vmatpush1.bf16.msra.mxu0 %v5533_v42  ;;  %2098 = vmatpush1.bf16.msra.mxu1 %v5534_v9 }
 0x631   :  { %2058 = vmatprep.subr.bf16.mxu0 %v5535_v38  ;;  %2099 = vmatprep.subr.bf16.mxu1 %v5536_v3 }
 0x634   :  { %2059 = vmatpush1.bf16.msra.mxu0 %v5537_v17  ;;  %2100 = vmatpush1.bf16.msra.mxu1 %v5538_v41 }
 0x635   :  { %2060 = vmatprep.subr.bf16.mxu0 %v5461_v43  ;;  %2101 = vmatprep.subr.bf16.mxu1 %v5462_v56 }
 0x638   :  { %2061 = vmatpush2.bf16.msra.mxu0 %v5463_v40  ;;  %2102 = vmatpush2.bf16.msra.mxu1 %v5464_v59 }
 0x639   :  { %2062 = vmatprep.subr.bf16.mxu0 %v5465_v24  ;;  %2103 = vmatprep.subr.bf16.mxu1 %v5466_v0 }
 0x63c   :  { %2063 = vmatpush2.bf16.msra.mxu0 %v5467_v21  ;;  %2104 = vmatpush2.bf16.msra.mxu1 %v5714_v31 }
 0x63d   :  { %2064 = vmatprep.subr.bf16.mxu0 %v5715_v15  ;;  %2105 = vmatprep.subr.bf16.mxu1 %v5716_v25 }
 0x640   :  { %2065 = vmatpush2.bf16.msra.mxu0 %v5717_v11  ;;  %2106 = vmatpush2.bf16.msra.mxu1 %v5718_v16 }
 0x641   :  { %2066 = vmatprep.subr.bf16.mxu0 %v5719_v26  ;;  %2107 = vmatprep.subr.bf16.mxu1 %v5720_v33  ;;  %v2813_v33 = vld [vmem:[%s4927_s0 + $0xb0] sm:$0xff] }
 0x642   :  { %v1958_v26 = vunpack.c.l.bf16 %v2813_v33  ;;  %v1959_v16 = vunpack.c.h.bf16 %v2813_v33 }
 0x644   :  { %2067 = vmatpush2.bf16.msra.mxu0 %v5721_v2  ;;  %2108 = vmatpush2.bf16.msra.mxu1 %v5722_v8 }
 0x645   :  { %2068 = vmatprep.subr.bf16.mxu0 %v5723_v35  ;;  %2109 = vmatprep.subr.bf16.mxu1 %v5724_v61 }
 0x648   :  { %2069 = vmatpush2.bf16.msra.mxu0 %v5725_v6  ;;  %2110 = vmatpush2.bf16.msra.mxu1 %v5726_v12 }
 0x649   :  { %2070 = vmatprep.subr.bf16.mxu0 %v5727_v1  ;;  %2111 = vmatprep.subr.bf16.mxu1 %v5728_v47  ;;  %v5738_v1 = vld [vmem:[#allocation129_spill] sm:$0xff]  ;;  %v5739_v47 = vld [vmem:[#allocation2_spill] sm:$0xff] }
 0x64c   :  { %2071 = vmatpush2.bf16.msra.mxu0 %v5729_v14  ;;  %2112 = vmatpush2.bf16.msra.mxu1 %v5730_v57  ;;  %v5740_v14 = vld [vmem:[#allocation5_spill] sm:$0xff] }
 0x64d   :  { %2072 = vmatprep.subr.bf16.mxu0 %v5731_v4  ;;  %2113 = vmatprep.subr.bf16.mxu1 %v5732_v46  ;;  %v5741_v46 = vld [vmem:[#allocation3_spill] sm:$0xff]  ;;  %v5750_v4 = vld [vmem:[#allocation14_spill] sm:$0xff] }
 0x650   :  { %2073 = vmatpush2.bf16.msra.mxu0 %v5733_v54  ;;  %2114 = vmatpush2.bf16.msra.mxu1 %v5734_v28  ;;  %v5742_v54 = vld [vmem:[#allocation6_spill] sm:$0xff]  ;;  %v5743_v28 = vld [vmem:[#allocation4_spill] sm:$0xff] }
 0x651   :  { %2074 = vmatprep.subr.bf16.mxu0 %v5735_v62  ;;  %2115 = vmatprep.subr.bf16.mxu1 %v5736_v23  ;;  %v5744_v62 = vld [vmem:[#allocation8_spill] sm:$0xff]  ;;  %v5745_v23 = vld [vmem:[#allocation7_spill] sm:$0xff] }
 0x654   :  { %2075 = vmatpush2.bf16.msra.mxu0 %v5737_v5  ;;  %2116 = vmatpush2.bf16.msra.mxu1 %v5738_v1  ;;  %v5746_v5 = vld [vmem:[#allocation10_spill] sm:$0xff]  ;;  %v5747_v1 = vld [vmem:[#allocation9_spill] sm:$0xff] }
 0x655   :  { %2193 = vmatprep.subr.bf16.mxu0 %v5739_v47  ;;  %2234 = vmatprep.subr.bf16.mxu1 %v5740_v14  ;;  %v5748_v47 = vld [vmem:[#allocation11_spill] sm:$0xff]  ;;  %v5749_v14 = vld [vmem:[#allocation12_spill] sm:$0xff] }
 0x657   :  { %2077 = vmatmul.mubr.bf16.vlgmr.msra.gmra.mxu0 %v4512_v10  ;;  %2118 = vmatmul.mubr.bf16.vlgmr.msra.gmra.mxu1 %v4512_v10  ;;  %v5751_v10 = vld [vmem:[#allocation13_spill] sm:$0xff] }
 0x658   :  { %2194 = vmatpush1.bf16.msra.mxu0 %v5741_v46  ;;  %2235 = vmatpush1.bf16.msra.mxu1 %v5742_v54  ;;  %v5752_v46 = vld [vmem:[#allocation15_spill] sm:$0xff]  ;;  %v5753_v54 = vld [vmem:[#allocation16_spill] sm:$0xff] }
 0x659   :  { %2195 = vmatprep.subr.bf16.mxu0 %v5743_v28  ;;  %2236 = vmatprep.subr.bf16.mxu1 %v5744_v62  ;;  %v5754_v28 = vld [vmem:[#allocation18_spill] sm:$0xff]  ;;  %v5755_v62 = vld [vmem:[#allocation17_spill] sm:$0xff] }
 0x65c   :  { %2196 = vmatpush1.bf16.msra.mxu0 %v5745_v23  ;;  %2237 = vmatpush1.bf16.msra.mxu1 %v5746_v5  ;;  %v5756_v23 = vld [vmem:[#allocation19_spill] sm:$0xff]  ;;  %v5757_v5 = vld [vmem:[#allocation20_spill] sm:$0xff] }
 0x65d   :  { %2197 = vmatprep.subr.bf16.mxu0 %v5747_v1  ;;  %2238 = vmatprep.subr.bf16.mxu1 %v5748_v47  ;;  %v5758_v1 = vld [vmem:[#allocation22_spill] sm:$0xff]  ;;  %v5759_v47 = vld [vmem:[#allocation21_spill] sm:$0xff] }
 0x660   :  { %2198 = vmatpush1.bf16.msra.mxu0 %v5749_v14  ;;  %2239 = vmatpush1.bf16.msra.mxu1 %v5750_v4  ;;  %v5760_v14 = vld [vmem:[#allocation23_spill] sm:$0xff]  ;;  %v5761_v4 = vld [vmem:[#allocation24_spill] sm:$0xff] }
 0x661   :  { %2199 = vmatprep.subr.bf16.mxu0 %v5751_v10  ;;  %2240 = vmatprep.subr.bf16.mxu1 %v5752_v46  ;;  %v5762_v10 = vld [vmem:[#allocation26_spill] sm:$0xff]  ;;  %v5763_v46 = vld [vmem:[#allocation25_spill] sm:$0xff] }
 0x664   :  { %2200 = vmatpush1.bf16.msra.mxu0 %v5753_v54  ;;  %2241 = vmatpush1.bf16.msra.mxu1 %v5754_v28  ;;  %v5764_v54 = vld [vmem:[#allocation27_spill] sm:$0xff]  ;;  %v5765_v28 = vld [vmem:[#allocation28_spill] sm:$0xff] }
 0x665   :  { %2201 = vmatprep.subr.bf16.mxu0 %v5755_v62  ;;  %2242 = vmatprep.subr.bf16.mxu1 %v5756_v23  ;;  %v5766_v62 = vld [vmem:[#allocation30_spill] sm:$0xff]  ;;  %v5767_v23 = vld [vmem:[#allocation29_spill] sm:$0xff] }
 0x668   :  { %2202 = vmatpush1.bf16.msra.mxu0 %v5757_v5  ;;  %2243 = vmatpush1.bf16.msra.mxu1 %v5758_v1  ;;  %v5768_v5 = vld [vmem:[#allocation31_spill] sm:$0xff]  ;;  %v5769_v1 = vld [vmem:[#allocation32_spill] sm:$0xff] }
 0x669   :  { %2203 = vmatprep.subr.bf16.mxu0 %v5759_v47  ;;  %2244 = vmatprep.subr.bf16.mxu1 %v5760_v14  ;;  %v5770_v47 = vld [vmem:[#allocation34_spill] sm:$0xff]  ;;  %v5771_v14 = vld [vmem:[#allocation33_spill] sm:$0xff] }
 0x66c   :  { %2204 = vmatpush1.bf16.msra.mxu0 %v5761_v4  ;;  %2245 = vmatpush1.bf16.msra.mxu1 %v5762_v10  ;;  %v5772_v4 = vld [vmem:[#allocation35_spill] sm:$0xff]  ;;  %v5773_v10 = vld [vmem:[#allocation36_spill] sm:$0xff] }
 0x66d   :  { %2205 = vmatprep.subr.bf16.mxu0 %v5763_v46  ;;  %2246 = vmatprep.subr.bf16.mxu1 %v5764_v54  ;;  %v5774_v46 = vld [vmem:[#allocation38_spill] sm:$0xff]  ;;  %v5775_v54 = vld [vmem:[#allocation37_spill] sm:$0xff] }
 0x670   :  { %2206 = vmatpush1.bf16.msra.mxu0 %v5765_v28  ;;  %2247 = vmatpush1.bf16.msra.mxu1 %v5766_v62  ;;  %v5776_v28 = vld [vmem:[#allocation39_spill] sm:$0xff]  ;;  %v5777_v62 = vld [vmem:[#allocation40_spill] sm:$0xff] }
 0x671   :  { %2207 = vmatprep.subr.bf16.mxu0 %v5767_v23  ;;  %2248 = vmatprep.subr.bf16.mxu1 %v5768_v5  ;;  %v5778_v23 = vld [vmem:[#allocation42_spill] sm:$0xff]  ;;  %v5779_v5 = vld [vmem:[#allocation41_spill] sm:$0xff] }
 0x674   :  { %2208 = vmatpush1.bf16.msra.mxu0 %v5769_v1  ;;  %2249 = vmatpush1.bf16.msra.mxu1 %v5770_v47  ;;  %v5780_v1 = vld [vmem:[#allocation43_spill] sm:$0xff]  ;;  %v5781_v47 = vld [vmem:[#allocation44_spill] sm:$0xff] }
 0x675   :  { %2209 = vmatprep.subr.bf16.mxu0 %v5771_v14  ;;  %2250 = vmatprep.subr.bf16.mxu1 %v5772_v4  ;;  %v5782_v14 = vld [vmem:[#allocation46_spill] sm:$0xff]  ;;  %v5783_v4 = vld [vmem:[#allocation45_spill] sm:$0xff] }
 0x678   :  { %2210 = vmatpush2.bf16.msra.mxu0 %v5773_v10  ;;  %2251 = vmatpush2.bf16.msra.mxu1 %v5774_v46  ;;  %v5784_v10 = vld [vmem:[#allocation47_spill] sm:$0xff]  ;;  %v5785_v46 = vld [vmem:[#allocation48_spill] sm:$0xff] }
 0x679   :  { %2211 = vmatprep.subr.bf16.mxu0 %v5775_v54  ;;  %2252 = vmatprep.subr.bf16.mxu1 %v5776_v28  ;;  %v5786_v54 = vld [vmem:[#allocation50_spill] sm:$0xff]  ;;  %v5787_v28 = vld [vmem:[#allocation49_spill] sm:$0xff] }
 0x67c   :  { %2212 = vmatpush2.bf16.msra.mxu0 %v5777_v62  ;;  %2253 = vmatpush2.bf16.msra.mxu1 %v5778_v23  ;;  %v5788_v62 = vld [vmem:[#allocation51_spill] sm:$0xff]  ;;  %v5789_v23 = vld [vmem:[#allocation52_spill] sm:$0xff] }
 0x67d   :  { %2213 = vmatprep.subr.bf16.mxu0 %v5779_v5  ;;  %2254 = vmatprep.subr.bf16.mxu1 %v5780_v1  ;;  %v5790_v5 = vld [vmem:[#allocation54_spill] sm:$0xff]  ;;  %v5791_v1 = vld [vmem:[#allocation53_spill] sm:$0xff] }
 0x680   :  { %2214 = vmatpush2.bf16.msra.mxu0 %v5781_v47  ;;  %2255 = vmatpush2.bf16.msra.mxu1 %v5782_v14  ;;  %v5792_v47 = vld [vmem:[#allocation55_spill] sm:$0xff]  ;;  %v5793_v14 = vld [vmem:[#allocation56_spill] sm:$0xff] }
 0x681   :  { %2215 = vmatprep.subr.bf16.mxu0 %v5783_v4  ;;  %2256 = vmatprep.subr.bf16.mxu1 %v5784_v10  ;;  %v5794_v4 = vld [vmem:[#allocation58_spill] sm:$0xff]  ;;  %v5795_v10 = vld [vmem:[#allocation57_spill] sm:$0xff] }
 0x684   :  { %2216 = vmatpush2.bf16.msra.mxu0 %v5785_v46  ;;  %2257 = vmatpush2.bf16.msra.mxu1 %v5786_v54  ;;  %v5796_v46 = vld [vmem:[#allocation59_spill] sm:$0xff]  ;;  %v5797_v54 = vld [vmem:[#allocation60_spill] sm:$0xff] }
 0x685   :  { %2217 = vmatprep.subr.bf16.mxu0 %v5787_v28  ;;  %2258 = vmatprep.subr.bf16.mxu1 %v5788_v62  ;;  %v5798_v28 = vld [vmem:[#allocation62_spill] sm:$0xff]  ;;  %v5799_v62 = vld [vmem:[#allocation61_spill] sm:$0xff] }
 0x688   :  { %2218 = vmatpush2.bf16.msra.mxu0 %v5789_v23  ;;  %2259 = vmatpush2.bf16.msra.mxu1 %v5790_v5  ;;  %v5800_v23 = vld [vmem:[#allocation63_spill] sm:$0xff]  ;;  %v5801_v5 = vld [vmem:[#allocation64_spill] sm:$0xff] }
 0x689   :  { %2219 = vmatprep.subr.bf16.mxu0 %v5791_v1  ;;  %2260 = vmatprep.subr.bf16.mxu1 %v5792_v47  ;;  %v5802_v1 = vld [vmem:[#allocation66_spill] sm:$0xff]  ;;  %v5803_v47 = vld [vmem:[#allocation65_spill] sm:$0xff] }
 0x68c   :  { %2220 = vmatpush2.bf16.msra.mxu0 %v5793_v14  ;;  %2261 = vmatpush2.bf16.msra.mxu1 %v5794_v4  ;;  %v5804_v14 = vld [vmem:[#allocation67_spill] sm:$0xff] }
 0x68d   :  { %2221 = vmatprep.subr.bf16.mxu0 %v5795_v10  ;;  %2262 = vmatprep.subr.bf16.mxu1 %v5796_v46 }
 0x690   :  { %2222 = vmatpush2.bf16.msra.mxu0 %v5797_v54  ;;  %2263 = vmatpush2.bf16.msra.mxu1 %v5798_v28 }
 0x691   :  { %2223 = vmatprep.subr.bf16.mxu0 %v5799_v62  ;;  %2264 = vmatprep.subr.bf16.mxu1 %v5800_v23  ;;  %v2812_v23 = vld [vmem:[%s4927_s0 + $0xa8] sm:$0xff] }
 0x692   :  { %v1957_v62 = vunpack.c.h.bf16 %v2812_v23 }
 0x694   :  { %2224 = vmatpush2.bf16.msra.mxu0 %v5801_v5  ;;  %2265 = vmatpush2.bf16.msra.mxu1 %v5802_v1  ;;  %v2811_v1 = vld [vmem:[%s4927_s0 + $0xa0] sm:$0xff]  ;;  %v1956_v5 = vunpack.c.l.bf16 %v2812_v23 }
 0x695   :  { %2275 = vmatprep.subr.bf16.mxu0 %v5803_v47  ;;  %2316 = vmatprep.subr.bf16.mxu1 %v5804_v14  ;;  %v1954_v47 = vunpack.c.l.bf16 %v2811_v1  ;;  %v1955_v61 = vunpack.c.h.bf16 %v2811_v1  ;;  %v2814_v1 = vld [vmem:[%s4927_s0 + $0xb8] sm:$0xff] }
 0x6d7   :  { %v1996_v4 = vpop.f32.mrf.mxu0  ;;  %v2037_v10 = vpop.f32.mrf.mxu1 }
 0x6d8   :  { %v2128_v14 = vadd.f32 %v2037_v10, %v1956_v5  ;;  %v2126_v35 = vadd.f32 %v1996_v4, %v1954_v47 }
 0x6d9   :  { %v1998_v57 = vpop.f32.mrf.mxu0  ;;  %v2039_v46 = vpop.f32.mrf.mxu1 }
 0x6da   :  { %v2129_v8 = vadd.f32 %v2039_v46, %v1957_v62  ;;  %v2142_v2 = vmul.f32 0.5, %v2128_v14 }
 0x6db   :  { %v2000_v12 = vpop.f32.mrf.mxu0  ;;  %v2041_v54 = vpop.f32.mrf.mxu1 }
 0x6dc   :  { %v2127_v12 = vadd.f32 %v1998_v57, %v1955_v61  ;;  %v2134_v54 = vmul.f32 0.5, %v2126_v35  ;;  %2938 = vtanh.f32 %v2142_v2  ;;  %v1960_v2 = vunpack.c.l.bf16 %v2814_v1 }
 0x6dd   :  { %v2001_v6 = vpop.f32.mrf.mxu0  ;;  %v2042_v28 = vpop.f32.mrf.mxu1  ;;  %v1961_v57 = vunpack.c.h.bf16 %v2814_v1 }
 0x6de   :  { %v2143_v6 = vmul.f32 0.5, %v2129_v8  ;;  %v2135_v28 = vmul.f32 0.5, %v2127_v12  ;;  %2940 = vtanh.f32 %v2134_v54 }
 0x6e0   :  { %2942 = vtanh.f32 %v2143_v6 }
 0x6e1   :  { %2944 = vtanh.f32 %v2135_v28 }
 0x6e9   :  { %v2939_v62 = vpop.eup %2938 }
 0x6ea   :  { %v2146_v28 = vadd.f32 1.0, %v2939_v62 }
 0x6eb   :  { %v2941_v12 = vpop.eup %2940 }
 0x6ec   :  { %v2138_v25 = vadd.f32 1.0, %v2941_v12 }
 0x6ed   :  { %v2943_v6 = vpop.eup %2942 }
 0x6ee   :  { %v2945_v11 = vpop.eup %2944 }
 0x6ef   :  { %v2139_v31 = vadd.f32 1.0, %v2945_v11 }
 0x717   :  { %v2078_v23 = vpop.f32.mrf.mxu0  ;;  %v2119_v47 = vpop.f32.mrf.mxu1 }
 0x718   :  { %v2130_v61 = vadd.f32 %v2078_v23, %v1958_v26  ;;  %v2132_v33 = vadd.f32 %v2119_v47, %v1960_v2  ;;  %v2147_v23 = vadd.f32 1.0, %v2943_v6  ;;  %v2141_v47 = vmul.f32 0.5, %v2139_v31 }
 0x719   :  { %v2080_v35 = vpop.f32.mrf.mxu0  ;;  %v2121_v8 = vpop.f32.mrf.mxu1 }
 0x71a   :  { %2946 = vtanh.f32 %v2130_v61  ;;  %v2131_v14 = vadd.f32 %v2080_v35, %v1959_v16  ;;  %v2133_v54 = vadd.f32 %v2121_v8, %v1961_v57  ;;  %v2152_v26 = vmul.f32 0.5, %v2132_v33 }
 0x71b   :  { %v2082_v4 = vpop.f32.mrf.mxu0  ;;  %v2123_v46 = vpop.f32.mrf.mxu1  ;;  %v2148_v61 = vmul.f32 0.5, %v2146_v28  ;;  %v2140_v16 = vmul.f32 0.5, %v2138_v25  ;;  %v2149_v35 = vmul.f32 0.5, %v2147_v23  ;;  %v5806_v23 = vld [vmem:[#allocation105_spill] sm:$0xff] }
 0x71c   :  { %2948 = vtanh.f32 %v2131_v14  ;;  %v2153_v15 = vmul.f32 0.5, %v2133_v54 }
 0x71d   :  { %v2083_v5 = vpop.f32.mrf.mxu0  ;;  %v2124_v10 = vpop.f32.mrf.mxu1  ;;  %2950 = vtanh.f32 %v2152_v26  ;;  %v2160_v14 = vmul.f32 %v2148_v61, %v4505_v19  ;;  %v2161_v57 = vmul.f32 %v2149_v35, %v4509_v13  ;;  %v5805_v26 = vld [vmem:[#allocation106_spill] sm:$0xff]  ;;  %v5807_v61 = vld [vmem:[#allocation107_spill] sm:$0xff]  ;;  %v5810_v35 = vld [vmem:[#allocation109_spill] sm:$0xff] }
 0x71e   :  { %2952 = vtanh.f32 %v2153_v15 }
 0x727   :  { %v2947_v1 = vpop.eup %2946 }
 0x728   :  { %v2162_v4 = vmul.f32 %v2947_v1, %v2140_v16  ;;  %v5808_v16 = vld [vmem:[#allocation108_spill] sm:$0xff]  ;;  %v5809_v1 = vld [vmem:[#allocation110_spill] sm:$0xff] }
 0x729   :  { %v2949_v2 = vpop.eup %2948 }
 0x72a   :  { %v4662_v8 = vadd.f32 %v2162_v4, %v2160_v14  ;;  %v2163_v46 = vmul.f32 %v2949_v2, %v2141_v47  ;;  %v2951_v25 = vpop.eup %2950  ;;  %v5811_v14 = vld [vmem:[#allocation111_spill] sm:$0xff]  ;;  %v5812_v4 = vld [vmem:[#allocation112_spill] sm:$0xff]  ;;  %v5813_v47 = vld [vmem:[#allocation114_spill] sm:$0xff] }
 0x72b   :  { %v2953_v11 = vpop.eup %2952  ;;  %v2156_v5 = vadd.f32 1.0, %v2951_v25  ;;  %v5814_v2 = vld [vmem:[#allocation113_spill] sm:$0xff]  ;;  %v5817_v25 = vld [vmem:[#allocation118_spill] sm:$0xff] }
 0x72c   :  { %2954 = vtanh.f32 %v4662_v8  ;;  %v4666_v62 = vadd.f32 %v2163_v46, %v2161_v57  ;;  %v2157_v15 = vadd.f32 1.0, %v2953_v11  ;;  %v5815_v57 = vld [vmem:[#allocation115_spill] sm:$0xff]  ;;  %v5816_v46 = vld [vmem:[#allocation116_spill] sm:$0xff]  ;;  %v5818_v11 = vld [vmem:[#allocation117_spill] sm:$0xff] }
 0x72d   :  { %v2158_v19 = vmul.f32 0.5, %v2156_v5  ;;  %v5819_v5 = vld [vmem:[#allocation119_spill] sm:$0xff] }
 0x72e   :  { %2956 = vtanh.f32 %v4666_v62  ;;  %v2159_v33 = vmul.f32 0.5, %v2157_v15  ;;  %v5820_v15 = vld [vmem:[#allocation120_spill] sm:$0xff] }
 0x739   :  { %v2955_v10 = vpop.eup %2954 }
 0x73a   :  { %v2168_v12 = vmul.f32 %v2955_v10, %v2158_v19  ;;  %v5821_v10 = vld [vmem:[#allocation122_spill] sm:$0xff]  ;;  %v5822_v19 = vld [vmem:[#allocation121_spill] sm:$0xff] }
 0x73b   :  { %v2957_v31 = vpop.eup %2956 }
 0x73c   :  { %v2169_v54 = vmul.f32 %v2957_v31, %v2159_v33  ;;  %v4669_v13 = vpack.c.bf16 %v2168_v12, %v2168_v12  ;;  %v5823_v33 = vld [vmem:[#allocation123_spill] sm:$0xff]  ;;  %v5824_v31 = vld [vmem:[#allocation124_spill] sm:$0xff] }
 0x73e   :  { %v2834_v6 = vpack.c.bf16 %v2169_v54, %v2168_v12  ;;  %v2171_v28 = vpack.c.bf16 %v2169_v54, %v2169_v54  ;;  %v5825_v12 = vld [vmem:[#allocation126_spill] sm:$0xff]  ;;  %v5826_v54 = vld [vmem:[#allocation125_spill] sm:$0xff] }
 0x740   :  { %2816 = vst [vmem:[%s4928_s2 + $0x28] sm:$0xff] %v2834_v6  ;;  %2225 = vmatprep.mubr.bf16.mxu0 %v2171_v28  ;;  %2266 = vmatprep.mubr.bf16.mxu1 %v2171_v28  ;;  %v5827_v6 = vld [vmem:[#allocation127_spill] sm:$0xff] }
 0x741   :  { %2226 = vmatmul.mubr.bf16.vlgmr.msra.gmra.mxu0 %v4669_v13  ;;  %2267 = vmatmul.mubr.bf16.vlgmr.msra.gmra.mxu1 %v4669_v13 }
 0x742   :  { %2276 = vmatpush1.bf16.msra.mxu0 %v5353_v39  ;;  %2317 = vmatpush1.bf16.msra.mxu1 %v5354_v30 }
 0x743   :  { %2307 = vmatprep.mubr.bf16.mxu0 %v2171_v28  ;;  %2348 = vmatprep.mubr.bf16.mxu1 %v2171_v28  ;;  %v5828_v28 = vld [vmem:[#allocation128_spill] sm:$0xff] }
 0x744   :  { %2277 = vmatprep.subr.bf16.mxu0 %v5355_v50  ;;  %2318 = vmatprep.subr.bf16.mxu1 %v5356_v34 }
 0x746   :  { %2278 = vmatpush1.bf16.msra.mxu0 %v5357_v22  ;;  %2319 = vmatpush1.bf16.msra.mxu1 %v5358_v58 }
 0x747   :  { %2279 = vmatprep.subr.bf16.mxu0 %v5359_v18  ;;  %2320 = vmatprep.subr.bf16.mxu1 %v5360_v55 }
 0x74a   :  { %2280 = vmatpush1.bf16.msra.mxu0 %v5361_v63  ;;  %2321 = vmatpush1.bf16.msra.mxu1 %v5362_v7 }
 0x74b   :  { %2281 = vmatprep.subr.bf16.mxu0 %v5441_v29  ;;  %2322 = vmatprep.subr.bf16.mxu1 %v5442_v60 }
 0x74e   :  { %2282 = vmatpush1.bf16.msra.mxu0 %v5443_v36  ;;  %2323 = vmatpush1.bf16.msra.mxu1 %v5444_v27 }
 0x74f   :  { %2283 = vmatprep.subr.bf16.mxu0 %v5445_v44  ;;  %2324 = vmatprep.subr.bf16.mxu1 %v5446_v37 }
 0x752   :  { %2284 = vmatpush1.bf16.msra.mxu0 %v5447_v45  ;;  %2325 = vmatpush1.bf16.msra.mxu1 %v5448_v52 }
 0x753   :  { %2285 = vmatprep.subr.bf16.mxu0 %v5449_v48  ;;  %2326 = vmatprep.subr.bf16.mxu1 %v5450_v32 }
 0x756   :  { %2286 = vmatpush1.bf16.msra.mxu0 %v5451_v51  ;;  %2327 = vmatpush1.bf16.msra.mxu1 %v5452_v53 }
 0x757   :  { %2287 = vmatprep.subr.bf16.mxu0 %v5453_v20  ;;  %2328 = vmatprep.subr.bf16.mxu1 %v5532_v49 }
 0x75a   :  { %2288 = vmatpush1.bf16.msra.mxu0 %v5533_v42  ;;  %2329 = vmatpush1.bf16.msra.mxu1 %v5534_v9 }
 0x75b   :  { %2289 = vmatprep.subr.bf16.mxu0 %v5535_v38  ;;  %2330 = vmatprep.subr.bf16.mxu1 %v5536_v3 }
 0x75e   :  { %2290 = vmatpush1.bf16.msra.mxu0 %v5537_v17  ;;  %2331 = vmatpush1.bf16.msra.mxu1 %v5538_v41 }
 0x75f   :  { %2291 = vmatprep.subr.bf16.mxu0 %v5461_v43  ;;  %2332 = vmatprep.subr.bf16.mxu1 %v5462_v56 }
 0x762   :  { %2292 = vmatpush2.bf16.msra.mxu0 %v5463_v40  ;;  %2333 = vmatpush2.bf16.msra.mxu1 %v5464_v59 }
 0x763   :  { %2293 = vmatprep.subr.bf16.mxu0 %v5465_v24  ;;  %2334 = vmatprep.subr.bf16.mxu1 %v5466_v0 }
 0x766   :  { %2294 = vmatpush2.bf16.msra.mxu0 %v5467_v21  ;;  %2335 = vmatpush2.bf16.msra.mxu1 %v5805_v26 }
 0x767   :  { %2295 = vmatprep.subr.bf16.mxu0 %v5806_v23  ;;  %2336 = vmatprep.subr.bf16.mxu1 %v5807_v61 }
 0x76a   :  { %2296 = vmatpush2.bf16.msra.mxu0 %v5808_v16  ;;  %2337 = vmatpush2.bf16.msra.mxu1 %v5809_v1 }
 0x76b   :  { %2297 = vmatprep.subr.bf16.mxu0 %v5810_v35  ;;  %2338 = vmatprep.subr.bf16.mxu1 %v5811_v14  ;;  %v2819_v14 = vld [vmem:[%s4927_s0 + $0xd0] sm:$0xff] }
 0x76c   :  { %v2189_v35 = vunpack.c.l.bf16 %v2819_v14  ;;  %v2190_v1 = vunpack.c.h.bf16 %v2819_v14 }
 0x76e   :  { %2298 = vmatpush2.bf16.msra.mxu0 %v5812_v4  ;;  %2339 = vmatpush2.bf16.msra.mxu1 %v5813_v47 }
 0x76f   :  { %2299 = vmatprep.subr.bf16.mxu0 %v5814_v2  ;;  %2340 = vmatprep.subr.bf16.mxu1 %v5815_v57 }
 0x772   :  { %2300 = vmatpush2.bf16.msra.mxu0 %v5816_v46  ;;  %2341 = vmatpush2.bf16.msra.mxu1 %v5817_v25 }
 0x773   :  { %2301 = vmatprep.subr.bf16.mxu0 %v5818_v11  ;;  %2342 = vmatprep.subr.bf16.mxu1 %v5819_v5  ;;  %v5829_v11 = vld [vmem:[#allocation129_spill] sm:$0xff]  ;;  %v5830_v5 = vld [vmem:[#allocation2_spill] sm:$0xff] }
 0x776   :  { %2302 = vmatpush2.bf16.msra.mxu0 %v5820_v15  ;;  %2343 = vmatpush2.bf16.msra.mxu1 %v5821_v10  ;;  %v5831_v15 = vld [vmem:[#allocation5_spill] sm:$0xff] }
 0x777   :  { %2303 = vmatprep.subr.bf16.mxu0 %v5822_v19  ;;  %2344 = vmatprep.subr.bf16.mxu1 %v5823_v33  ;;  %v5832_v33 = vld [vmem:[#allocation3_spill] sm:$0xff]  ;;  %v5841_v19 = vld [vmem:[#allocation14_spill] sm:$0xff] }
 0x77a   :  { %2304 = vmatpush2.bf16.msra.mxu0 %v5824_v31  ;;  %2345 = vmatpush2.bf16.msra.mxu1 %v5825_v12  ;;  %v5833_v31 = vld [vmem:[#allocation6_spill] sm:$0xff]  ;;  %v5834_v12 = vld [vmem:[#allocation4_spill] sm:$0xff] }
 0x77b   :  { %2305 = vmatprep.subr.bf16.mxu0 %v5826_v54  ;;  %2346 = vmatprep.subr.bf16.mxu1 %v5827_v6  ;;  %v5835_v54 = vld [vmem:[#allocation8_spill] sm:$0xff]  ;;  %v5836_v6 = vld [vmem:[#allocation7_spill] sm:$0xff] }
 0x77e   :  { %2306 = vmatpush2.bf16.msra.mxu0 %v5828_v28  ;;  %2347 = vmatpush2.bf16.msra.mxu1 %v5829_v11  ;;  %v5837_v28 = vld [vmem:[#allocation10_spill] sm:$0xff]  ;;  %v5838_v11 = vld [vmem:[#allocation9_spill] sm:$0xff] }
 0x77f   :  { %2424 = vmatprep.subr.bf16.mxu0 %v5830_v5  ;;  %2465 = vmatprep.subr.bf16.mxu1 %v5831_v15  ;;  %v5839_v5 = vld [vmem:[#allocation11_spill] sm:$0xff]  ;;  %v5840_v15 = vld [vmem:[#allocation12_spill] sm:$0xff] }
 0x781   :  { %2308 = vmatmul.mubr.bf16.vlgmr.msra.gmra.mxu0 %v4669_v13  ;;  %2349 = vmatmul.mubr.bf16.vlgmr.msra.gmra.mxu1 %v4669_v13  ;;  %v5842_v13 = vld [vmem:[#allocation13_spill] sm:$0xff] }
 0x782   :  { %2425 = vmatpush1.bf16.msra.mxu0 %v5832_v33  ;;  %2466 = vmatpush1.bf16.msra.mxu1 %v5833_v31  ;;  %v5843_v33 = vld [vmem:[#allocation15_spill] sm:$0xff]  ;;  %v5844_v31 = vld [vmem:[#allocation16_spill] sm:$0xff] }
 0x783   :  { %2426 = vmatprep.subr.bf16.mxu0 %v5834_v12  ;;  %2467 = vmatprep.subr.bf16.mxu1 %v5835_v54  ;;  %v5845_v12 = vld [vmem:[#allocation18_spill] sm:$0xff]  ;;  %v5846_v54 = vld [vmem:[#allocation17_spill] sm:$0xff] }
 0x786   :  { %2427 = vmatpush1.bf16.msra.mxu0 %v5836_v6  ;;  %2468 = vmatpush1.bf16.msra.mxu1 %v5837_v28  ;;  %v5847_v6 = vld [vmem:[#allocation19_spill] sm:$0xff]  ;;  %v5848_v28 = vld [vmem:[#allocation20_spill] sm:$0xff] }
 0x787   :  { %2428 = vmatprep.subr.bf16.mxu0 %v5838_v11  ;;  %2469 = vmatprep.subr.bf16.mxu1 %v5839_v5  ;;  %v5849_v11 = vld [vmem:[#allocation22_spill] sm:$0xff]  ;;  %v5850_v5 = vld [vmem:[#allocation21_spill] sm:$0xff] }
 0x78a   :  { %2429 = vmatpush1.bf16.msra.mxu0 %v5840_v15  ;;  %2470 = vmatpush1.bf16.msra.mxu1 %v5841_v19  ;;  %v5851_v15 = vld [vmem:[#allocation23_spill] sm:$0xff]  ;;  %v5852_v19 = vld [vmem:[#allocation24_spill] sm:$0xff] }
 0x78b   :  { %2430 = vmatprep.subr.bf16.mxu0 %v5842_v13  ;;  %2471 = vmatprep.subr.bf16.mxu1 %v5843_v33  ;;  %v5853_v13 = vld [vmem:[#allocation26_spill] sm:$0xff]  ;;  %v5854_v33 = vld [vmem:[#allocation25_spill] sm:$0xff] }
 0x78e   :  { %2431 = vmatpush1.bf16.msra.mxu0 %v5844_v31  ;;  %2472 = vmatpush1.bf16.msra.mxu1 %v5845_v12  ;;  %v5855_v31 = vld [vmem:[#allocation27_spill] sm:$0xff]  ;;  %v5856_v12 = vld [vmem:[#allocation28_spill] sm:$0xff] }
 0x78f   :  { %2432 = vmatprep.subr.bf16.mxu0 %v5846_v54  ;;  %2473 = vmatprep.subr.bf16.mxu1 %v5847_v6  ;;  %v5857_v54 = vld [vmem:[#allocation30_spill] sm:$0xff]  ;;  %v5858_v6 = vld [vmem:[#allocation29_spill] sm:$0xff] }
 0x792   :  { %2433 = vmatpush1.bf16.msra.mxu0 %v5848_v28  ;;  %2474 = vmatpush1.bf16.msra.mxu1 %v5849_v11  ;;  %v5859_v28 = vld [vmem:[#allocation31_spill] sm:$0xff]  ;;  %v5860_v11 = vld [vmem:[#allocation32_spill] sm:$0xff] }
 0x793   :  { %2434 = vmatprep.subr.bf16.mxu0 %v5850_v5  ;;  %2475 = vmatprep.subr.bf16.mxu1 %v5851_v15  ;;  %v5861_v5 = vld [vmem:[#allocation34_spill] sm:$0xff]  ;;  %v5862_v15 = vld [vmem:[#allocation33_spill] sm:$0xff] }
 0x796   :  { %2435 = vmatpush1.bf16.msra.mxu0 %v5852_v19  ;;  %2476 = vmatpush1.bf16.msra.mxu1 %v5853_v13  ;;  %v5863_v19 = vld [vmem:[#allocation35_spill] sm:$0xff]  ;;  %v5864_v13 = vld [vmem:[#allocation36_spill] sm:$0xff] }
 0x797   :  { %2436 = vmatprep.subr.bf16.mxu0 %v5854_v33  ;;  %2477 = vmatprep.subr.bf16.mxu1 %v5855_v31  ;;  %v5865_v33 = vld [vmem:[#allocation38_spill] sm:$0xff]  ;;  %v5866_v31 = vld [vmem:[#allocation37_spill] sm:$0xff] }
 0x79a   :  { %2437 = vmatpush1.bf16.msra.mxu0 %v5856_v12  ;;  %2478 = vmatpush1.bf16.msra.mxu1 %v5857_v54  ;;  %v5867_v12 = vld [vmem:[#allocation39_spill] sm:$0xff]  ;;  %v5868_v54 = vld [vmem:[#allocation40_spill] sm:$0xff] }
 0x79b   :  { %2438 = vmatprep.subr.bf16.mxu0 %v5858_v6  ;;  %2479 = vmatprep.subr.bf16.mxu1 %v5859_v28  ;;  %v5869_v6 = vld [vmem:[#allocation42_spill] sm:$0xff]  ;;  %v5870_v28 = vld [vmem:[#allocation41_spill] sm:$0xff] }
 0x79e   :  { %2439 = vmatpush1.bf16.msra.mxu0 %v5860_v11  ;;  %2480 = vmatpush1.bf16.msra.mxu1 %v5861_v5  ;;  %v5871_v11 = vld [vmem:[#allocation43_spill] sm:$0xff]  ;;  %v5872_v5 = vld [vmem:[#allocation44_spill] sm:$0xff] }
 0x79f   :  { %2440 = vmatprep.subr.bf16.mxu0 %v5862_v15  ;;  %2481 = vmatprep.subr.bf16.mxu1 %v5863_v19  ;;  %v5873_v15 = vld [vmem:[#allocation46_spill] sm:$0xff]  ;;  %v5874_v19 = vld [vmem:[#allocation45_spill] sm:$0xff] }
 0x7a2   :  { %2441 = vmatpush2.bf16.msra.mxu0 %v5864_v13  ;;  %2482 = vmatpush2.bf16.msra.mxu1 %v5865_v33  ;;  %v5875_v13 = vld [vmem:[#allocation47_spill] sm:$0xff]  ;;  %v5876_v33 = vld [vmem:[#allocation48_spill] sm:$0xff] }
 0x7a3   :  { %2442 = vmatprep.subr.bf16.mxu0 %v5866_v31  ;;  %2483 = vmatprep.subr.bf16.mxu1 %v5867_v12  ;;  %v5877_v31 = vld [vmem:[#allocation50_spill] sm:$0xff]  ;;  %v5878_v12 = vld [vmem:[#allocation49_spill] sm:$0xff] }
 0x7a6   :  { %2443 = vmatpush2.bf16.msra.mxu0 %v5868_v54  ;;  %2484 = vmatpush2.bf16.msra.mxu1 %v5869_v6  ;;  %v5879_v54 = vld [vmem:[#allocation51_spill] sm:$0xff]  ;;  %v5880_v6 = vld [vmem:[#allocation52_spill] sm:$0xff] }
 0x7a7   :  { %2444 = vmatprep.subr.bf16.mxu0 %v5870_v28  ;;  %2485 = vmatprep.subr.bf16.mxu1 %v5871_v11  ;;  %v5881_v28 = vld [vmem:[#allocation54_spill] sm:$0xff]  ;;  %v5882_v11 = vld [vmem:[#allocation53_spill] sm:$0xff] }
 0x7aa   :  { %2445 = vmatpush2.bf16.msra.mxu0 %v5872_v5  ;;  %2486 = vmatpush2.bf16.msra.mxu1 %v5873_v15  ;;  %v5883_v5 = vld [vmem:[#allocation55_spill] sm:$0xff]  ;;  %v5884_v15 = vld [vmem:[#allocation56_spill] sm:$0xff] }
 0x7ab   :  { %2446 = vmatprep.subr.bf16.mxu0 %v5874_v19  ;;  %2487 = vmatprep.subr.bf16.mxu1 %v5875_v13  ;;  %v5885_v19 = vld [vmem:[#allocation58_spill] sm:$0xff]  ;;  %v5886_v13 = vld [vmem:[#allocation57_spill] sm:$0xff] }
 0x7ae   :  { %2447 = vmatpush2.bf16.msra.mxu0 %v5876_v33  ;;  %2488 = vmatpush2.bf16.msra.mxu1 %v5877_v31  ;;  %v5887_v33 = vld [vmem:[#allocation59_spill] sm:$0xff]  ;;  %v5888_v31 = vld [vmem:[#allocation60_spill] sm:$0xff] }
 0x7af   :  { %2448 = vmatprep.subr.bf16.mxu0 %v5878_v12  ;;  %2489 = vmatprep.subr.bf16.mxu1 %v5879_v54  ;;  %v5889_v12 = vld [vmem:[#allocation62_spill] sm:$0xff]  ;;  %v5890_v54 = vld [vmem:[#allocation61_spill] sm:$0xff] }
 0x7b2   :  { %2449 = vmatpush2.bf16.msra.mxu0 %v5880_v6  ;;  %2490 = vmatpush2.bf16.msra.mxu1 %v5881_v28  ;;  %v5891_v6 = vld [vmem:[#allocation63_spill] sm:$0xff]  ;;  %v5892_v28 = vld [vmem:[#allocation64_spill] sm:$0xff] }
 0x7b3   :  { %2450 = vmatprep.subr.bf16.mxu0 %v5882_v11  ;;  %2491 = vmatprep.subr.bf16.mxu1 %v5883_v5  ;;  %v5893_v11 = vld [vmem:[#allocation66_spill] sm:$0xff]  ;;  %v5894_v5 = vld [vmem:[#allocation65_spill] sm:$0xff] }
 0x7b6   :  { %2451 = vmatpush2.bf16.msra.mxu0 %v5884_v15  ;;  %2492 = vmatpush2.bf16.msra.mxu1 %v5885_v19  ;;  %v5895_v15 = vld [vmem:[#allocation67_spill] sm:$0xff] }
 0x7b7   :  { %2452 = vmatprep.subr.bf16.mxu0 %v5886_v13  ;;  %2493 = vmatprep.subr.bf16.mxu1 %v5887_v33 }
 0x7ba   :  { %2453 = vmatpush2.bf16.msra.mxu0 %v5888_v31  ;;  %2494 = vmatpush2.bf16.msra.mxu1 %v5889_v12 }
 0x7bb   :  { %2454 = vmatprep.subr.bf16.mxu0 %v5890_v54  ;;  %2495 = vmatprep.subr.bf16.mxu1 %v5891_v6  ;;  %v2818_v54 = vld [vmem:[%s4927_s0 + $0xc8] sm:$0xff]  ;;  %v2817_v6 = vld [vmem:[%s4927_s0 + $0xc0] sm:$0xff] }
 0x7bc   :  { %v2186_v57 = vunpack.c.h.bf16 %v2817_v6 }
 0x7be   :  { %2455 = vmatpush2.bf16.msra.mxu0 %v5892_v28  ;;  %2496 = vmatpush2.bf16.msra.mxu1 %v5893_v11  ;;  %v2187_v28 = vunpack.c.l.bf16 %v2818_v54  ;;  %v2185_v11 = vunpack.c.l.bf16 %v2817_v6 }
 0x7bf   :  { %2506 = vmatprep.subr.bf16.mxu0 %v5894_v5  ;;  %2547 = vmatprep.subr.bf16.mxu1 %v5895_v15  ;;  %v2188_v5 = vunpack.c.h.bf16 %v2818_v54 }
 0x801   :  { %v2227_v19 = vpop.f32.mrf.mxu0  ;;  %v2268_v13 = vpop.f32.mrf.mxu1 }
 0x802   :  { %v2359_v15 = vadd.f32 %v2268_v13, %v2187_v28  ;;  %v2357_v2 = vadd.f32 %v2227_v19, %v2185_v11  ;;  %v2820_v19 = vld [vmem:[%s4927_s0 + $0xd8] sm:$0xff] }
 0x803   :  { %v2229_v10 = vpop.f32.mrf.mxu0  ;;  %v2270_v33 = vpop.f32.mrf.mxu1 }
 0x804   :  { %v2360_v47 = vadd.f32 %v2270_v33, %v2188_v5  ;;  %v2373_v4 = vmul.f32 0.5, %v2359_v15  ;;  %v2192_v33 = vunpack.c.h.bf16 %v2820_v19 }
 0x805   :  { %v2231_v25 = vpop.f32.mrf.mxu0  ;;  %v2272_v31 = vpop.f32.mrf.mxu1 }
 0x806   :  { %v2358_v25 = vadd.f32 %v2229_v10, %v2186_v57  ;;  %v2365_v31 = vmul.f32 0.5, %v2357_v2  ;;  %2958 = vtanh.f32 %v2373_v4  ;;  %v2191_v4 = vunpack.c.l.bf16 %v2820_v19 }
 0x807   :  { %v2232_v46 = vpop.f32.mrf.mxu0  ;;  %v2273_v12 = vpop.f32.mrf.mxu1 }
 0x808   :  { %v2374_v46 = vmul.f32 0.5, %v2360_v47  ;;  %v2366_v12 = vmul.f32 0.5, %v2358_v25  ;;  %2960 = vtanh.f32 %v2365_v31 }
 0x80a   :  { %2962 = vtanh.f32 %v2374_v46 }
 0x80b   :  { %2964 = vtanh.f32 %v2366_v12 }
 0x813   :  { %v2959_v11 = vpop.eup %2958 }
 0x814   :  { %v2377_v12 = vadd.f32 1.0, %v2959_v11 }
 0x815   :  { %v2961_v25 = vpop.eup %2960 }
 0x816   :  { %v2369_v61 = vadd.f32 1.0, %v2961_v25 }
 0x817   :  { %v2963_v46 = vpop.eup %2962 }
 0x818   :  { %v2965_v16 = vpop.eup %2964 }
 0x819   :  { %v2370_v26 = vadd.f32 1.0, %v2965_v16 }
 0x841   :  { %v2309_v54 = vpop.f32.mrf.mxu0  ;;  %v2350_v13 = vpop.f32.mrf.mxu1 }
 0x842   :  { %v2361_v57 = vadd.f32 %v2309_v54, %v2189_v35  ;;  %v2363_v14 = vadd.f32 %v2350_v13, %v2191_v4  ;;  %v2378_v54 = vadd.f32 1.0, %v2963_v46  ;;  %v2372_v13 = vmul.f32 0.5, %v2370_v26 }
 0x843   :  { %v2311_v2 = vpop.f32.mrf.mxu0  ;;  %v2352_v47 = vpop.f32.mrf.mxu1 }
 0x844   :  { %2966 = vtanh.f32 %v2361_v57  ;;  %v2362_v10 = vadd.f32 %v2311_v2, %v2190_v1  ;;  %v2364_v31 = vadd.f32 %v2352_v47, %v2192_v33  ;;  %v2383_v35 = vmul.f32 0.5, %v2363_v14 }
 0x845   :  { %v2313_v6 = vpop.f32.mrf.mxu0  ;;  %v2354_v28 = vpop.f32.mrf.mxu1  ;;  %v2379_v57 = vmul.f32 0.5, %v2377_v12  ;;  %v2371_v1 = vmul.f32 0.5, %v2369_v61  ;;  %v2380_v2 = vmul.f32 0.5, %v2378_v54 }
 0x846   :  { %2968 = vtanh.f32 %v2362_v10  ;;  %v2384_v23 = vmul.f32 0.5, %v2364_v31 }
 0x847   :  { %v2314_v5 = vpop.f32.mrf.mxu0  ;;  %v2355_v15 = vpop.f32.mrf.mxu1  ;;  %2970 = vtanh.f32 %v2383_v35  ;;  %v2391_v10 = vmul.f32 %v2379_v57, %v4662_v8  ;;  %v2392_v33 = vmul.f32 %v2380_v2, %v4666_v62 }
 0x848   :  { %2972 = vtanh.f32 %v2384_v23 }
 0x851   :  { %v2967_v19 = vpop.eup %2966 }
 0x852   :  { %v2393_v6 = vmul.f32 %v2967_v19, %v2371_v1 }
 0x853   :  { %v2969_v4 = vpop.eup %2968 }
 0x854   :  { %v4819_v47 = vadd.f32 %v2393_v6, %v2391_v10  ;;  %v2394_v28 = vmul.f32 %v2969_v4, %v2372_v13  ;;  %v2971_v61 = vpop.eup %2970 }
 0x855   :  { %v2973_v16 = vpop.eup %2972  ;;  %v2387_v5 = vadd.f32 1.0, %v2971_v61  ;;  %v2826_v61 = vld [vmem:[%s4927_s0 + $0xf8] sm:$0xff] }
 0x856   :  { %2974 = vtanh.f32 %v4819_v47  ;;  %v4823_v11 = vadd.f32 %v2394_v28, %v2392_v33  ;;  %v2388_v23 = vadd.f32 1.0, %v2973_v16  ;;  %v2825_v33 = vld [vmem:[%s4927_s0 + $0xf0] sm:$0xff] }
 0x857   :  { %v2389_v8 = vmul.f32 0.5, %v2387_v5  ;;  %v2420_v28 = vunpack.c.l.bf16 %v2825_v33  ;;  %v2421_v16 = vunpack.c.h.bf16 %v2825_v33 }
 0x858   :  { %2976 = vtanh.f32 %v4823_v11  ;;  %v2390_v14 = vmul.f32 0.5, %v2388_v23 }
 0x863   :  { %v2975_v15 = vpop.eup %2974 }
 0x864   :  { %v2399_v25 = vmul.f32 %v2975_v15, %v2389_v8  ;;  %v2422_v8 = vunpack.c.l.bf16 %v2826_v61 }
 0x865   :  { %v2977_v26 = vpop.eup %2976 }
 0x866   :  { %v2400_v31 = vmul.f32 %v2977_v26, %v2390_v14  ;;  %v4826_v62 = vpack.c.bf16 %v2399_v25, %v2399_v25 }
 0x868   :  { %v2835_v46 = vpack.c.bf16 %v2400_v31, %v2399_v25  ;;  %v2402_v12 = vpack.c.bf16 %v2400_v31, %v2400_v31  ;;  %v2423_v31 = vunpack.c.h.bf16 %v2826_v61 }
 0x86a   :  { %2822 = vst [vmem:[%s4928_s2 + $0x30] sm:$0xff] %v2835_v46  ;;  %2456 = vmatprep.mubr.bf16.mxu0 %v2402_v12  ;;  %2497 = vmatprep.mubr.bf16.mxu1 %v2402_v12 }
 0x86b   :  { %2457 = vmatmul.mubr.bf16.vlgmr.msra.gmra.mxu0 %v4826_v62  ;;  %2498 = vmatmul.mubr.bf16.vlgmr.msra.gmra.mxu1 %v4826_v62 }
 0x86c   :  { %2507 = vmatpush1.bf16.msra.mxu0 %v5353_v39  ;;  %2548 = vmatpush1.bf16.msra.mxu1 %v5354_v30  ;;  %v5896_v39 = vld [vmem:[#allocation106_spill] sm:$0xff]  ;;  %v5897_v30 = vld [vmem:[#allocation105_spill] sm:$0xff] }
 0x86d   :  { %2538 = vmatprep.mubr.bf16.mxu0 %v2402_v12  ;;  %2579 = vmatprep.mubr.bf16.mxu1 %v2402_v12 }
 0x86e   :  { %2508 = vmatprep.subr.bf16.mxu0 %v5355_v50  ;;  %2549 = vmatprep.subr.bf16.mxu1 %v5356_v34  ;;  %v5898_v50 = vld [vmem:[#allocation107_spill] sm:$0xff]  ;;  %v5899_v34 = vld [vmem:[#allocation108_spill] sm:$0xff] }
 0x870   :  { %2509 = vmatpush1.bf16.msra.mxu0 %v5357_v22  ;;  %2550 = vmatpush1.bf16.msra.mxu1 %v5358_v58  ;;  %v5900_v22 = vld [vmem:[#allocation110_spill] sm:$0xff]  ;;  %v5901_v58 = vld [vmem:[#allocation109_spill] sm:$0xff] }
 0x871   :  { %2510 = vmatprep.subr.bf16.mxu0 %v5359_v18  ;;  %2551 = vmatprep.subr.bf16.mxu1 %v5360_v55  ;;  %v5902_v18 = vld [vmem:[#allocation111_spill] sm:$0xff]  ;;  %v5903_v55 = vld [vmem:[#allocation112_spill] sm:$0xff] }
 0x874   :  { %2511 = vmatpush1.bf16.msra.mxu0 %v5361_v63  ;;  %2552 = vmatpush1.bf16.msra.mxu1 %v5362_v7  ;;  %v5904_v63 = vld [vmem:[#allocation114_spill] sm:$0xff]  ;;  %v5905_v7 = vld [vmem:[#allocation113_spill] sm:$0xff] }
 0x875   :  { %2512 = vmatprep.subr.bf16.mxu0 %v5441_v29  ;;  %2553 = vmatprep.subr.bf16.mxu1 %v5442_v60  ;;  %v5906_v29 = vld [vmem:[#allocation115_spill] sm:$0xff]  ;;  %v5907_v60 = vld [vmem:[#allocation116_spill] sm:$0xff] }
 0x878   :  { %2513 = vmatpush1.bf16.msra.mxu0 %v5443_v36  ;;  %2554 = vmatpush1.bf16.msra.mxu1 %v5444_v27  ;;  %v5908_v36 = vld [vmem:[#allocation118_spill] sm:$0xff]  ;;  %v5909_v27 = vld [vmem:[#allocation117_spill] sm:$0xff] }
 0x879   :  { %2514 = vmatprep.subr.bf16.mxu0 %v5445_v44  ;;  %2555 = vmatprep.subr.bf16.mxu1 %v5446_v37  ;;  %v5910_v44 = vld [vmem:[#allocation119_spill] sm:$0xff]  ;;  %v5911_v37 = vld [vmem:[#allocation120_spill] sm:$0xff] }
 0x87c   :  { %2515 = vmatpush1.bf16.msra.mxu0 %v5447_v45  ;;  %2556 = vmatpush1.bf16.msra.mxu1 %v5448_v52  ;;  %v5912_v45 = vld [vmem:[#allocation122_spill] sm:$0xff]  ;;  %v5913_v52 = vld [vmem:[#allocation121_spill] sm:$0xff] }
 0x87d   :  { %2516 = vmatprep.subr.bf16.mxu0 %v5449_v48  ;;  %2557 = vmatprep.subr.bf16.mxu1 %v5450_v32  ;;  %v5914_v48 = vld [vmem:[#allocation123_spill] sm:$0xff]  ;;  %v5915_v32 = vld [vmem:[#allocation124_spill] sm:$0xff] }
 0x880   :  { %2517 = vmatpush1.bf16.msra.mxu0 %v5451_v51  ;;  %2558 = vmatpush1.bf16.msra.mxu1 %v5452_v53  ;;  %v5916_v51 = vld [vmem:[#allocation126_spill] sm:$0xff]  ;;  %v5917_v53 = vld [vmem:[#allocation125_spill] sm:$0xff] }
 0x881   :  { %2518 = vmatprep.subr.bf16.mxu0 %v5453_v20  ;;  %2559 = vmatprep.subr.bf16.mxu1 %v5532_v49  ;;  %v5918_v20 = vld [vmem:[#allocation127_spill] sm:$0xff] }
 0x884   :  { %2519 = vmatpush1.bf16.msra.mxu0 %v5533_v42  ;;  %2560 = vmatpush1.bf16.msra.mxu1 %v5534_v9 }
 0x885   :  { %2520 = vmatprep.subr.bf16.mxu0 %v5535_v38  ;;  %2561 = vmatprep.subr.bf16.mxu1 %v5536_v3  ;;  %v2824_v38 = vld [vmem:[%s4927_s0 + $0xe8] sm:$0xff]  ;;  %v2823_v3 = vld [vmem:[%s4927_s0 + $0xe0] sm:$0xff] }
 0x886   :  { %v2419_v35 = vunpack.c.h.bf16 %v2824_v38  ;;  %v2417_v57 = vunpack.c.h.bf16 %v2823_v3 }
 0x888   :  { %2521 = vmatpush1.bf16.msra.mxu0 %v5537_v17  ;;  %2562 = vmatpush1.bf16.msra.mxu1 %v5538_v41  ;;  %v2418_v17 = vunpack.c.l.bf16 %v2824_v38  ;;  %v2416_v41 = vunpack.c.l.bf16 %v2823_v3 }
 0x889   :  { %2522 = vmatprep.subr.bf16.mxu0 %v5461_v43  ;;  %2563 = vmatprep.subr.bf16.mxu1 %v5462_v56 }
 0x88c   :  { %2523 = vmatpush2.bf16.msra.mxu0 %v5463_v40  ;;  %2564 = vmatpush2.bf16.msra.mxu1 %v5464_v59 }
 0x88d   :  { %2524 = vmatprep.subr.bf16.mxu0 %v5465_v24  ;;  %2565 = vmatprep.subr.bf16.mxu1 %v5466_v0  ;;  %v5919_v24 = vld [vmem:[#allocation128_spill] sm:$0xff]  ;;  %v5920_v0 = vld [vmem:[#allocation129_spill] sm:$0xff] }
 0x890   :  { %2525 = vmatpush2.bf16.msra.mxu0 %v5467_v21  ;;  %2566 = vmatpush2.bf16.msra.mxu1 %v5896_v39 }
 0x891   :  { %2526 = vmatprep.subr.bf16.mxu0 %v5897_v30  ;;  %2567 = vmatprep.subr.bf16.mxu1 %v5898_v50 }
 0x894   :  { %2527 = vmatpush2.bf16.msra.mxu0 %v5899_v34  ;;  %2568 = vmatpush2.bf16.msra.mxu1 %v5900_v22 }
 0x895   :  { %2528 = vmatprep.subr.bf16.mxu0 %v5901_v58  ;;  %2569 = vmatprep.subr.bf16.mxu1 %v5902_v18 }
 0x898   :  { %2529 = vmatpush2.bf16.msra.mxu0 %v5903_v55  ;;  %2570 = vmatpush2.bf16.msra.mxu1 %v5904_v63 }
 0x899   :  { %2530 = vmatprep.subr.bf16.mxu0 %v5905_v7  ;;  %2571 = vmatprep.subr.bf16.mxu1 %v5906_v29 }
 0x89c   :  { %2531 = vmatpush2.bf16.msra.mxu0 %v5907_v60  ;;  %2572 = vmatpush2.bf16.msra.mxu1 %v5908_v36 }
 0x89d   :  { %2532 = vmatprep.subr.bf16.mxu0 %v5909_v27  ;;  %2573 = vmatprep.subr.bf16.mxu1 %v5910_v44 }
 0x8a0   :  { %2533 = vmatpush2.bf16.msra.mxu0 %v5911_v37  ;;  %2574 = vmatpush2.bf16.msra.mxu1 %v5912_v45 }
 0x8a1   :  { %2534 = vmatprep.subr.bf16.mxu0 %v5913_v52  ;;  %2575 = vmatprep.subr.bf16.mxu1 %v5914_v48 }
 0x8a4   :  { %2535 = vmatpush2.bf16.msra.mxu0 %v5915_v32  ;;  %2576 = vmatpush2.bf16.msra.mxu1 %v5916_v51 }
 0x8a5   :  { %2536 = vmatprep.subr.bf16.mxu0 %v5917_v53  ;;  %2577 = vmatprep.subr.bf16.mxu1 %v5918_v20 }
 0x8a8   :  { %2537 = vmatpush2.bf16.msra.mxu0 %v5919_v24  ;;  %2578 = vmatpush2.bf16.msra.mxu1 %v5920_v0 }
 0x8ab   :  { %2539 = vmatmul.mubr.bf16.vlgmr.msra.gmra.mxu0 %v4826_v62  ;;  %2580 = vmatmul.mubr.bf16.vlgmr.msra.gmra.mxu1 %v4826_v62 }
 0x92b   :  { %v2458_v21 = vpop.f32.mrf.mxu0  ;;  %v2499_v43 = vpop.f32.mrf.mxu1 }
 0x92c   :  { %v2590_v54 = vadd.f32 %v2499_v43, %v2418_v17  ;;  %v2588_v1 = vadd.f32 %v2458_v21, %v2416_v41 }
 0x92d   :  { %v2460_v56 = vpop.f32.mrf.mxu0  ;;  %v2501_v40 = vpop.f32.mrf.mxu1 }
 0x92e   :  { %v2591_v19 = vadd.f32 %v2501_v40, %v2419_v35  ;;  %v2604_v2 = vmul.f32 0.5, %v2590_v54  ;;  %v2589_v10 = vadd.f32 %v2460_v56, %v2417_v57  ;;  %v2596_v6 = vmul.f32 0.5, %v2588_v1 }
 0x92f   :  { %v2462_v59 = vpop.f32.mrf.mxu0  ;;  %v2503_v49 = vpop.f32.mrf.mxu1 }
 0x930   :  { %v2605_v13 = vmul.f32 0.5, %v2591_v19  ;;  %2978 = vtanh.f32 %v2604_v2  ;;  %v2597_v4 = vmul.f32 0.5, %v2589_v10 }
 0x931   :  { %v2463_v42 = vpop.f32.mrf.mxu0  ;;  %v2504_v9 = vpop.f32.mrf.mxu1  ;;  %2980 = vtanh.f32 %v2596_v6 }
 0x932   :  { %2982 = vtanh.f32 %v2605_v13 }
 0x933   :  { %2984 = vtanh.f32 %v2597_v4 }
 0x93d   :  { %v2979_v39 = vpop.eup %2978 }
 0x93e   :  { %v2981_v34 = vpop.eup %2980  ;;  %v2608_v18 = vadd.f32 1.0, %v2979_v39 }
 0x93f   :  { %v2983_v58 = vpop.eup %2982  ;;  %v2600_v7 = vadd.f32 1.0, %v2981_v34 }
 0x940   :  { %v2985_v63 = vpop.eup %2984  ;;  %v2609_v29 = vadd.f32 1.0, %v2983_v58  ;;  %v2610_v36 = vmul.f32 0.5, %v2608_v18 }
 0x941   :  { %v2601_v27 = vadd.f32 1.0, %v2985_v63  ;;  %v2602_v44 = vmul.f32 0.5, %v2600_v7 }
 0x942   :  { %v2611_v45 = vmul.f32 0.5, %v2609_v29  ;;  %v2622_v52 = vmul.f32 %v2610_v36, %v4819_v47 }
 0x943   :  { %v2603_v32 = vmul.f32 0.5, %v2601_v27 }
 0x944   :  { %v2623_v20 = vmul.f32 %v2611_v45, %v4823_v11 }
 0x96b   :  { %v2540_v5 = vpop.f32.mrf.mxu0  ;;  %v2581_v23 = vpop.f32.mrf.mxu1 }
 0x96c   :  { %v2592_v15 = vadd.f32 %v2540_v5, %v2420_v28  ;;  %v2594_v62 = vadd.f32 %v2581_v23, %v2422_v8 }
 0x96d   :  { %v2542_v14 = vpop.f32.mrf.mxu0  ;;  %v2583_v26 = vpop.f32.mrf.mxu1 }
 0x96e   :  { %2986 = vtanh.f32 %v2592_v15  ;;  %v2593_v25 = vadd.f32 %v2542_v14, %v2421_v16  ;;  %v2595_v22 = vadd.f32 %v2583_v26, %v2423_v31  ;;  %v2614_v55 = vmul.f32 0.5, %v2594_v62 }
 0x96f   :  { %v2544_v46 = vpop.f32.mrf.mxu0  ;;  %v2585_v12 = vpop.f32.mrf.mxu1 }
 0x970   :  { %2988 = vtanh.f32 %v2593_v25  ;;  %v2615_v60 = vmul.f32 0.5, %v2595_v22 }
 0x971   :  { %v2545_v30 = vpop.f32.mrf.mxu0  ;;  %v2586_v50 = vpop.f32.mrf.mxu1  ;;  %2990 = vtanh.f32 %v2614_v55 }
 0x972   :  { %2992 = vtanh.f32 %v2615_v60 }
 0x97b   :  { %v2987_v37 = vpop.eup %2986 }
 0x97c   :  { %v2624_v48 = vmul.f32 %v2987_v37, %v2602_v44 }
 0x97d   :  { %v2989_v51 = vpop.eup %2988 }
 0x97e   :  { %v2626_v53 = vadd.f32 %v2624_v48, %v2622_v52  ;;  %v2625_v24 = vmul.f32 %v2989_v51, %v2603_v32  ;;  %v2991_v21 = vpop.eup %2990 }
 0x97f   :  { %v2993_v47 = vpop.eup %2992  ;;  %v2618_v43 = vadd.f32 1.0, %v2991_v21 }
 0x980   :  { %2994 = vtanh.f32 %v2626_v53  ;;  %2644 = vst [vmem:[%s4929_s4] sm:$0xff] %v2626_v53  ;;  %v2627_v0 = vadd.f32 %v2625_v24, %v2623_v20  ;;  %v2619_v56 = vadd.f32 1.0, %v2993_v47 }
 0x981   :  { %v2620_v40 = vmul.f32 0.5, %v2618_v43 }
 0x982   :  { %2996 = vtanh.f32 %v2627_v0  ;;  %2645 = vst [vmem:[%s4929_s4 + $0x8] sm:$0xff] %v2627_v0  ;;  %v2621_v11 = vmul.f32 0.5, %v2619_v56 }
 0x98d   :  { %v2995_v59 = vpop.eup %2994 }
 0x98e   :  { %v2630_v49 = vmul.f32 %v2995_v59, %v2620_v40 }
 0x98f   :  { %v2997_v42 = vpop.eup %2996 }
 0x990   :  { %2642 = vst [vmem:[%s4930_s3] sm:$0xff] %v2630_v49  ;;  %v2631_v9 = vmul.f32 %v2997_v42, %v2621_v11 }
 0x992   :  { %v2836_v38 = vpack.c.bf16 %v2631_v9, %v2630_v49  ;;  %2643 = vst [vmem:[%s4930_s3 + $0x8] sm:$0xff] %v2631_v9 }
 0x994   :  { %2828 = vst [vmem:[%s4928_s2 + $0x38] sm:$0xff] %v2836_v38 }

</bundles_post_ra>
